<compile_context>
chip_gen: v6e
topology: v6e:2x2x1
jax: 0.10.0
libtpu: 0.0.40
codegen_flags: <defaults>
</compile_context>

<pallas_src>
import functools

import jax
import jax.numpy as jnp
from jax.experimental import pallas as pl
from jax.experimental.pallas import tpu as pltpu

BN_EPS = 1e-5

# MXU operand dtype.  Set to jnp.bfloat16 on v6e/v7x for ~2x matmul throughput
# (accumulation stays f32 via preferred_element_type).  Default f32 keeps the
# PyTorch forward numerics bit-for-bit comparable.
MXU_DTYPE = jnp.float32

# Explicit scoped-VMEM budget (v7x: 64 MiB physical, 32 MiB default scope).
_VMEM_LIMIT = 48 * 1024 * 1024

_COMPILER_PARAMS = pltpu.CompilerParams(
    dimension_semantics=("parallel", "parallel"),
    vmem_limit_bytes=_VMEM_LIMIT,
)


# ---------------------------------------------------------------------------
# Pass 1: 3x3 conv (in-kernel, no im2col) + per-tile BN partial statistics.
# ---------------------------------------------------------------------------
def _conv_stats_kernel(x_ref, w_ref, y_ref, ysum_ref, ysq_ref, *, width, tile_h):
    """One tile of tile_h output rows of one image.

    x_ref : ((H+2)*W + 2, Cin)  H-padded, row-major flattened image (+1 guard row
            front/back so the kx-shifted reads stay inside the block).
    w_ref : (9, Cin, Cout)      taps ordered (ky, kx).
    y_ref : (tile_h*W, Cout)    raw conv output tile (pre-BN).
    ysum_ref / ysq_ref : (1, Cout) per-tile partial sum / sum-of-squares.
    """
    tile_m, cout = y_ref.shape
    cin = x_ref.shape[-1]
    t = pl.program_id(1)

    # Output-column index of every row of the tile; zero the taps that would have
    # read the (virtual) left / right zero padding.
    col = jax.lax.broadcasted_iota(jnp.int32, (tile_m, cin), 0) % width
    left_edge = col == 0
    right_edge = col == width - 1

    acc = jnp.zeros((tile_m, cout), jnp.float32)
    for ky in range(3):
        for kx in range(3):
            start = (t * tile_h + ky) * width + kx
            slab = x_ref[pl.ds(start, tile_m), :]            # (tile_m, Cin)
            if kx == 0:
                slab = jnp.where(left_edge, 0.0, slab)
            elif kx == 2:
                slab = jnp.where(right_edge, 0.0, slab)
            acc = acc + jnp.dot(
                slab.astype(MXU_DTYPE),
                w_ref[3 * ky + kx].astype(MXU_DTYPE),
                preferred_element_type=jnp.float32,
            )

    y_ref[...] = acc
    ysum_ref[...] = jnp.sum(acc, axis=0, keepdims=True)
    ysq_ref[...] = jnp.sum(acc * acc, axis=0, keepdims=True)


# ---------------------------------------------------------------------------
# Pass 2a: y*scale + shift, ReLU (no pooling).
# ---------------------------------------------------------------------------
def _bn_relu_kernel(y_ref, sc_ref, sh_ref, o_ref):
    o_ref[...] = jnp.maximum(y_ref[...] * sc_ref[...] + sh_ref[...], 0.0)


# ---------------------------------------------------------------------------
# Pass 2b: y*scale + shift, ReLU, fused 2x2 max-pool.
# ---------------------------------------------------------------------------
def _bn_relu_pool_kernel(y_ref, sc_ref, sh_ref, o_ref, hrow_ref):
    t_hp, w_p, _ = o_ref.shape
    w_in = y_ref.shape[1]
    z = jnp.maximum(y_ref[...] * sc_ref[...] + sh_ref[...], 0.0)   # (2*t_hp, W, C)
    # Pool over H: pair adjacent rows (leading-dim reshape is layout-free).
    hrow_ref[...] = jnp.max(z.reshape(t_hp, 2, w_in, z.shape[-1]), axis=1)
    # Pool over W: strided reads of even / odd columns from the VMEM scratch.
    even = hrow_ref[:, pl.ds(0, w_p, stride=2), :]
    odd = hrow_ref[:, pl.ds(1, w_p, stride=2), :]
    o_ref[...] = jnp.maximum(even, odd)


# ---------------------------------------------------------------------------
# Tile-size selection.
# ---------------------------------------------------------------------------
def _pick_tile_h(h, w, max_rows=512):
    """Largest divisor of h whose row tile (tile_h*w) fits max_rows rows and keeps
    the second-minor block dim a multiple of 8 (falls back to the full extent)."""
    best = None
    for th in range(1, h + 1):
        if h % th:
            continue
        rows = th * w
        if rows <= max_rows and rows % 8 == 0:
            best = th
    return best if best is not None else h


def _pick_tile_hp(hp, w, max_rows=512):
    best = 1
    for th in range(1, hp + 1):
        if hp % th == 0 and 2 * th * w <= max_rows:
            best = th
    return best


# ---------------------------------------------------------------------------
# One conv layer: conv -> BN(train batch stats) -> ReLU -> [maxpool 2x2].
# ---------------------------------------------------------------------------
def _conv_bn_relu_layer(x, w, gamma, beta, pool):
    """x: (N, H, W, Cin) f32 NHWC -> (N, H', W', Cout) f32 NHWC."""
    n, h, wi, cin = x.shape
    cout = w.shape[0]

    # ---- pass 1: conv + BN partials ---------------------------------------
    xp = jnp.pad(x, ((0, 0), (1, 1), (0, 0), (0, 0)))                 # pad H only
    xflat = jnp.pad(xp.reshape(n, (h + 2) * wi, cin), ((0, 0), (1, 1), (0, 0)))
    l_flat = (h + 2) * wi + 2

    # torch weight (Cout, Cin, kH, kW) -> (kH*kW, Cin, Cout)
    w9 = jnp.transpose(w, (2, 3, 1, 0)).reshape(9, cin, cout)

    tile_h = _pick_tile_h(h, wi)
    n_t = h // tile_h
    tile_m = tile_h * wi

    y, ysum, ysq = pl.pallas_call(
        functools.partial(_conv_stats_kernel, width=wi, tile_h=tile_h),
        grid=(n, n_t),
        in_specs=[
            pl.BlockSpec((None, l_flat, cin), lambda i, j: (i, 0, 0)),
            pl.BlockSpec((9, cin, cout), lambda i, j: (0, 0, 0)),
        ],
        out_specs=[
            pl.BlockSpec((None, tile_m, cout), lambda i, j: (i, j, 0)),
            pl.BlockSpec((None, None, 1, cout), lambda i, j: (i, j, 0, 0)),
            pl.BlockSpec((None, None, 1, cout), lambda i, j: (i, j, 0, 0)),
        ],
        out_shape=[
            jax.ShapeDtypeStruct((n, h * wi, cout), jnp.float32),
            jax.ShapeDtypeStruct((n, n_t, 1, cout), jnp.float32),
            jax.ShapeDtypeStruct((n, n_t, 1, cout), jnp.float32),
        ],
        compiler_params=_COMPILER_PARAMS,
    )(xflat, w9)
    # TODO(synk): for very large H*W the per-image input block should be split with
    # manual halo DMAs instead of keeping the whole padded image resident in VMEM.

    # ---- BN batch stats -> folded scale/shift (tiny, plain JAX) ------------
    m_total = jnp.float32(n * h * wi)
    mean = jnp.sum(ysum, axis=(0, 1, 2)) / m_total
    var = jnp.maximum(jnp.sum(ysq, axis=(0, 1, 2)) / m_total - mean * mean, 0.0)
    inv_std = jax.lax.rsqrt(var + BN_EPS)
    scale = (gamma * inv_std).reshape(1, cout)
    shift = (beta - mean * gamma * inv_std).reshape(1, cout)
    # NOTE: the conv bias is intentionally not used: train-mode BN mean-centering
    # cancels it exactly.
    # TODO(synk): BatchNorm running_mean/running_var momentum updates are a
    # training-time side effect with no influence on this forward output; omitted.

    # ---- pass 2: affine + ReLU (+ fused 2x2 max-pool) -----------------------
    if not pool:
        out = pl.pallas_call(
            _bn_relu_kernel,
            grid=(n, n_t),
            in_specs=[
                pl.BlockSpec((None, tile_m, cout), lambda i, j: (i, j, 0)),
                pl.BlockSpec((1, cout), lambda i, j: (0, 0)),
                pl.BlockSpec((1, cout), lambda i, j: (0, 0)),
            ],
            out_specs=pl.BlockSpec((None, tile_m, cout), lambda i, j: (i, j, 0)),
            out_shape=jax.ShapeDtypeStruct((n, h * wi, cout), jnp.float32),
            compiler_params=_COMPILER_PARAMS,
        )(y, scale, shift)
        return out.reshape(n, h, wi, cout)

    hp, wp = h // 2, wi // 2
    tile_hp = _pick_tile_hp(hp, wi)
    y4 = y.reshape(n, h, wi, cout)  # free view of the pass-1 output
    out = pl.pallas_call(
        _bn_relu_pool_kernel,
        grid=(n, hp // tile_hp),
        in_specs=[
            pl.BlockSpec((None, 2 * tile_hp, wi, cout), lambda i, j: (i, j, 0, 0)),
            pl.BlockSpec((1, cout), lambda i, j: (0, 0)),
            pl.BlockSpec((1, cout), lambda i, j: (0, 0)),
        ],
        out_specs=pl.BlockSpec((None, tile_hp, wp, cout), lambda i, j: (i, j, 0, 0)),
        out_shape=jax.ShapeDtypeStruct((n, hp, wp, cout), jnp.float32),
        scratch_shapes=[pltpu.VMEM((tile_hp, wi, cout), jnp.float32)],
        compiler_params=_COMPILER_PARAMS,
    )(y4, scale, shift)
    return out


# ---------------------------------------------------------------------------
# Parameter init (mirrors nn.Conv2d default init; BN affine defaults).
# ---------------------------------------------------------------------------
def init_params(key, in_features, out_features, num_conv):
    feats = [in_features] + [out_features] * num_conv
    params = []
    for i in range(num_conv):
        cin, cout = feats[i], feats[i + 1]
        key, k_w, k_b = jax.random.split(key, 3)
        fan_in = cin * 3 * 3
        bound = 1.0 / (fan_in ** 0.5)
        w = jax.random.uniform(k_w, (cout, cin, 3, 3), jnp.float32, -bound, bound)
        b = jax.random.uniform(k_b, (cout,), jnp.float32, -bound, bound)
        gamma = jnp.ones((cout,), jnp.float32)   # BN weight default
        beta = jnp.zeros((cout,), jnp.float32)   # BN bias default
        params.append((w, b, gamma, beta))
    return params


# ---------------------------------------------------------------------------
# ConvBlock forward (NCHW in / NCHW out, matching the PyTorch module).
# ---------------------------------------------------------------------------
def conv_block_forward(x_nchw, params, pool=False):
    x = jnp.transpose(x_nchw, (0, 2, 3, 1)).astype(jnp.float32)  # NCHW -> NHWC
    for (w, _b, gamma, beta) in params:
        x = _conv_bn_relu_layer(x, w, gamma, beta, pool)
    return jnp.transpose(x, (0, 3, 1, 2))                         # NHWC -> NCHW


if __name__ == "__main__":
    key = jax.random.PRNGKey(0)
    k_x, k_p = jax.random.split(key)

    # ConvBlock(in_features=4, out_features=8, num_conv=2, pool=True)
    x = jax.random.normal(k_x, (2, 4, 16, 16), jnp.float32)  # NCHW
    params = init_params(k_p, in_features=4, out_features=8, num_conv=2)

    fwd = jax.jit(functools.partial(conv_block_forward, pool=True))
    out = jax.block_until_ready(fwd(x, params))

    # two conv+pool stages: 16 -> 8 -> 4 spatial, 8 channels
    assert out.shape == (2, 8, 4, 4), out.shape
    assert bool(jnp.all(out >= 0.0))  # ReLU output
    print("KERNEL_OK")
</pallas_src>

<mosaic_0001>
module attributes {stable_mosaic.version = 11 : i64} {
  func.func @_conv_stats_kernel(%arg0: i32, %arg1: i32, %arg2: memref<1x290x4xf32, #tpu.memory_space<vmem>>, %arg3: memref<9x4x8xf32, #tpu.memory_space<vmem>>, %arg4: memref<1x256x8xf32, #tpu.memory_space<vmem>>, %arg5: memref<1x1x1x8xf32, #tpu.memory_space<vmem>>, %arg6: memref<1x1x1x8xf32, #tpu.memory_space<vmem>>) attributes {dimension_semantics = [#tpu.dimension_semantics<parallel>, #tpu.dimension_semantics<parallel>], iteration_bounds = array<i64: 2, 1>, scalar_prefetch = 0 : i64, scratch_operands = 0 : i64, tpu.core_type = #tpu.core_type<tc>, window_params = [{transform_indices = @transform_0, window_bounds = array<i64: 1, 290, 4>}, {pipeline_mode = #tpu.pipeline_mode<synchronous>, transform_indices = @transform_1, window_bounds = array<i64: 9, 4, 8>}, {transform_indices = @transform_2, window_bounds = array<i64: 1, 256, 8>}, {transform_indices = @transform_3, window_bounds = array<i64: 1, 1, 1, 8>}, {transform_indices = @transform_4, window_bounds = array<i64: 1, 1, 1, 8>}]} {
    %0 = tpu.iota {dimensions = array<i32: 0>} : vector<256x4xi32>
    %c16_i32 = arith.constant 16 : i32
    %c0_i32 = arith.constant 0 : i32
    %1 = arith.cmpi eq, %c16_i32, %c0_i32 : i32
    %c1_i32 = arith.constant 1 : i32
    %2 = arith.select %1, %c1_i32, %c16_i32 : i32
    %3 = vector.broadcast %2 : i32 to vector<256x4xi32>
    %4 = arith.remsi %0, %3 : vector<256x4xi32>
    %c0_i32_0 = arith.constant 0 : i32
    %5 = vector.broadcast %c0_i32_0 : i32 to vector<256x4xi32>
    %6 = arith.cmpi ne, %4, %5 : vector<256x4xi32>
    %c0_i32_1 = arith.constant 0 : i32
    %7 = vector.broadcast %c0_i32_1 : i32 to vector<256x4xi32>
    %8 = arith.cmpi slt, %4, %7 : vector<256x4xi32>
    %c0_i32_2 = arith.constant 0 : i32
    %9 = arith.cmpi slt, %2, %c0_i32_2 : i32
    %10 = vector.broadcast %9 : i1 to vector<256x4xi1>
    %11 = vector.broadcast %10 : vector<256x4xi1> to vector<256x4xi1>
    %12 = arith.xori %8, %11 : vector<256x4xi1>
    %13 = arith.andi %12, %6 : vector<256x4xi1>
    %14 = vector.broadcast %2 : i32 to vector<256x4xi32>
    %15 = arith.addi %4, %14 : vector<256x4xi32>
    %16 = arith.select %13, %15, %4 : vector<256x4xi1>, vector<256x4xi32>
    %c0_i32_3 = arith.constant 0 : i32
    %17 = vector.broadcast %c0_i32_3 : i32 to vector<256x4xi32>
    %18 = arith.cmpi eq, %16, %17 : vector<256x4xi32>
    %c15_i32 = arith.constant 15 : i32
    %19 = vector.broadcast %c15_i32 : i32 to vector<256x4xi32>
    %20 = arith.cmpi eq, %16, %19 : vector<256x4xi32>
    %cst = arith.constant 0.000000e+00 : f32
    %21 = vector.broadcast %cst : f32 to vector<256x8xf32>
    %c16_i32_4 = arith.constant 16 : i32
    %22 = arith.muli %arg1, %c16_i32_4 : i32
    %c0_i32_5 = arith.constant 0 : i32
    %23 = arith.addi %22, %c0_i32_5 : i32
    %c16_i32_6 = arith.constant 16 : i32
    %24 = arith.muli %23, %c16_i32_6 : i32
    %c0_i32_7 = arith.constant 0 : i32
    %25 = arith.addi %24, %c0_i32_7 : i32
    %c0 = arith.constant 0 : index
    %26 = arith.index_cast %25 : i32 to index
    %c0_8 = arith.constant 0 : index
    %27 = vector.load %arg2[%c0, %26, %c0_8] : memref<1x290x4xf32, #tpu.memory_space<vmem>>, vector<1x256x4xf32>
    %28 = vector.shape_cast %27 : vector<1x256x4xf32> to vector<256x4xf32>
    %cst_9 = arith.constant 0.000000e+00 : f32
    %29 = vector.broadcast %cst_9 : f32 to vector<256x4xf32>
    %30 = arith.select %18, %29, %28 : vector<256x4xi1>, vector<256x4xf32>
    %c0_10 = arith.constant 0 : index
    %c0_11 = arith.constant 0 : index
    %c0_12 = arith.constant 0 : index
    %31 = vector.load %arg3[%c0_10, %c0_11, %c0_12] : memref<9x4x8xf32, #tpu.memory_space<vmem>>, vector<1x4x8xf32>
    %32 = vector.shape_cast %31 : vector<1x4x8xf32> to vector<4x8xf32>
    %cst_13 = arith.constant dense<0.000000e+00> : vector<256x8xf32>
    %33 = tpu.matmul %30, %32, %cst_13 {dimension_numbers = #tpu.dot_dimension_numbers<[1], [0], [0], [1], [0, 0, 1, 1], [], []>} : vector<256x4xf32>, vector<4x8xf32>, vector<256x8xf32> -> vector<256x8xf32>
    %34 = arith.addf %21, %33 : vector<256x8xf32>
    %c16_i32_14 = arith.constant 16 : i32
    %35 = arith.muli %arg1, %c16_i32_14 : i32
    %c0_i32_15 = arith.constant 0 : i32
    %36 = arith.addi %35, %c0_i32_15 : i32
    %c16_i32_16 = arith.constant 16 : i32
    %37 = arith.muli %36, %c16_i32_16 : i32
    %c1_i32_17 = arith.constant 1 : i32
    %38 = arith.addi %37, %c1_i32_17 : i32
    %c0_18 = arith.constant 0 : index
    %39 = arith.index_cast %38 : i32 to index
    %c0_19 = arith.constant 0 : index
    %40 = vector.load %arg2[%c0_18, %39, %c0_19] : memref<1x290x4xf32, #tpu.memory_space<vmem>>, vector<1x256x4xf32>
    %41 = vector.shape_cast %40 : vector<1x256x4xf32> to vector<256x4xf32>
    %c1 = arith.constant 1 : index
    %c0_20 = arith.constant 0 : index
    %c0_21 = arith.constant 0 : index
    %42 = vector.load %arg3[%c1, %c0_20, %c0_21] : memref<9x4x8xf32, #tpu.memory_space<vmem>>, vector<1x4x8xf32>
    %43 = vector.shape_cast %42 : vector<1x4x8xf32> to vector<4x8xf32>
    %cst_22 = arith.constant dense<0.000000e+00> : vector<256x8xf32>
    %44 = tpu.matmul %41, %43, %cst_22 {dimension_numbers = #tpu.dot_dimension_numbers<[1], [0], [0], [1], [0, 0, 1, 1], [], []>} : vector<256x4xf32>, vector<4x8xf32>, vector<256x8xf32> -> vector<256x8xf32>
    %45 = arith.addf %34, %44 : vector<256x8xf32>
    %c16_i32_23 = arith.constant 16 : i32
    %46 = arith.muli %arg1, %c16_i32_23 : i32
    %c0_i32_24 = arith.constant 0 : i32
    %47 = arith.addi %46, %c0_i32_24 : i32
    %c16_i32_25 = arith.constant 16 : i32
    %48 = arith.muli %47, %c16_i32_25 : i32
    %c2_i32 = arith.constant 2 : i32
    %49 = arith.addi %48, %c2_i32 : i32
    %c0_26 = arith.constant 0 : index
    %50 = arith.index_cast %49 : i32 to index
    %c0_27 = arith.constant 0 : index
    %51 = vector.load %arg2[%c0_26, %50, %c0_27] : memref<1x290x4xf32, #tpu.memory_space<vmem>>, vector<1x256x4xf32>
    %52 = vector.shape_cast %51 : vector<1x256x4xf32> to vector<256x4xf32>
    %cst_28 = arith.constant 0.000000e+00 : f32
    %53 = vector.broadcast %cst_28 : f32 to vector<256x4xf32>
    %54 = arith.select %20, %53, %52 : vector<256x4xi1>, vector<256x4xf32>
    %c2 = arith.constant 2 : index
    %c0_29 = arith.constant 0 : index
    %c0_30 = arith.constant 0 : index
    %55 = vector.load %arg3[%c2, %c0_29, %c0_30] : memref<9x4x8xf32, #tpu.memory_space<vmem>>, vector<1x4x8xf32>
    %56 = vector.shape_cast %55 : vector<1x4x8xf32> to vector<4x8xf32>
    %cst_31 = arith.constant dense<0.000000e+00> : vector<256x8xf32>
    %57 = tpu.matmul %54, %56, %cst_31 {dimension_numbers = #tpu.dot_dimension_numbers<[1], [0], [0], [1], [0, 0, 1, 1], [], []>} : vector<256x4xf32>, vector<4x8xf32>, vector<256x8xf32> -> vector<256x8xf32>
    %58 = arith.addf %45, %57 : vector<256x8xf32>
    %c16_i32_32 = arith.constant 16 : i32
    %59 = arith.muli %arg1, %c16_i32_32 : i32
    %c1_i32_33 = arith.constant 1 : i32
    %60 = arith.addi %59, %c1_i32_33 : i32
    %c16_i32_34 = arith.constant 16 : i32
    %61 = arith.muli %60, %c16_i32_34 : i32
    %c0_i32_35 = arith.constant 0 : i32
    %62 = arith.addi %61, %c0_i32_35 : i32
    %c0_36 = arith.constant 0 : index
    %63 = arith.index_cast %62 : i32 to index
    %c0_37 = arith.constant 0 : index
    %64 = vector.load %arg2[%c0_36, %63, %c0_37] : memref<1x290x4xf32, #tpu.memory_space<vmem>>, vector<1x256x4xf32>
    %65 = vector.shape_cast %64 : vector<1x256x4xf32> to vector<256x4xf32>
    %cst_38 = arith.constant 0.000000e+00 : f32
    %66 = vector.broadcast %cst_38 : f32 to vector<256x4xf32>
    %67 = arith.select %18, %66, %65 : vector<256x4xi1>, vector<256x4xf32>
    %c3 = arith.constant 3 : index
    %c0_39 = arith.constant 0 : index
    %c0_40 = arith.constant 0 : index
    %68 = vector.load %arg3[%c3, %c0_39, %c0_40] : memref<9x4x8xf32, #tpu.memory_space<vmem>>, vector<1x4x8xf32>
    %69 = vector.shape_cast %68 : vector<1x4x8xf32> to vector<4x8xf32>
    %cst_41 = arith.constant dense<0.000000e+00> : vector<256x8xf32>
    %70 = tpu.matmul %67, %69, %cst_41 {dimension_numbers = #tpu.dot_dimension_numbers<[1], [0], [0], [1], [0, 0, 1, 1], [], []>} : vector<256x4xf32>, vector<4x8xf32>, vector<256x8xf32> -> vector<256x8xf32>
    %71 = arith.addf %58, %70 : vector<256x8xf32>
    %c16_i32_42 = arith.constant 16 : i32
    %72 = arith.muli %arg1, %c16_i32_42 : i32
    %c1_i32_43 = arith.constant 1 : i32
    %73 = arith.addi %72, %c1_i32_43 : i32
    %c16_i32_44 = arith.constant 16 : i32
    %74 = arith.muli %73, %c16_i32_44 : i32
    %c1_i32_45 = arith.constant 1 : i32
    %75 = arith.addi %74, %c1_i32_45 : i32
    %c0_46 = arith.constant 0 : index
    %76 = arith.index_cast %75 : i32 to index
    %c0_47 = arith.constant 0 : index
    %77 = vector.load %arg2[%c0_46, %76, %c0_47] : memref<1x290x4xf32, #tpu.memory_space<vmem>>, vector<1x256x4xf32>
    %78 = vector.shape_cast %77 : vector<1x256x4xf32> to vector<256x4xf32>
    %c4 = arith.constant 4 : index
    %c0_48 = arith.constant 0 : index
    %c0_49 = arith.constant 0 : index
    %79 = vector.load %arg3[%c4, %c0_48, %c0_49] : memref<9x4x8xf32, #tpu.memory_space<vmem>>, vector<1x4x8xf32>
    %80 = vector.shape_cast %79 : vector<1x4x8xf32> to vector<4x8xf32>
    %cst_50 = arith.constant dense<0.000000e+00> : vector<256x8xf32>
    %81 = tpu.matmul %78, %80, %cst_50 {dimension_numbers = #tpu.dot_dimension_numbers<[1], [0], [0], [1], [0, 0, 1, 1], [], []>} : vector<256x4xf32>, vector<4x8xf32>, vector<256x8xf32> -> vector<256x8xf32>
    %82 = arith.addf %71, %81 : vector<256x8xf32>
    %c16_i32_51 = arith.constant 16 : i32
    %83 = arith.muli %arg1, %c16_i32_51 : i32
    %c1_i32_52 = arith.constant 1 : i32
    %84 = arith.addi %83, %c1_i32_52 : i32
    %c16_i32_53 = arith.constant 16 : i32
    %85 = arith.muli %84, %c16_i32_53 : i32
    %c2_i32_54 = arith.constant 2 : i32
    %86 = arith.addi %85, %c2_i32_54 : i32
    %c0_55 = arith.constant 0 : index
    %87 = arith.index_cast %86 : i32 to index
    %c0_56 = arith.constant 0 : index
    %88 = vector.load %arg2[%c0_55, %87, %c0_56] : memref<1x290x4xf32, #tpu.memory_space<vmem>>, vector<1x256x4xf32>
    %89 = vector.shape_cast %88 : vector<1x256x4xf32> to vector<256x4xf32>
    %cst_57 = arith.constant 0.000000e+00 : f32
    %90 = vector.broadcast %cst_57 : f32 to vector<256x4xf32>
    %91 = arith.select %20, %90, %89 : vector<256x4xi1>, vector<256x4xf32>
    %c5 = arith.constant 5 : index
    %c0_58 = arith.constant 0 : index
    %c0_59 = arith.constant 0 : index
    %92 = vector.load %arg3[%c5, %c0_58, %c0_59] : memref<9x4x8xf32, #tpu.memory_space<vmem>>, vector<1x4x8xf32>
    %93 = vector.shape_cast %92 : vector<1x4x8xf32> to vector<4x8xf32>
    %cst_60 = arith.constant dense<0.000000e+00> : vector<256x8xf32>
    %94 = tpu.matmul %91, %93, %cst_60 {dimension_numbers = #tpu.dot_dimension_numbers<[1], [0], [0], [1], [0, 0, 1, 1], [], []>} : vector<256x4xf32>, vector<4x8xf32>, vector<256x8xf32> -> vector<256x8xf32>
    %95 = arith.addf %82, %94 : vector<256x8xf32>
    %c16_i32_61 = arith.constant 16 : i32
    %96 = arith.muli %arg1, %c16_i32_61 : i32
    %c2_i32_62 = arith.constant 2 : i32
    %97 = arith.addi %96, %c2_i32_62 : i32
    %c16_i32_63 = arith.constant 16 : i32
    %98 = arith.muli %97, %c16_i32_63 : i32
    %c0_i32_64 = arith.constant 0 : i32
    %99 = arith.addi %98, %c0_i32_64 : i32
    %c0_65 = arith.constant 0 : index
    %100 = arith.index_cast %99 : i32 to index
    %c0_66 = arith.constant 0 : index
    %101 = vector.load %arg2[%c0_65, %100, %c0_66] : memref<1x290x4xf32, #tpu.memory_space<vmem>>, vector<1x256x4xf32>
    %102 = vector.shape_cast %101 : vector<1x256x4xf32> to vector<256x4xf32>
    %cst_67 = arith.constant 0.000000e+00 : f32
    %103 = vector.broadcast %cst_67 : f32 to vector<256x4xf32>
    %104 = arith.select %18, %103, %102 : vector<256x4xi1>, vector<256x4xf32>
    %c6 = arith.constant 6 : index
    %c0_68 = arith.constant 0 : index
    %c0_69 = arith.constant 0 : index
    %105 = vector.load %arg3[%c6, %c0_68, %c0_69] : memref<9x4x8xf32, #tpu.memory_space<vmem>>, vector<1x4x8xf32>
    %106 = vector.shape_cast %105 : vector<1x4x8xf32> to vector<4x8xf32>
    %cst_70 = arith.constant dense<0.000000e+00> : vector<256x8xf32>
    %107 = tpu.matmul %104, %106, %cst_70 {dimension_numbers = #tpu.dot_dimension_numbers<[1], [0], [0], [1], [0, 0, 1, 1], [], []>} : vector<256x4xf32>, vector<4x8xf32>, vector<256x8xf32> -> vector<256x8xf32>
    %108 = arith.addf %95, %107 : vector<256x8xf32>
    %c16_i32_71 = arith.constant 16 : i32
    %109 = arith.muli %arg1, %c16_i32_71 : i32
    %c2_i32_72 = arith.constant 2 : i32
    %110 = arith.addi %109, %c2_i32_72 : i32
    %c16_i32_73 = arith.constant 16 : i32
    %111 = arith.muli %110, %c16_i32_73 : i32
    %c1_i32_74 = arith.constant 1 : i32
    %112 = arith.addi %111, %c1_i32_74 : i32
    %c0_75 = arith.constant 0 : index
    %113 = arith.index_cast %112 : i32 to index
    %c0_76 = arith.constant 0 : index
    %114 = vector.load %arg2[%c0_75, %113, %c0_76] : memref<1x290x4xf32, #tpu.memory_space<vmem>>, vector<1x256x4xf32>
    %115 = vector.shape_cast %114 : vector<1x256x4xf32> to vector<256x4xf32>
    %c7 = arith.constant 7 : index
    %c0_77 = arith.constant 0 : index
    %c0_78 = arith.constant 0 : index
    %116 = vector.load %arg3[%c7, %c0_77, %c0_78] : memref<9x4x8xf32, #tpu.memory_space<vmem>>, vector<1x4x8xf32>
    %117 = vector.shape_cast %116 : vector<1x4x8xf32> to vector<4x8xf32>
    %cst_79 = arith.constant dense<0.000000e+00> : vector<256x8xf32>
    %118 = tpu.matmul %115, %117, %cst_79 {dimension_numbers = #tpu.dot_dimension_numbers<[1], [0], [0], [1], [0, 0, 1, 1], [], []>} : vector<256x4xf32>, vector<4x8xf32>, vector<256x8xf32> -> vector<256x8xf32>
    %119 = arith.addf %108, %118 : vector<256x8xf32>
    %c16_i32_80 = arith.constant 16 : i32
    %120 = arith.muli %arg1, %c16_i32_80 : i32
    %c2_i32_81 = arith.constant 2 : i32
    %121 = arith.addi %120, %c2_i32_81 : i32
    %c16_i32_82 = arith.constant 16 : i32
    %122 = arith.muli %121, %c16_i32_82 : i32
    %c2_i32_83 = arith.constant 2 : i32
    %123 = arith.addi %122, %c2_i32_83 : i32
    %c0_84 = arith.constant 0 : index
    %124 = arith.index_cast %123 : i32 to index
    %c0_85 = arith.constant 0 : index
    %125 = vector.load %arg2[%c0_84, %124, %c0_85] : memref<1x290x4xf32, #tpu.memory_space<vmem>>, vector<1x256x4xf32>
    %126 = vector.shape_cast %125 : vector<1x256x4xf32> to vector<256x4xf32>
    %cst_86 = arith.constant 0.000000e+00 : f32
    %127 = vector.broadcast %cst_86 : f32 to vector<256x4xf32>
    %128 = arith.select %20, %127, %126 : vector<256x4xi1>, vector<256x4xf32>
    %c8 = arith.constant 8 : index
    %c0_87 = arith.constant 0 : index
    %c0_88 = arith.constant 0 : index
    %129 = vector.load %arg3[%c8, %c0_87, %c0_88] : memref<9x4x8xf32, #tpu.memory_space<vmem>>, vector<1x4x8xf32>
    %130 = vector.shape_cast %129 : vector<1x4x8xf32> to vector<4x8xf32>
    %cst_89 = arith.constant dense<0.000000e+00> : vector<256x8xf32>
    %131 = tpu.matmul %128, %130, %cst_89 {dimension_numbers = #tpu.dot_dimension_numbers<[1], [0], [0], [1], [0, 0, 1, 1], [], []>} : vector<256x4xf32>, vector<4x8xf32>, vector<256x8xf32> -> vector<256x8xf32>
    %132 = arith.addf %119, %131 : vector<256x8xf32>
    %c0_90 = arith.constant 0 : index
    %c0_91 = arith.constant 0 : index
    %c0_92 = arith.constant 0 : index
    %133 = vector.load %arg4[%c0_90, %c0_91, %c0_92] : memref<1x256x8xf32, #tpu.memory_space<vmem>>, vector<1x256x8xf32>
    %134 = vector.shape_cast %133 : vector<1x256x8xf32> to vector<256x8xf32>
    %135 = vector.shape_cast %132 : vector<256x8xf32> to vector<1x256x8xf32>
    tpu.vector_store %arg4[%c0_90, %c0_91, %c0_92], %135 {strides = array<i32>} : memref<1x256x8xf32, #tpu.memory_space<vmem>>, vector<1x256x8xf32>,
    %cst_93 = arith.constant dense<0.000000e+00> : vector<8xf32>
    %136 = vector.multi_reduction <add>, %132, %cst_93 [0] : vector<256x8xf32> to vector<8xf32>
    %137 = vector.shape_cast %136 : vector<8xf32> to vector<1x8xf32>
    %c0_94 = arith.constant 0 : index
    %c0_95 = arith.constant 0 : index
    %c0_96 = arith.constant 0 : index
    %c0_97 = arith.constant 0 : index
    %138 = vector.load %arg5[%c0_94, %c0_95, %c0_96, %c0_97] : memref<1x1x1x8xf32, #tpu.memory_space<vmem>>, vector<1x1x1x8xf32>
    %139 = vector.shape_cast %138 : vector<1x1x1x8xf32> to vector<1x8xf32>
    %140 = vector.shape_cast %137 : vector<1x8xf32> to vector<1x1x1x8xf32>
    tpu.vector_store %arg5[%c0_94, %c0_95, %c0_96, %c0_97], %140 {strides = array<i32>} : memref<1x1x1x8xf32, #tpu.memory_space<vmem>>, vector<1x1x1x8xf32>,
    %141 = arith.mulf %132, %132 : vector<256x8xf32>
    %cst_98 = arith.constant dense<0.000000e+00> : vector<8xf32>
    %142 = vector.multi_reduction <add>, %141, %cst_98 [0] : vector<256x8xf32> to vector<8xf32>
    %143 = vector.shape_cast %142 : vector<8xf32> to vector<1x8xf32>
    %c0_99 = arith.constant 0 : index
    %c0_100 = arith.constant 0 : index
    %c0_101 = arith.constant 0 : index
    %c0_102 = arith.constant 0 : index
    %144 = vector.load %arg6[%c0_99, %c0_100, %c0_101, %c0_102] : memref<1x1x1x8xf32, #tpu.memory_space<vmem>>, vector<1x1x1x8xf32>
    %145 = vector.shape_cast %144 : vector<1x1x1x8xf32> to vector<1x8xf32>
    %146 = vector.shape_cast %143 : vector<1x8xf32> to vector<1x1x1x8xf32>
    tpu.vector_store %arg6[%c0_99, %c0_100, %c0_101, %c0_102], %146 {strides = array<i32>} : memref<1x1x1x8xf32, #tpu.memory_space<vmem>>, vector<1x1x1x8xf32>,
    return
  }
  func.func @transform_0(%arg0: i32, %arg1: i32) -> (i32, i32, i32) {
    %c0_i32 = arith.constant 0 : i32
    %c0_i32_0 = arith.constant 0 : i32
    %c0_i32_1 = arith.constant 0 : i32
    return %arg0, %c0_i32, %c0_i32_0 : i32, i32, i32
  }
  func.func @transform_1(%arg0: i32, %arg1: i32) -> (i32, i32, i32) {
    %c0_i32 = arith.constant 0 : i32
    %c0_i32_0 = arith.constant 0 : i32
    %c0_i32_1 = arith.constant 0 : i32
    %c0_i32_2 = arith.constant 0 : i32
    return %c0_i32, %c0_i32_0, %c0_i32_1 : i32, i32, i32
  }
  func.func @transform_2(%arg0: i32, %arg1: i32) -> (i32, i32, i32) {
    %c0_i32 = arith.constant 0 : i32
    %c0_i32_0 = arith.constant 0 : i32
    return %arg0, %arg1, %c0_i32 : i32, i32, i32
  }
  func.func @transform_3(%arg0: i32, %arg1: i32) -> (i32, i32, i32, i32) {
    %c0_i32 = arith.constant 0 : i32
    %c0_i32_0 = arith.constant 0 : i32
    %c0_i32_1 = arith.constant 0 : i32
    return %arg0, %arg1, %c0_i32, %c0_i32_0 : i32, i32, i32, i32
  }
  func.func @transform_4(%arg0: i32, %arg1: i32) -> (i32, i32, i32, i32) {
    %c0_i32 = arith.constant 0 : i32
    %c0_i32_0 = arith.constant 0 : i32
    %c0_i32_1 = arith.constant 0 : i32
    return %arg0, %arg1, %c0_i32, %c0_i32_0 : i32, i32, i32, i32
  }
}

module attributes {stable_mosaic.version = 11 : i64} {
  func.func @_bn_relu_pool_kernel(%arg0: i32, %arg1: i32, %arg2: memref<1x16x16x8xf32, #tpu.memory_space<vmem>>, %arg3: memref<1x8xf32, #tpu.memory_space<vmem>>, %arg4: memref<1x8xf32, #tpu.memory_space<vmem>>, %arg5: memref<1x8x8x8xf32, #tpu.memory_space<vmem>>, %arg6: memref<8x16x8xf32, #tpu.memory_space<vmem>>) attributes {dimension_semantics = [#tpu.dimension_semantics<parallel>, #tpu.dimension_semantics<parallel>], iteration_bounds = array<i64: 2, 1>, scalar_prefetch = 0 : i64, scratch_operands = 1 : i64, tpu.core_type = #tpu.core_type<tc>, window_params = [{transform_indices = @transform_0, window_bounds = array<i64: 1, 16, 16, 8>}, {pipeline_mode = #tpu.pipeline_mode<synchronous>, transform_indices = @transform_1, window_bounds = array<i64: 1, 8>}, {pipeline_mode = #tpu.pipeline_mode<synchronous>, transform_indices = @transform_2, window_bounds = array<i64: 1, 8>}, {transform_indices = @transform_3, window_bounds = array<i64: 1, 8, 8, 8>}]} {
    %c0 = arith.constant 0 : index
    %c0_0 = arith.constant 0 : index
    %c0_1 = arith.constant 0 : index
    %c0_2 = arith.constant 0 : index
    %0 = vector.load %arg2[%c0, %c0_0, %c0_1, %c0_2] : memref<1x16x16x8xf32, #tpu.memory_space<vmem>>, vector<1x16x16x8xf32>
    %1 = vector.shape_cast %0 : vector<1x16x16x8xf32> to vector<16x16x8xf32>
    %c0_3 = arith.constant 0 : index
    %c0_4 = arith.constant 0 : index
    %2 = vector.load %arg3[%c0_3, %c0_4] : memref<1x8xf32, #tpu.memory_space<vmem>>, vector<1x8xf32>
    %3 = vector.shape_cast %2 : vector<1x8xf32> to vector<1x1x8xf32>
    %4 = vector.broadcast %3 : vector<1x1x8xf32> to vector<16x16x8xf32>
    %5 = arith.mulf %1, %4 : vector<16x16x8xf32>
    %c0_5 = arith.constant 0 : index
    %c0_6 = arith.constant 0 : index
    %6 = vector.load %arg4[%c0_5, %c0_6] : memref<1x8xf32, #tpu.memory_space<vmem>>, vector<1x8xf32>
    %7 = vector.shape_cast %6 : vector<1x8xf32> to vector<1x1x8xf32>
    %8 = vector.broadcast %7 : vector<1x1x8xf32> to vector<16x16x8xf32>
    %9 = arith.addf %5, %8 : vector<16x16x8xf32>
    %cst = arith.constant 0.000000e+00 : f32
    %10 = vector.broadcast %cst : f32 to vector<16x16x8xf32>
    %11 = arith.maximumf %9, %10 : vector<16x16x8xf32>
    %12 = vector.shape_cast %11 : vector<16x16x8xf32> to vector<8x2x16x8xf32>
    %cst_7 = arith.constant dense<0xFF800000> : vector<8x16x8xf32>
    %13 = vector.multi_reduction <maximumf>, %12, %cst_7 [1] : vector<8x2x16x8xf32> to vector<8x16x8xf32>
    %c0_8 = arith.constant 0 : index
    %c0_9 = arith.constant 0 : index
    %c0_10 = arith.constant 0 : index
    %14 = vector.load %arg6[%c0_8, %c0_9, %c0_10] : memref<8x16x8xf32, #tpu.memory_space<vmem>>, vector<8x16x8xf32>
    tpu.vector_store %arg6[%c0_8, %c0_9, %c0_10], %13 {strides = array<i32>} : memref<8x16x8xf32, #tpu.memory_space<vmem>>, vector<8x16x8xf32>,
    %c0_11 = arith.constant 0 : index
    %c0_12 = arith.constant 0 : index
    %c0_13 = arith.constant 0 : index
    %15 = tpu.strided_load %arg6[%c0_11, %c0_12, %c0_13] {strides = array<i32: 1, 2, 1>} : memref<8x16x8xf32, #tpu.memory_space<vmem>>, vector<8x8x8xf32>
    %c0_14 = arith.constant 0 : index
    %c1 = arith.constant 1 : index
    %c0_15 = arith.constant 0 : index
    %16 = tpu.strided_load %arg6[%c0_14, %c1, %c0_15] {strides = array<i32: 1, 2, 1>} : memref<8x16x8xf32, #tpu.memory_space<vmem>>, vector<8x8x8xf32>
    %17 = arith.maximumf %15, %16 : vector<8x8x8xf32>
    %c0_16 = arith.constant 0 : index
    %c0_17 = arith.constant 0 : index
    %c0_18 = arith.constant 0 : index
    %c0_19 = arith.constant 0 : index
    %18 = vector.load %arg5[%c0_16, %c0_17, %c0_18, %c0_19] : memref<1x8x8x8xf32, #tpu.memory_space<vmem>>, vector<1x8x8x8xf32>
    %19 = vector.shape_cast %18 : vector<1x8x8x8xf32> to vector<8x8x8xf32>
    %20 = vector.shape_cast %17 : vector<8x8x8xf32> to vector<1x8x8x8xf32>
    tpu.vector_store %arg5[%c0_16, %c0_17, %c0_18, %c0_19], %20 {strides = array<i32>} : memref<1x8x8x8xf32, #tpu.memory_space<vmem>>, vector<1x8x8x8xf32>,
    return
  }
  func.func @transform_0(%arg0: i32, %arg1: i32) -> (i32, i32, i32, i32) {
    %c0_i32 = arith.constant 0 : i32
    %c0_i32_0 = arith.constant 0 : i32
    %c0_i32_1 = arith.constant 0 : i32
    return %arg0, %arg1, %c0_i32, %c0_i32_0 : i32, i32, i32, i32
  }
  func.func @transform_1(%arg0: i32, %arg1: i32) -> (i32, i32) {
    %c0_i32 = arith.constant 0 : i32
    %c0_i32_0 = arith.constant 0 : i32
    %c0_i32_1 = arith.constant 0 : i32
    return %c0_i32, %c0_i32_0 : i32, i32
  }
  func.func @transform_2(%arg0: i32, %arg1: i32) -> (i32, i32) {
    %c0_i32 = arith.constant 0 : i32
    %c0_i32_0 = arith.constant 0 : i32
    %c0_i32_1 = arith.constant 0 : i32
    return %c0_i32, %c0_i32_0 : i32, i32
  }
  func.func @transform_3(%arg0: i32, %arg1: i32) -> (i32, i32, i32, i32) {
    %c0_i32 = arith.constant 0 : i32
    %c0_i32_0 = arith.constant 0 : i32
    %c0_i32_1 = arith.constant 0 : i32
    return %arg0, %arg1, %c0_i32, %c0_i32_0 : i32, i32, i32, i32
  }
}

module attributes {stable_mosaic.version = 11 : i64} {
  func.func @_conv_stats_kernel(%arg0: i32, %arg1: i32, %arg2: memref<1x82x8xf32, #tpu.memory_space<vmem>>, %arg3: memref<9x8x8xf32, #tpu.memory_space<vmem>>, %arg4: memref<1x64x8xf32, #tpu.memory_space<vmem>>, %arg5: memref<1x1x1x8xf32, #tpu.memory_space<vmem>>, %arg6: memref<1x1x1x8xf32, #tpu.memory_space<vmem>>) attributes {dimension_semantics = [#tpu.dimension_semantics<parallel>, #tpu.dimension_semantics<parallel>], iteration_bounds = array<i64: 2, 1>, scalar_prefetch = 0 : i64, scratch_operands = 0 : i64, tpu.core_type = #tpu.core_type<tc>, window_params = [{transform_indices = @transform_0, window_bounds = array<i64: 1, 82, 8>}, {pipeline_mode = #tpu.pipeline_mode<synchronous>, transform_indices = @transform_1, window_bounds = array<i64: 9, 8, 8>}, {transform_indices = @transform_2, window_bounds = array<i64: 1, 64, 8>}, {transform_indices = @transform_3, window_bounds = array<i64: 1, 1, 1, 8>}, {transform_indices = @transform_4, window_bounds = array<i64: 1, 1, 1, 8>}]} {
    %0 = tpu.iota {dimensions = array<i32: 0>} : vector<64x8xi32>
    %c8_i32 = arith.constant 8 : i32
    %c0_i32 = arith.constant 0 : i32
    %1 = arith.cmpi eq, %c8_i32, %c0_i32 : i32
    %c1_i32 = arith.constant 1 : i32
    %2 = arith.select %1, %c1_i32, %c8_i32 : i32
    %3 = vector.broadcast %2 : i32 to vector<64x8xi32>
    %4 = arith.remsi %0, %3 : vector<64x8xi32>
    %c0_i32_0 = arith.constant 0 : i32
    %5 = vector.broadcast %c0_i32_0 : i32 to vector<64x8xi32>
    %6 = arith.cmpi ne, %4, %5 : vector<64x8xi32>
    %c0_i32_1 = arith.constant 0 : i32
    %7 = vector.broadcast %c0_i32_1 : i32 to vector<64x8xi32>
    %8 = arith.cmpi slt, %4, %7 : vector<64x8xi32>
    %c0_i32_2 = arith.constant 0 : i32
    %9 = arith.cmpi slt, %2, %c0_i32_2 : i32
    %10 = vector.broadcast %9 : i1 to vector<64x8xi1>
    %11 = vector.broadcast %10 : vector<64x8xi1> to vector<64x8xi1>
    %12 = arith.xori %8, %11 : vector<64x8xi1>
    %13 = arith.andi %12, %6 : vector<64x8xi1>
    %14 = vector.broadcast %2 : i32 to vector<64x8xi32>
    %15 = arith.addi %4, %14 : vector<64x8xi32>
    %16 = arith.select %13, %15, %4 : vector<64x8xi1>, vector<64x8xi32>
    %c0_i32_3 = arith.constant 0 : i32
    %17 = vector.broadcast %c0_i32_3 : i32 to vector<64x8xi32>
    %18 = arith.cmpi eq, %16, %17 : vector<64x8xi32>
    %c7_i32 = arith.constant 7 : i32
    %19 = vector.broadcast %c7_i32 : i32 to vector<64x8xi32>
    %20 = arith.cmpi eq, %16, %19 : vector<64x8xi32>
    %cst = arith.constant 0.000000e+00 : f32
    %21 = vector.broadcast %cst : f32 to vector<64x8xf32>
    %c8_i32_4 = arith.constant 8 : i32
    %22 = arith.muli %arg1, %c8_i32_4 : i32
    %c0_i32_5 = arith.constant 0 : i32
    %23 = arith.addi %22, %c0_i32_5 : i32
    %c8_i32_6 = arith.constant 8 : i32
    %24 = arith.muli %23, %c8_i32_6 : i32
    %c0_i32_7 = arith.constant 0 : i32
    %25 = arith.addi %24, %c0_i32_7 : i32
    %c0 = arith.constant 0 : index
    %26 = arith.index_cast %25 : i32 to index
    %c0_8 = arith.constant 0 : index
    %27 = vector.load %arg2[%c0, %26, %c0_8] : memref<1x82x8xf32, #tpu.memory_space<vmem>>, vector<1x64x8xf32>
    %28 = vector.shape_cast %27 : vector<1x64x8xf32> to vector<64x8xf32>
    %cst_9 = arith.constant 0.000000e+00 : f32
    %29 = vector.broadcast %cst_9 : f32 to vector<64x8xf32>
    %30 = arith.select %18, %29, %28 : vector<64x8xi1>, vector<64x8xf32>
    %c0_10 = arith.constant 0 : index
    %c0_11 = arith.constant 0 : index
    %c0_12 = arith.constant 0 : index
    %31 = vector.load %arg3[%c0_10, %c0_11, %c0_12] : memref<9x8x8xf32, #tpu.memory_space<vmem>>, vector<1x8x8xf32>
    %32 = vector.shape_cast %31 : vector<1x8x8xf32> to vector<8x8xf32>
    %cst_13 = arith.constant dense<0.000000e+00> : vector<64x8xf32>
    %33 = tpu.matmul %30, %32, %cst_13 {dimension_numbers = #tpu.dot_dimension_numbers<[1], [0], [0], [1], [0, 0, 1, 1], [], []>} : vector<64x8xf32>, vector<8x8xf32>, vector<64x8xf32> -> vector<64x8xf32>
    %34 = arith.addf %21, %33 : vector<64x8xf32>
    %c8_i32_14 = arith.constant 8 : i32
    %35 = arith.muli %arg1, %c8_i32_14 : i32
    %c0_i32_15 = arith.constant 0 : i32
    %36 = arith.addi %35, %c0_i32_15 : i32
    %c8_i32_16 = arith.constant 8 : i32
    %37 = arith.muli %36, %c8_i32_16 : i32
    %c1_i32_17 = arith.constant 1 : i32
    %38 = arith.addi %37, %c1_i32_17 : i32
    %c0_18 = arith.constant 0 : index
    %39 = arith.index_cast %38 : i32 to index
    %c0_19 = arith.constant 0 : index
    %40 = vector.load %arg2[%c0_18, %39, %c0_19] : memref<1x82x8xf32, #tpu.memory_space<vmem>>, vector<1x64x8xf32>
    %41 = vector.shape_cast %40 : vector<1x64x8xf32> to vector<64x8xf32>
    %c1 = arith.constant 1 : index
    %c0_20 = arith.constant 0 : index
    %c0_21 = arith.constant 0 : index
    %42 = vector.load %arg3[%c1, %c0_20, %c0_21] : memref<9x8x8xf32, #tpu.memory_space<vmem>>, vector<1x8x8xf32>
    %43 = vector.shape_cast %42 : vector<1x8x8xf32> to vector<8x8xf32>
    %cst_22 = arith.constant dense<0.000000e+00> : vector<64x8xf32>
    %44 = tpu.matmul %41, %43, %cst_22 {dimension_numbers = #tpu.dot_dimension_numbers<[1], [0], [0], [1], [0, 0, 1, 1], [], []>} : vector<64x8xf32>, vector<8x8xf32>, vector<64x8xf32> -> vector<64x8xf32>
    %45 = arith.addf %34, %44 : vector<64x8xf32>
    %c8_i32_23 = arith.constant 8 : i32
    %46 = arith.muli %arg1, %c8_i32_23 : i32
    %c0_i32_24 = arith.constant 0 : i32
    %47 = arith.addi %46, %c0_i32_24 : i32
    %c8_i32_25 = arith.constant 8 : i32
    %48 = arith.muli %47, %c8_i32_25 : i32
    %c2_i32 = arith.constant 2 : i32
    %49 = arith.addi %48, %c2_i32 : i32
    %c0_26 = arith.constant 0 : index
    %50 = arith.index_cast %49 : i32 to index
    %c0_27 = arith.constant 0 : index
    %51 = vector.load %arg2[%c0_26, %50, %c0_27] : memref<1x82x8xf32, #tpu.memory_space<vmem>>, vector<1x64x8xf32>
    %52 = vector.shape_cast %51 : vector<1x64x8xf32> to vector<64x8xf32>
    %cst_28 = arith.constant 0.000000e+00 : f32
    %53 = vector.broadcast %cst_28 : f32 to vector<64x8xf32>
    %54 = arith.select %20, %53, %52 : vector<64x8xi1>, vector<64x8xf32>
    %c2 = arith.constant 2 : index
    %c0_29 = arith.constant 0 : index
    %c0_30 = arith.constant 0 : index
    %55 = vector.load %arg3[%c2, %c0_29, %c0_30] : memref<9x8x8xf32, #tpu.memory_space<vmem>>, vector<1x8x8xf32>
    %56 = vector.shape_cast %55 : vector<1x8x8xf32> to vector<8x8xf32>
    %cst_31 = arith.constant dense<0.000000e+00> : vector<64x8xf32>
    %57 = tpu.matmul %54, %56, %cst_31 {dimension_numbers = #tpu.dot_dimension_numbers<[1], [0], [0], [1], [0, 0, 1, 1], [], []>} : vector<64x8xf32>, vector<8x8xf32>, vector<64x8xf32> -> vector<64x8xf32>
    %58 = arith.addf %45, %57 : vector<64x8xf32>
    %c8_i32_32 = arith.constant 8 : i32
    %59 = arith.muli %arg1, %c8_i32_32 : i32
    %c1_i32_33 = arith.constant 1 : i32
    %60 = arith.addi %59, %c1_i32_33 : i32
    %c8_i32_34 = arith.constant 8 : i32
    %61 = arith.muli %60, %c8_i32_34 : i32
    %c0_i32_35 = arith.constant 0 : i32
    %62 = arith.addi %61, %c0_i32_35 : i32
    %c0_36 = arith.constant 0 : index
    %63 = arith.index_cast %62 : i32 to index
    %c0_37 = arith.constant 0 : index
    %64 = vector.load %arg2[%c0_36, %63, %c0_37] : memref<1x82x8xf32, #tpu.memory_space<vmem>>, vector<1x64x8xf32>
    %65 = vector.shape_cast %64 : vector<1x64x8xf32> to vector<64x8xf32>
    %cst_38 = arith.constant 0.000000e+00 : f32
    %66 = vector.broadcast %cst_38 : f32 to vector<64x8xf32>
    %67 = arith.select %18, %66, %65 : vector<64x8xi1>, vector<64x8xf32>
    %c3 = arith.constant 3 : index
    %c0_39 = arith.constant 0 : index
    %c0_40 = arith.constant 0 : index
    %68 = vector.load %arg3[%c3, %c0_39, %c0_40] : memref<9x8x8xf32, #tpu.memory_space<vmem>>, vector<1x8x8xf32>
    %69 = vector.shape_cast %68 : vector<1x8x8xf32> to vector<8x8xf32>
    %cst_41 = arith.constant dense<0.000000e+00> : vector<64x8xf32>
    %70 = tpu.matmul %67, %69, %cst_41 {dimension_numbers = #tpu.dot_dimension_numbers<[1], [0], [0], [1], [0, 0, 1, 1], [], []>} : vector<64x8xf32>, vector<8x8xf32>, vector<64x8xf32> -> vector<64x8xf32>
    %71 = arith.addf %58, %70 : vector<64x8xf32>
    %c8_i32_42 = arith.constant 8 : i32
    %72 = arith.muli %arg1, %c8_i32_42 : i32
    %c1_i32_43 = arith.constant 1 : i32
    %73 = arith.addi %72, %c1_i32_43 : i32
    %c8_i32_44 = arith.constant 8 : i32
    %74 = arith.muli %73, %c8_i32_44 : i32
    %c1_i32_45 = arith.constant 1 : i32
    %75 = arith.addi %74, %c1_i32_45 : i32
    %c0_46 = arith.constant 0 : index
    %76 = arith.index_cast %75 : i32 to index
    %c0_47 = arith.constant 0 : index
    %77 = vector.load %arg2[%c0_46, %76, %c0_47] : memref<1x82x8xf32, #tpu.memory_space<vmem>>, vector<1x64x8xf32>
    %78 = vector.shape_cast %77 : vector<1x64x8xf32> to vector<64x8xf32>
    %c4 = arith.constant 4 : index
    %c0_48 = arith.constant 0 : index
    %c0_49 = arith.constant 0 : index
    %79 = vector.load %arg3[%c4, %c0_48, %c0_49] : memref<9x8x8xf32, #tpu.memory_space<vmem>>, vector<1x8x8xf32>
    %80 = vector.shape_cast %79 : vector<1x8x8xf32> to vector<8x8xf32>
    %cst_50 = arith.constant dense<0.000000e+00> : vector<64x8xf32>
    %81 = tpu.matmul %78, %80, %cst_50 {dimension_numbers = #tpu.dot_dimension_numbers<[1], [0], [0], [1], [0, 0, 1, 1], [], []>} : vector<64x8xf32>, vector<8x8xf32>, vector<64x8xf32> -> vector<64x8xf32>
    %82 = arith.addf %71, %81 : vector<64x8xf32>
    %c8_i32_51 = arith.constant 8 : i32
    %83 = arith.muli %arg1, %c8_i32_51 : i32
    %c1_i32_52 = arith.constant 1 : i32
    %84 = arith.addi %83, %c1_i32_52 : i32
    %c8_i32_53 = arith.constant 8 : i32
    %85 = arith.muli %84, %c8_i32_53 : i32
    %c2_i32_54 = arith.constant 2 : i32
    %86 = arith.addi %85, %c2_i32_54 : i32
    %c0_55 = arith.constant 0 : index
    %87 = arith.index_cast %86 : i32 to index
    %c0_56 = arith.constant 0 : index
    %88 = vector.load %arg2[%c0_55, %87, %c0_56] : memref<1x82x8xf32, #tpu.memory_space<vmem>>, vector<1x64x8xf32>
    %89 = vector.shape_cast %88 : vector<1x64x8xf32> to vector<64x8xf32>
    %cst_57 = arith.constant 0.000000e+00 : f32
    %90 = vector.broadcast %cst_57 : f32 to vector<64x8xf32>
    %91 = arith.select %20, %90, %89 : vector<64x8xi1>, vector<64x8xf32>
    %c5 = arith.constant 5 : index
    %c0_58 = arith.constant 0 : index
    %c0_59 = arith.constant 0 : index
    %92 = vector.load %arg3[%c5, %c0_58, %c0_59] : memref<9x8x8xf32, #tpu.memory_space<vmem>>, vector<1x8x8xf32>
    %93 = vector.shape_cast %92 : vector<1x8x8xf32> to vector<8x8xf32>
    %cst_60 = arith.constant dense<0.000000e+00> : vector<64x8xf32>
    %94 = tpu.matmul %91, %93, %cst_60 {dimension_numbers = #tpu.dot_dimension_numbers<[1], [0], [0], [1], [0, 0, 1, 1], [], []>} : vector<64x8xf32>, vector<8x8xf32>, vector<64x8xf32> -> vector<64x8xf32>
    %95 = arith.addf %82, %94 : vector<64x8xf32>
    %c8_i32_61 = arith.constant 8 : i32
    %96 = arith.muli %arg1, %c8_i32_61 : i32
    %c2_i32_62 = arith.constant 2 : i32
    %97 = arith.addi %96, %c2_i32_62 : i32
    %c8_i32_63 = arith.constant 8 : i32
    %98 = arith.muli %97, %c8_i32_63 : i32
    %c0_i32_64 = arith.constant 0 : i32
    %99 = arith.addi %98, %c0_i32_64 : i32
    %c0_65 = arith.constant 0 : index
    %100 = arith.index_cast %99 : i32 to index
    %c0_66 = arith.constant 0 : index
    %101 = vector.load %arg2[%c0_65, %100, %c0_66] : memref<1x82x8xf32, #tpu.memory_space<vmem>>, vector<1x64x8xf32>
    %102 = vector.shape_cast %101 : vector<1x64x8xf32> to vector<64x8xf32>
    %cst_67 = arith.constant 0.000000e+00 : f32
    %103 = vector.broadcast %cst_67 : f32 to vector<64x8xf32>
    %104 = arith.select %18, %103, %102 : vector<64x8xi1>, vector<64x8xf32>
    %c6 = arith.constant 6 : index
    %c0_68 = arith.constant 0 : index
    %c0_69 = arith.constant 0 : index
    %105 = vector.load %arg3[%c6, %c0_68, %c0_69] : memref<9x8x8xf32, #tpu.memory_space<vmem>>, vector<1x8x8xf32>
    %106 = vector.shape_cast %105 : vector<1x8x8xf32> to vector<8x8xf32>
    %cst_70 = arith.constant dense<0.000000e+00> : vector<64x8xf32>
    %107 = tpu.matmul %104, %106, %cst_70 {dimension_numbers = #tpu.dot_dimension_numbers<[1], [0], [0], [1], [0, 0, 1, 1], [], []>} : vector<64x8xf32>, vector<8x8xf32>, vector<64x8xf32> -> vector<64x8xf32>
    %108 = arith.addf %95, %107 : vector<64x8xf32>
    %c8_i32_71 = arith.constant 8 : i32
    %109 = arith.muli %arg1, %c8_i32_71 : i32
    %c2_i32_72 = arith.constant 2 : i32
    %110 = arith.addi %109, %c2_i32_72 : i32
    %c8_i32_73 = arith.constant 8 : i32
    %111 = arith.muli %110, %c8_i32_73 : i32
    %c1_i32_74 = arith.constant 1 : i32
    %112 = arith.addi %111, %c1_i32_74 : i32
    %c0_75 = arith.constant 0 : index
    %113 = arith.index_cast %112 : i32 to index
    %c0_76 = arith.constant 0 : index
    %114 = vector.load %arg2[%c0_75, %113, %c0_76] : memref<1x82x8xf32, #tpu.memory_space<vmem>>, vector<1x64x8xf32>
    %115 = vector.shape_cast %114 : vector<1x64x8xf32> to vector<64x8xf32>
    %c7 = arith.constant 7 : index
    %c0_77 = arith.constant 0 : index
    %c0_78 = arith.constant 0 : index
    %116 = vector.load %arg3[%c7, %c0_77, %c0_78] : memref<9x8x8xf32, #tpu.memory_space<vmem>>, vector<1x8x8xf32>
    %117 = vector.shape_cast %116 : vector<1x8x8xf32> to vector<8x8xf32>
    %cst_79 = arith.constant dense<0.000000e+00> : vector<64x8xf32>
    %118 = tpu.matmul %115, %117, %cst_79 {dimension_numbers = #tpu.dot_dimension_numbers<[1], [0], [0], [1], [0, 0, 1, 1], [], []>} : vector<64x8xf32>, vector<8x8xf32>, vector<64x8xf32> -> vector<64x8xf32>
    %119 = arith.addf %108, %118 : vector<64x8xf32>
    %c8_i32_80 = arith.constant 8 : i32
    %120 = arith.muli %arg1, %c8_i32_80 : i32
    %c2_i32_81 = arith.constant 2 : i32
    %121 = arith.addi %120, %c2_i32_81 : i32
    %c8_i32_82 = arith.constant 8 : i32
    %122 = arith.muli %121, %c8_i32_82 : i32
    %c2_i32_83 = arith.constant 2 : i32
    %123 = arith.addi %122, %c2_i32_83 : i32
    %c0_84 = arith.constant 0 : index
    %124 = arith.index_cast %123 : i32 to index
    %c0_85 = arith.constant 0 : index
    %125 = vector.load %arg2[%c0_84, %124, %c0_85] : memref<1x82x8xf32, #tpu.memory_space<vmem>>, vector<1x64x8xf32>
    %126 = vector.shape_cast %125 : vector<1x64x8xf32> to vector<64x8xf32>
    %cst_86 = arith.constant 0.000000e+00 : f32
    %127 = vector.broadcast %cst_86 : f32 to vector<64x8xf32>
    %128 = arith.select %20, %127, %126 : vector<64x8xi1>, vector<64x8xf32>
    %c8 = arith.constant 8 : index
    %c0_87 = arith.constant 0 : index
    %c0_88 = arith.constant 0 : index
    %129 = vector.load %arg3[%c8, %c0_87, %c0_88] : memref<9x8x8xf32, #tpu.memory_space<vmem>>, vector<1x8x8xf32>
    %130 = vector.shape_cast %129 : vector<1x8x8xf32> to vector<8x8xf32>
    %cst_89 = arith.constant dense<0.000000e+00> : vector<64x8xf32>
    %131 = tpu.matmul %128, %130, %cst_89 {dimension_numbers = #tpu.dot_dimension_numbers<[1], [0], [0], [1], [0, 0, 1, 1], [], []>} : vector<64x8xf32>, vector<8x8xf32>, vector<64x8xf32> -> vector<64x8xf32>
    %132 = arith.addf %119, %131 : vector<64x8xf32>
    %c0_90 = arith.constant 0 : index
    %c0_91 = arith.constant 0 : index
    %c0_92 = arith.constant 0 : index
    %133 = vector.load %arg4[%c0_90, %c0_91, %c0_92] : memref<1x64x8xf32, #tpu.memory_space<vmem>>, vector<1x64x8xf32>
    %134 = vector.shape_cast %133 : vector<1x64x8xf32> to vector<64x8xf32>
    %135 = vector.shape_cast %132 : vector<64x8xf32> to vector<1x64x8xf32>
    tpu.vector_store %arg4[%c0_90, %c0_91, %c0_92], %135 {strides = array<i32>} : memref<1x64x8xf32, #tpu.memory_space<vmem>>, vector<1x64x8xf32>,
    %cst_93 = arith.constant dense<0.000000e+00> : vector<8xf32>
    %136 = vector.multi_reduction <add>, %132, %cst_93 [0] : vector<64x8xf32> to vector<8xf32>
    %137 = vector.shape_cast %136 : vector<8xf32> to vector<1x8xf32>
    %c0_94 = arith.constant 0 : index
    %c0_95 = arith.constant 0 : index
    %c0_96 = arith.constant 0 : index
    %c0_97 = arith.constant 0 : index
    %138 = vector.load %arg5[%c0_94, %c0_95, %c0_96, %c0_97] : memref<1x1x1x8xf32, #tpu.memory_space<vmem>>, vector<1x1x1x8xf32>
    %139 = vector.shape_cast %138 : vector<1x1x1x8xf32> to vector<1x8xf32>
    %140 = vector.shape_cast %137 : vector<1x8xf32> to vector<1x1x1x8xf32>
    tpu.vector_store %arg5[%c0_94, %c0_95, %c0_96, %c0_97], %140 {strides = array<i32>} : memref<1x1x1x8xf32, #tpu.memory_space<vmem>>, vector<1x1x1x8xf32>,
    %141 = arith.mulf %132, %132 : vector<64x8xf32>
    %cst_98 = arith.constant dense<0.000000e+00> : vector<8xf32>
    %142 = vector.multi_reduction <add>, %141, %cst_98 [0] : vector<64x8xf32> to vector<8xf32>
    %143 = vector.shape_cast %142 : vector<8xf32> to vector<1x8xf32>
    %c0_99 = arith.constant 0 : index
    %c0_100 = arith.constant 0 : index
    %c0_101 = arith.constant 0 : index
    %c0_102 = arith.constant 0 : index
    %144 = vector.load %arg6[%c0_99, %c0_100, %c0_101, %c0_102] : memref<1x1x1x8xf32, #tpu.memory_space<vmem>>, vector<1x1x1x8xf32>
    %145 = vector.shape_cast %144 : vector<1x1x1x8xf32> to vector<1x8xf32>
    %146 = vector.shape_cast %143 : vector<1x8xf32> to vector<1x1x1x8xf32>
    tpu.vector_store %arg6[%c0_99, %c0_100, %c0_101, %c0_102], %146 {strides = array<i32>} : memref<1x1x1x8xf32, #tpu.memory_space<vmem>>, vector<1x1x1x8xf32>,
    return
  }
  func.func @transform_0(%arg0: i32, %arg1: i32) -> (i32, i32, i32) {
    %c0_i32 = arith.constant 0 : i32
    %c0_i32_0 = arith.constant 0 : i32
    %c0_i32_1 = arith.constant 0 : i32
    return %arg0, %c0_i32, %c0_i32_0 : i32, i32, i32
  }
  func.func @transform_1(%arg0: i32, %arg1: i32) -> (i32, i32, i32) {
    %c0_i32 = arith.constant 0 : i32
    %c0_i32_0 = arith.constant 0 : i32
    %c0_i32_1 = arith.constant 0 : i32
    %c0_i32_2 = arith.constant 0 : i32
    return %c0_i32, %c0_i32_0, %c0_i32_1 : i32, i32, i32
  }
  func.func @transform_2(%arg0: i32, %arg1: i32) -> (i32, i32, i32) {
    %c0_i32 = arith.constant 0 : i32
    %c0_i32_0 = arith.constant 0 : i32
    return %arg0, %arg1, %c0_i32 : i32, i32, i32
  }
  func.func @transform_3(%arg0: i32, %arg1: i32) -> (i32, i32, i32, i32) {
    %c0_i32 = arith.constant 0 : i32
    %c0_i32_0 = arith.constant 0 : i32
    %c0_i32_1 = arith.constant 0 : i32
    return %arg0, %arg1, %c0_i32, %c0_i32_0 : i32, i32, i32, i32
  }
  func.func @transform_4(%arg0: i32, %arg1: i32) -> (i32, i32, i32, i32) {
    %c0_i32 = arith.constant 0 : i32
    %c0_i32_0 = arith.constant 0 : i32
    %c0_i32_1 = arith.constant 0 : i32
    return %arg0, %arg1, %c0_i32, %c0_i32_0 : i32, i32, i32, i32
  }
}

module attributes {stable_mosaic.version = 11 : i64} {
  func.func @_bn_relu_pool_kernel(%arg0: i32, %arg1: i32, %arg2: memref<1x8x8x8xf32, #tpu.memory_space<vmem>>, %arg3: memref<1x8xf32, #tpu.memory_space<vmem>>, %arg4: memref<1x8xf32, #tpu.memory_space<vmem>>, %arg5: memref<1x4x4x8xf32, #tpu.memory_space<vmem>>, %arg6: memref<4x8x8xf32, #tpu.memory_space<vmem>>) attributes {dimension_semantics = [#tpu.dimension_semantics<parallel>, #tpu.dimension_semantics<parallel>], iteration_bounds = array<i64: 2, 1>, scalar_prefetch = 0 : i64, scratch_operands = 1 : i64, tpu.core_type = #tpu.core_type<tc>, window_params = [{transform_indices = @transform_0, window_bounds = array<i64: 1, 8, 8, 8>}, {pipeline_mode = #tpu.pipeline_mode<synchronous>, transform_indices = @transform_1, window_bounds = array<i64: 1, 8>}, {pipeline_mode = #tpu.pipeline_mode<synchronous>, transform_indices = @transform_2, window_bounds = array<i64: 1, 8>}, {transform_indices = @transform_3, window_bounds = array<i64: 1, 4, 4, 8>}]} {
    %c0 = arith.constant 0 : index
    %c0_0 = arith.constant 0 : index
    %c0_1 = arith.constant 0 : index
    %c0_2 = arith.constant 0 : index
    %0 = vector.load %arg2[%c0, %c0_0, %c0_1, %c0_2] : memref<1x8x8x8xf32, #tpu.memory_space<vmem>>, vector<1x8x8x8xf32>
    %1 = vector.shape_cast %0 : vector<1x8x8x8xf32> to vector<8x8x8xf32>
    %c0_3 = arith.constant 0 : index
    %c0_4 = arith.constant 0 : index
    %2 = vector.load %arg3[%c0_3, %c0_4] : memref<1x8xf32, #tpu.memory_space<vmem>>, vector<1x8xf32>
    %3 = vector.shape_cast %2 : vector<1x8xf32> to vector<1x1x8xf32>
    %4 = vector.broadcast %3 : vector<1x1x8xf32> to vector<8x8x8xf32>
    %5 = arith.mulf %1, %4 : vector<8x8x8xf32>
    %c0_5 = arith.constant 0 : index
    %c0_6 = arith.constant 0 : index
    %6 = vector.load %arg4[%c0_5, %c0_6] : memref<1x8xf32, #tpu.memory_space<vmem>>, vector<1x8xf32>
    %7 = vector.shape_cast %6 : vector<1x8xf32> to vector<1x1x8xf32>
    %8 = vector.broadcast %7 : vector<1x1x8xf32> to vector<8x8x8xf32>
    %9 = arith.addf %5, %8 : vector<8x8x8xf32>
    %cst = arith.constant 0.000000e+00 : f32
    %10 = vector.broadcast %cst : f32 to vector<8x8x8xf32>
    %11 = arith.maximumf %9, %10 : vector<8x8x8xf32>
    %12 = vector.shape_cast %11 : vector<8x8x8xf32> to vector<4x2x8x8xf32>
    %cst_7 = arith.constant dense<0xFF800000> : vector<4x8x8xf32>
    %13 = vector.multi_reduction <maximumf>, %12, %cst_7 [1] : vector<4x2x8x8xf32> to vector<4x8x8xf32>
    %c0_8 = arith.constant 0 : index
    %c0_9 = arith.constant 0 : index
    %c0_10 = arith.constant 0 : index
    %14 = vector.load %arg6[%c0_8, %c0_9, %c0_10] : memref<4x8x8xf32, #tpu.memory_space<vmem>>, vector<4x8x8xf32>
    tpu.vector_store %arg6[%c0_8, %c0_9, %c0_10], %13 {strides = array<i32>} : memref<4x8x8xf32, #tpu.memory_space<vmem>>, vector<4x8x8xf32>,
    %c0_11 = arith.constant 0 : index
    %c0_12 = arith.constant 0 : index
    %c0_13 = arith.constant 0 : index
    %15 = tpu.strided_load %arg6[%c0_11, %c0_12, %c0_13] {strides = array<i32: 1, 2, 1>} : memref<4x8x8xf32, #tpu.memory_space<vmem>>, vector<4x4x8xf32>
    %c0_14 = arith.constant 0 : index
    %c1 = arith.constant 1 : index
    %c0_15 = arith.constant 0 : index
    %16 = tpu.strided_load %arg6[%c0_14, %c1, %c0_15] {strides = array<i32: 1, 2, 1>} : memref<4x8x8xf32, #tpu.memory_space<vmem>>, vector<4x4x8xf32>
    %17 = arith.maximumf %15, %16 : vector<4x4x8xf32>
    %c0_16 = arith.constant 0 : index
    %c0_17 = arith.constant 0 : index
    %c0_18 = arith.constant 0 : index
    %c0_19 = arith.constant 0 : index
    %18 = vector.load %arg5[%c0_16, %c0_17, %c0_18, %c0_19] : memref<1x4x4x8xf32, #tpu.memory_space<vmem>>, vector<1x4x4x8xf32>
    %19 = vector.shape_cast %18 : vector<1x4x4x8xf32> to vector<4x4x8xf32>
    %20 = vector.shape_cast %17 : vector<4x4x8xf32> to vector<1x4x4x8xf32>
    tpu.vector_store %arg5[%c0_16, %c0_17, %c0_18, %c0_19], %20 {strides = array<i32>} : memref<1x4x4x8xf32, #tpu.memory_space<vmem>>, vector<1x4x4x8xf32>,
    return
  }
  func.func @transform_0(%arg0: i32, %arg1: i32) -> (i32, i32, i32, i32) {
    %c0_i32 = arith.constant 0 : i32
    %c0_i32_0 = arith.constant 0 : i32
    %c0_i32_1 = arith.constant 0 : i32
    return %arg0, %arg1, %c0_i32, %c0_i32_0 : i32, i32, i32, i32
  }
  func.func @transform_1(%arg0: i32, %arg1: i32) -> (i32, i32) {
    %c0_i32 = arith.constant 0 : i32
    %c0_i32_0 = arith.constant 0 : i32
    %c0_i32_1 = arith.constant 0 : i32
    return %c0_i32, %c0_i32_0 : i32, i32
  }
  func.func @transform_2(%arg0: i32, %arg1: i32) -> (i32, i32) {
    %c0_i32 = arith.constant 0 : i32
    %c0_i32_0 = arith.constant 0 : i32
    %c0_i32_1 = arith.constant 0 : i32
    return %c0_i32, %c0_i32_0 : i32, i32
  }
  func.func @transform_3(%arg0: i32, %arg1: i32) -> (i32, i32, i32, i32) {
    %c0_i32 = arith.constant 0 : i32
    %c0_i32_0 = arith.constant 0 : i32
    %c0_i32_1 = arith.constant 0 : i32
    return %arg0, %arg1, %c0_i32, %c0_i32_0 : i32, i32, i32, i32
  }
}

</mosaic_0001>

<bundles_post_ra>
// kernel: conv_block_forward.5
= control target key start
LH: loop header
LB: loop body
LE: loop exit
PB: predicated region body
PF: predicated region fallthrough
CT: control target
= control target key end

     0   :  { %s640_s12 = smov 0   ;;  %s642_s13 = smov 0   ;;  %s841_s0 = inlined_call_operand.vmem [shape: f32[2,16,16,8], index: 0, kind: input, shape index: {}]   ;;  %s842_s1 = inlined_call_operand.vmem [shape: f32[1,8], index: 1, kind: input, shape index: {}]   ;;  %s843_s2 = inlined_call_operand.vmem [shape: f32[1,8], index: 2, kind: input, shape index: {}]   ;;  %s844_s3 = inlined_call_operand.vmem [shape: f32[2,8,8,8], index: 3, kind: output, shape index: {}]  }
   0x1   :  { %s644_s14 = smov 0  }
   0x2 LB: > { %s25_s15 = sadd.s32 1, %s614_s13  ;;  %p561_p0 = scmp.ge.s32.totalorder %s618_s14, 1  ;;  %s618_s14 = sphi %s644_s14, %s13_s14   ;;  %s614_s13 = sphi %s642_s13, %s846_s13   ;;  %s610_s12 = sphi %s640_s12, %s845_s12  }
   0x3   : > { %p27_p1 = scmp.ge.s32.totalorder %s25_s15, 2  ;;  %p159_p2 = scmp.lt.s32.totalorder %s618_s14, 3 }
   0x5   : > { %s848_s15 = smov (%p27_p1, %s25_s15), 0  ;;  %p160_p3 = pnand %p561_p0, %p159_p2 }
   0x6   : > { %p193_p4 = scmp.lt.s32.totalorder (!%p160_p3), %s610_s12, 1 }
   0x7   : > { %163 = sbr.rel (%p160_p3) target bundleno = 67 (0x43), region = 32 }
   0xc   : > { %s850_s12 = smov (!%p193_p4, %s610_s12), 1  ;;  %v664_v0 = vld [vmem:[%s842_s1] ss:$0 sm:$0xff]  ;;  %vm355_vm0 = vcmask 64512  }
   0xd   : > { %s570_s16 = sshll.u32 %s850_s12, 8  ;;  %v674_v1 = vld [vmem:[%s843_s2] ss:$0 sm:$0xff]  ;;  %s571_s24 = sshll.u32 %s850_s12, 6 }
   0xe   : > { %s669_s21 = scalar_lea.vmem %s841_s0, %s570_s16  ;;  %s211_s27 = scalar_lea.vmem %s844_s3, %s571_s24 }
   0xf   : > { %v213_v2 = vld [vmem:[%s669_s21] sm:$0xff]  ;;  %v215_v3 = vld [vmem:[%s669_s21 + $0x10] sm:$0xff]  ;;  %v214_v4 = vld [vmem:[%s669_s21 + $0x8] sm:$0xff] }
  0x10   : > { %v252_v5 = vmul.f32 %v664_v0, %v213_v2  ;;  %v254_v6 = vmul.f32 %v664_v0, %v215_v3  ;;  %v216_v7 = vld [vmem:[%s669_s21 + $0x18] sm:$0xff]  ;;  %v253_v8 = vmul.f32 %v664_v0, %v214_v4  ;;  %v217_v9 = vld [vmem:[%s669_s21 + $0x20] sm:$0xff]  ;;  %v219_v10 = vld [vmem:[%s669_s21 + $0x30] sm:$0xff] }
  0x11   : > { %v255_v11 = vmul.f32 %v664_v0, %v216_v7  ;;  %v256_v12 = vmul.f32 %v664_v0, %v217_v9  ;;  %v258_v13 = vmul.f32 %v664_v0, %v219_v10  ;;  %v218_v14 = vld [vmem:[%s669_s21 + $0x28] sm:$0xff]  ;;  %v220_v15 = vld [vmem:[%s669_s21 + $0x38] sm:$0xff]  ;;  %v221_v32 = vld [vmem:[%s669_s21 + $0x40] sm:$0xff] }
  0x12   : > { %v291_v16 = vadd.f32 %v674_v1, %v252_v5  ;;  %v293_v17 = vadd.f32 %v674_v1, %v254_v6  ;;  %v292_v18 = vadd.f32 %v674_v1, %v253_v8  ;;  %v257_v19 = vmul.f32 %v664_v0, %v218_v14  ;;  %v223_v33 = vld [vmem:[%s669_s21 + $0x50] sm:$0xff]  ;;  %v222_v38 = vld [vmem:[%s669_s21 + $0x48] sm:$0xff]  ;;  %v224_v39 = vld [vmem:[%s669_s21 + $0x58] sm:$0xff] }
  0x13   : > { %v294_v20 = vadd.f32 %v674_v1, %v255_v11  ;;  %v295_v21 = vadd.f32 %v674_v1, %v256_v12  ;;  %v297_v22 = vadd.f32 %v674_v1, %v258_v13  ;;  %v259_v23 = vmul.f32 %v664_v0, %v220_v15  ;;  %v225_v44 = vld [vmem:[%s669_s21 + $0x60] sm:$0xff]  ;;  %v227_v45 = vld [vmem:[%s669_s21 + $0x70] sm:$0xff]  ;;  %v226_v46 = vld [vmem:[%s669_s21 + $0x68] sm:$0xff] }
  0x14   : > { %v323_v24 = vmax.f32 %v291_v16, 0.0  ;;  %v325_v25 = vmax.f32 %v293_v17, 0.0  ;;  %v324_v26 = vmax.f32 %v292_v18, 0.0  ;;  %v296_v27 = vadd.f32 %v674_v1, %v257_v19  ;;  %v228_v55 = vld [vmem:[%s669_s21 + $0x78] sm:$0xff]  ;;  %v229_v14 = vld [vmem:[%s669_s21 + $0x80] sm:$0xff]  ;;  %v231_v15 = vld [vmem:[%s669_s21 + $0x90] sm:$0xff] }
  0x15   : > { %v326_v28 = vmax.f32 %v294_v20, 0.0  ;;  %v327_v29 = vmax.f32 %v295_v21, 0.0  ;;  %v329_v30 = vmax.f32 %v297_v22, 0.0  ;;  %v298_v31 = vadd.f32 %v674_v1, %v259_v23  ;;  %v230_v20 = vld [vmem:[%s669_s21 + $0x88] sm:$0xff]  ;;  %v232_v21 = vld [vmem:[%s669_s21 + $0x98] sm:$0xff] }
  0x16   : > { %v356_v34 = vsel %vm355_vm0, %v323_v24, -inf  ;;  %v357_v35 = vsel %vm355_vm0, %v325_v25, -inf  ;;  %v359_v36 = vsel %vm355_vm0, %v324_v26, -inf  ;;  %v328_v37 = vmax.f32 %v296_v27, 0.0  ;;  %v233_v26 = vld [vmem:[%s669_s21 + $0xa0] sm:$0xff]  ;;  %v235_v27 = vld [vmem:[%s669_s21 + $0xb0] sm:$0xff] }
  0x17   : > { %v358_v40 = vmax.f32 %v356_v34, %v357_v35  ;;  %v360_v41 = vsel %vm355_vm0, %v326_v28, -inf  ;;  %v362_v42 = vsel %vm355_vm0, %v327_v29, -inf  ;;  %v363_v43 = vsel %vm355_vm0, %v329_v30, -inf  ;;  %v234_v28 = vld [vmem:[%s669_s21 + $0xa8] sm:$0xff] }
  0x18   : > { %v361_v47 = vmax.f32 %v359_v36, %v360_v41  ;;  %v364_v48 = vmax.f32 %v362_v42, %v363_v43  ;;  %v330_v49 = vmax.f32 %v298_v31, 0.0  ;;  %v365_v50 = vsel %vm355_vm0, %v328_v37, -inf  ;;  %v236_v37 = vld [vmem:[%s669_s21 + $0xb8] sm:$0xff] }
  0x19   : > { %404 = vst.msk [vmem:[#allocation2] sm:$0xff] %vm355_vm0, %v358_v40  ;;  %v260_v51 = vmul.f32 %v664_v0, %v221_v32  ;;  %v262_v52 = vmul.f32 %v664_v0, %v223_v33  ;;  %v261_v53 = vmul.f32 %v664_v0, %v222_v38  ;;  %v263_v54 = vmul.f32 %v664_v0, %v224_v39 }
  0x1a   : > { %405 = vst.msk [vmem:[#allocation2 + $0x8] sm:$0xff] %vm355_vm0, %v361_v47  ;;  %406 = vst.msk [vmem:[#allocation2 + $0x10] sm:$0xff] %vm355_vm0, %v364_v48  ;;  %v366_v56 = vsel %vm355_vm0, %v330_v49, -inf  ;;  %v264_v57 = vmul.f32 %v664_v0, %v225_v44  ;;  %v266_v58 = vmul.f32 %v664_v0, %v227_v45  ;;  %v265_v59 = vmul.f32 %v664_v0, %v226_v46 }
  0x1b   : > { %v367_v60 = vmax.f32 %v365_v50, %v366_v56  ;;  %v299_v61 = vadd.f32 %v674_v1, %v260_v51  ;;  %v301_v62 = vadd.f32 %v674_v1, %v262_v52  ;;  %v300_v63 = vadd.f32 %v674_v1, %v261_v53 }
  0x1c   : > { %v302_v2 = vadd.f32 %v674_v1, %v263_v54  ;;  %v303_v3 = vadd.f32 %v674_v1, %v264_v57  ;;  %v305_v4 = vadd.f32 %v674_v1, %v266_v58  ;;  %v267_v5 = vmul.f32 %v664_v0, %v228_v55  ;;  %v237_v58 = vld [vmem:[%s669_s21 + $0xc0] sm:$0xff] }
  0x1d   : > { %407 = vst.msk [vmem:[#allocation2 + $0x18] sm:$0xff] %vm355_vm0, %v367_v60  ;;  %v331_v6 = vmax.f32 %v299_v61, 0.0  ;;  %v333_v7 = vmax.f32 %v301_v62, 0.0  ;;  %v332_v8 = vmax.f32 %v300_v63, 0.0  ;;  %v304_v9 = vadd.f32 %v674_v1, %v265_v59  ;;  %v239_v59 = vld [vmem:[%s669_s21 + $0xd0] sm:$0xff] }
  0x1e   : > { %v334_v10 = vmax.f32 %v302_v2, 0.0  ;;  %v335_v11 = vmax.f32 %v303_v3, 0.0  ;;  %v337_v12 = vmax.f32 %v305_v4, 0.0  ;;  %v306_v13 = vadd.f32 %v674_v1, %v267_v5  ;;  %v238_v2 = vld [vmem:[%s669_s21 + $0xc8] sm:$0xff]  ;;  %v240_v3 = vld [vmem:[%s669_s21 + $0xd8] sm:$0xff] }
  0x1f   : > { %v368_v16 = vsel %vm355_vm0, %v331_v6, -inf  ;;  %v369_v17 = vsel %vm355_vm0, %v333_v7, -inf  ;;  %v371_v18 = vsel %vm355_vm0, %v332_v8, -inf  ;;  %v336_v19 = vmax.f32 %v304_v9, 0.0  ;;  %v241_v8 = vld [vmem:[%s669_s21 + $0xe0] sm:$0xff]  ;;  %v243_v9 = vld [vmem:[%s669_s21 + $0xf0] sm:$0xff] }
  0x20   : > { %v370_v22 = vmax.f32 %v368_v16, %v369_v17  ;;  %v372_v23 = vsel %vm355_vm0, %v334_v10, -inf  ;;  %v374_v24 = vsel %vm355_vm0, %v335_v11, -inf  ;;  %v375_v25 = vsel %vm355_vm0, %v337_v12, -inf  ;;  %v242_v10 = vld [vmem:[%s669_s21 + $0xe8] sm:$0xff] }
  0x21   : > { %v373_v29 = vmax.f32 %v371_v18, %v372_v23  ;;  %v376_v30 = vmax.f32 %v374_v24, %v375_v25  ;;  %v338_v31 = vmax.f32 %v306_v13, 0.0  ;;  %v377_v32 = vsel %vm355_vm0, %v336_v19, -inf  ;;  %v244_v19 = vld [vmem:[%s669_s21 + $0xf8] sm:$0xff] }
  0x22   : > { %408 = vst.msk [vmem:[#allocation2 + $0x20] sm:$0xff] %vm355_vm0, %v370_v22  ;;  %v268_v33 = vmul.f32 %v664_v0, %v229_v14  ;;  %v270_v34 = vmul.f32 %v664_v0, %v231_v15  ;;  %v269_v35 = vmul.f32 %v664_v0, %v230_v20  ;;  %v271_v36 = vmul.f32 %v664_v0, %v232_v21 }
  0x23   : > { %409 = vst.msk [vmem:[#allocation2 + $0x28] sm:$0xff] %vm355_vm0, %v373_v29  ;;  %410 = vst.msk [vmem:[#allocation2 + $0x30] sm:$0xff] %vm355_vm0, %v376_v30  ;;  %v378_v38 = vsel %vm355_vm0, %v338_v31, -inf  ;;  %v272_v39 = vmul.f32 %v664_v0, %v233_v26  ;;  %v274_v40 = vmul.f32 %v664_v0, %v235_v27  ;;  %v273_v41 = vmul.f32 %v664_v0, %v234_v28 }
  0x24   : > { %v379_v42 = vmax.f32 %v377_v32, %v378_v38  ;;  %v307_v43 = vadd.f32 %v674_v1, %v268_v33  ;;  %v309_v44 = vadd.f32 %v674_v1, %v270_v34  ;;  %v308_v45 = vadd.f32 %v674_v1, %v269_v35  ;;  %v422_v38 = vld [vmem:[#allocation2 + $0x10] ss:$2 sm:$0xff] }
  0x25   : > { %v310_v46 = vadd.f32 %v674_v1, %v271_v36  ;;  %v311_v47 = vadd.f32 %v674_v1, %v272_v39  ;;  %v313_v48 = vadd.f32 %v674_v1, %v274_v40  ;;  %v275_v49 = vmul.f32 %v664_v0, %v236_v37  ;;  %v420_v36 = vld [vmem:[#allocation2] ss:$2 sm:$0xff]  ;;  %v436_v37 = vld [vmem:[#allocation2 + $0x1] ss:$2 sm:$0xff]  ;;  %v438_v39 = vld [vmem:[#allocation2 + $0x11] ss:$2 sm:$0xff] }
  0x26   : > { %411 = vst.msk [vmem:[#allocation2 + $0x38] sm:$0xff] %vm355_vm0, %v379_v42  ;;  %v339_v50 = vmax.f32 %v307_v43, 0.0  ;;  %v341_v51 = vmax.f32 %v309_v44, 0.0  ;;  %v340_v52 = vmax.f32 %v308_v45, 0.0  ;;  %v312_v53 = vadd.f32 %v674_v1, %v273_v41 }
  0x27   : > { %v342_v54 = vmax.f32 %v310_v46, 0.0  ;;  %v343_v55 = vmax.f32 %v311_v47, 0.0  ;;  %v345_v56 = vmax.f32 %v313_v48, 0.0  ;;  %v314_v57 = vadd.f32 %v674_v1, %v275_v49 }
  0x28   : > { %v380_v60 = vsel %vm355_vm0, %v339_v50, -inf  ;;  %v381_v61 = vsel %vm355_vm0, %v341_v51, -inf  ;;  %v383_v62 = vsel %vm355_vm0, %v340_v52, -inf  ;;  %v344_v63 = vmax.f32 %v312_v53, 0.0 }
  0x29   : > { %v382_v4 = vmax.f32 %v380_v60, %v381_v61  ;;  %v384_v5 = vsel %vm355_vm0, %v342_v54, -inf  ;;  %v386_v6 = vsel %vm355_vm0, %v343_v55, -inf  ;;  %v387_v7 = vsel %vm355_vm0, %v345_v56, -inf }
  0x2a   : > { %v385_v11 = vmax.f32 %v383_v62, %v384_v5  ;;  %v388_v12 = vmax.f32 %v386_v6, %v387_v7  ;;  %v346_v13 = vmax.f32 %v314_v57, 0.0  ;;  %v389_v14 = vsel %vm355_vm0, %v344_v63, -inf  ;;  %v424_v40 = vld [vmem:[#allocation2 + $0x20] ss:$2 sm:$0xff]  ;;  %v440_v41 = vld [vmem:[#allocation2 + $0x21] ss:$2 sm:$0xff] }
  0x2b   : > { %412 = vst.msk [vmem:[#allocation2 + $0x40] sm:$0xff] %vm355_vm0, %v382_v4  ;;  %v276_v15 = vmul.f32 %v664_v0, %v237_v58  ;;  %v278_v16 = vmul.f32 %v664_v0, %v239_v59  ;;  %v277_v17 = vmul.f32 %v664_v0, %v238_v2  ;;  %v279_v18 = vmul.f32 %v664_v0, %v240_v3 }
  0x2c   : > { %413 = vst.msk [vmem:[#allocation2 + $0x48] sm:$0xff] %vm355_vm0, %v385_v11  ;;  %414 = vst.msk [vmem:[#allocation2 + $0x50] sm:$0xff] %vm355_vm0, %v388_v12  ;;  %v390_v20 = vsel %vm355_vm0, %v346_v13, -inf  ;;  %v280_v21 = vmul.f32 %v664_v0, %v241_v8  ;;  %v282_v22 = vmul.f32 %v664_v0, %v243_v9  ;;  %v281_v23 = vmul.f32 %v664_v0, %v242_v10 }
  0x2d   : > { %v391_v24 = vmax.f32 %v389_v14, %v390_v20  ;;  %v315_v25 = vadd.f32 %v674_v1, %v276_v15  ;;  %v317_v26 = vadd.f32 %v674_v1, %v278_v16  ;;  %v316_v27 = vadd.f32 %v674_v1, %v277_v17  ;;  %v442_v50 = vld [vmem:[#allocation2 + $0x31] ss:$2 sm:$0xff] }
  0x2e   : > { %v318_v28 = vadd.f32 %v674_v1, %v279_v18  ;;  %v319_v29 = vadd.f32 %v674_v1, %v280_v21  ;;  %v321_v30 = vadd.f32 %v674_v1, %v282_v22  ;;  %v283_v31 = vmul.f32 %v664_v0, %v244_v19  ;;  %v426_v0 = vld [vmem:[#allocation2 + $0x30] ss:$2 sm:$0xff] }
  0x2f   : > { %415 = vst.msk [vmem:[#allocation2 + $0x58] sm:$0xff] %vm355_vm0, %v391_v24  ;;  %v347_v32 = vmax.f32 %v315_v25, 0.0  ;;  %v349_v33 = vmax.f32 %v317_v26, 0.0  ;;  %v348_v34 = vmax.f32 %v316_v27, 0.0  ;;  %v320_v35 = vadd.f32 %v674_v1, %v281_v23 }
  0x30   : > { %v350_v42 = vmax.f32 %v318_v28, 0.0  ;;  %v351_v43 = vmax.f32 %v319_v29, 0.0  ;;  %v353_v44 = vmax.f32 %v321_v30, 0.0  ;;  %v322_v45 = vadd.f32 %v674_v1, %v283_v31 }
  0x31   : > { %v392_v46 = vsel %vm355_vm0, %v347_v32, -inf  ;;  %v393_v47 = vsel %vm355_vm0, %v349_v33, -inf  ;;  %v395_v48 = vsel %vm355_vm0, %v348_v34, -inf  ;;  %v352_v49 = vmax.f32 %v320_v35, 0.0 }
  0x32   : > { %v394_v51 = vmax.f32 %v392_v46, %v393_v47  ;;  %v396_v52 = vsel %vm355_vm0, %v350_v42, -inf  ;;  %v398_v53 = vsel %vm355_vm0, %v351_v43, -inf  ;;  %v399_v54 = vsel %vm355_vm0, %v353_v44, -inf }
  0x33   : > { %v397_v55 = vmax.f32 %v395_v48, %v396_v52  ;;  %v400_v56 = vmax.f32 %v398_v53, %v399_v54  ;;  %v354_v1 = vmax.f32 %v322_v45, 0.0  ;;  %v401_v57 = vsel %vm355_vm0, %v352_v49, -inf  ;;  %v428_v58 = vld [vmem:[#allocation2 + $0x40] ss:$2 sm:$0xff]  ;;  %v444_v59 = vld [vmem:[#allocation2 + $0x41] ss:$2 sm:$0xff] }
  0x34   : > { %416 = vst.msk [vmem:[#allocation2 + $0x60] sm:$0xff] %vm355_vm0, %v394_v51  ;;  %v451_v60 = vmax.f32 %v420_v36, %v436_v37  ;;  %v452_v61 = vmax.f32 %v422_v38, %v438_v39  ;;  %v453_v62 = vmax.f32 %v424_v40, %v440_v41  ;;  %v454_v63 = vmax.f32 %v426_v0, %v442_v50 }
  0x35   : > { %417 = vst.msk [vmem:[#allocation2 + $0x68] sm:$0xff] %vm355_vm0, %v397_v55  ;;  %418 = vst.msk [vmem:[#allocation2 + $0x70] sm:$0xff] %vm355_vm0, %v400_v56  ;;  %v402_v2 = vsel %vm355_vm0, %v354_v1, -inf  ;;  %v455_v3 = vmax.f32 %v428_v58, %v444_v59 }
  0x36   : > { %v403_v4 = vmax.f32 %v401_v57, %v402_v2  ;;  %459 = vst.msk [vmem:[%s211_s27] sm:$0xff] %vm355_vm0, %v451_v60  ;;  %460 = vst.msk [vmem:[%s211_s27 + $0x8] sm:$0xff] %vm355_vm0, %v452_v61  ;;  %v430_v5 = vld [vmem:[#allocation2 + $0x50] ss:$2 sm:$0xff]  ;;  %v446_v6 = vld [vmem:[#allocation2 + $0x51] ss:$2 sm:$0xff] }
  0x37   : > { %461 = vst.msk [vmem:[%s211_s27 + $0x10] sm:$0xff] %vm355_vm0, %v453_v62  ;;  %462 = vst.msk [vmem:[%s211_s27 + $0x18] sm:$0xff] %vm355_vm0, %v454_v63  ;;  %v456_v7 = vmax.f32 %v430_v5, %v446_v6 }
  0x38   : > { %463 = vst.msk [vmem:[%s211_s27 + $0x20] sm:$0xff] %vm355_vm0, %v455_v3  ;;  %419 = vst.msk [vmem:[#allocation2 + $0x78] sm:$0xff] %vm355_vm0, %v403_v4 }
  0x39   : > { %464 = vst.msk [vmem:[%s211_s27 + $0x28] sm:$0xff] %vm355_vm0, %v456_v7 }
  0x3c   : > { %v432_v8 = vld [vmem:[#allocation2 + $0x60] ss:$2 sm:$0xff]  ;;  %v448_v9 = vld [vmem:[#allocation2 + $0x61] ss:$2 sm:$0xff] }
  0x3d   : > { %v457_v10 = vmax.f32 %v432_v8, %v448_v9 }
  0x3f   : > { %465 = vst.msk [vmem:[%s211_s27 + $0x30] sm:$0xff] %vm355_vm0, %v457_v10  ;;  %v434_v11 = vld [vmem:[#allocation2 + $0x70] ss:$2 sm:$0xff]  ;;  %v450_v12 = vld [vmem:[#allocation2 + $0x71] ss:$2 sm:$0xff] }
  0x40   : > { %v458_v13 = vmax.f32 %v434_v11, %v450_v12 }
  0x42   : > { %466 = vst.msk [vmem:[%s211_s27 + $0x38] sm:$0xff] %vm355_vm0, %v458_v13 }
  0x43 PF: > { %s13_s14 = sadd.s32 1, %s618_s14   ;;  %s845_s12 = smov %s614_s13 }
  0x44   : > { %p10_p5 = scmp.ge.s32.totalorder %s13_s14, 4   ;;  %s846_s13 = smov %s848_s15 }
  0x46   :  { %12 = sbr.rel (!%p10_p5) target bundleno = 2 (0x2), region = 77 }

// kernel: conv_block_forward.7
= control target key start
LH: loop header
LB: loop body
LE: loop exit
PB: predicated region body
PF: predicated region fallthrough
CT: control target
= control target key end

     0   :  { %8 = vsyncpa [#allocation4], 0  ;;  %s697_s0 = inlined_call_operand.vmem [shape: f32[2,8,8,8], index: 0, kind: input, shape index: {}]   ;;  %s698_s1 = inlined_call_operand.vmem [shape: f32[1,8], index: 1, kind: input, shape index: {}]   ;;  %s699_s2 = inlined_call_operand.vmem [shape: f32[1,8], index: 2, kind: input, shape index: {}]   ;;  %s700_s3 = inlined_call_operand.hbm [shape: f32[2,4,4,8], index: 3, kind: output, shape index: {}]  }
   0x1   :  { %10 = vsyncpa [#allocation4 + $0x1], 0  ;;  %s557_s12 = smov 0   ;;  %s559_s13 = smov 0  }
   0x2   :  { %s561_s14 = smov 0   ;;  %s563_s15 = smov 0  }
   0x3   :  { %s565_s16 = smov 0   ;;  %s567_s17 = smov 0  }
   0x4 LB: > { %s382_s18 = sadd.s32 4294967295, %s532_s17   ;;  %s383_s19 = sadd.s32 4294967294, %s532_s17   ;;  %s532_s17 = sphi %s567_s17, %s16_s17   ;;  %s528_s16 = sphi %s565_s16, %s707_s16   ;;  %s524_s15 = sphi %s563_s15, %s706_s15   ;;  %s520_s14 = sphi %s561_s14, %s705_s14   ;;  %s516_s13 = sphi %s559_s13, %s704_s13   ;;  %s512_s12 = sphi %s557_s12, %s703_s12  }
   0x5   : > { %s28_s20 = sadd.s32 1, %s528_s16  ;;  %s107_s21 = sadd.s32 1, %s520_s14 }
   0x6   : > { %p30_p0 = scmp.ge.s32.totalorder %s28_s20, 2  ;;  %p117_p1 = scmp.ne.s32.totalorder %s520_s14, %s516_s13 }
   0x7   : > { %p118_p2 = scmp.eq.s32.totalorder %s382_s18, 1  ;;  %p123_p3 = scmp.ne.s32.totalorder %s516_s13, %s512_s12 }
   0x8   : > { %s709_s20 = smov (%p30_p0, %s28_s20), 0  ;;  %p124_p5 = scmp.eq.s32.totalorder %s383_s19, 1 }
   0x9   : > { %p597_p4 = por %p118_p2, %p117_p1  ;;  %s102_s23 = ssub.s32 %s528_s16, %s709_s20 }
   0xa   : > { %p386_p6 = scmp.ge.s32.totalorder %s532_s17, 1  ;;  %p105_p7 = scmp.eq.s32.totalorder %s102_s23, 0 }
   0xb   : > { %p604_p8 = por %p124_p5, %p123_p3  ;;  %p161_p9 = scmp.lt.s32.totalorder %s532_s17, 3 }
   0xc   : > { %s610_s25 = scalar_select %p105_p7, %s520_s14, %s107_s21  }
   0xd   : > { %p162_p10 = pnand %p386_p6, %p161_p9 }
   0xe   : > { %p190_p11 = scmp.lt.s32.totalorder (!%p162_p10), %s524_s15, 1  ;;  %s186_s8 = sand.u32 (!%p162_p10), 1, %s516_s13  }
   0xf   : > { %165 = sbr.rel (%p162_p10) target bundleno = 63 (0x3f), region = 32  ;;  %s387_s9 = sshll.u32 (!%p162_p10), %s186_s8, 4 }
  0x10   : > { %s188_s10 = scalar_lea.vmem (!%p162_p10), [#allocation3], %s387_s9  ;;  %s398_s18 = sshll.u32 (!%p162_p10), %s524_s15, 8 }
  0x11   : > { %s303_s11 = sshll.u32 (!%p162_p10), %s188_s10, 4  ;;  %s646_s21 = scalar_lea.hbm (!%p162_p10), %s700_s3, %s398_s18  ;;  %s640_s11 = int_to_ptr.vmem [resolvable:$true] %s303_s11 }
  0x12   : > { %s652_s23 = scalar_lea.sflag (!%p162_p10), [#allocation4], %s186_s8 }
  0x14   : > { %s191_s26 = scalar_select %p190_p11, %s524_s15, 1  ;;  %v390_v0 = vld [vmem:[%s698_s1] ss:$0 sm:$0xff]  ;;  %vm246_vm0 = vcmask 64512   ;;  %vm282_vm1 = vcmask 60416  }
  0x15   : > { %v391_v1 = vld [vmem:[%s699_s2] ss:$0 sm:$0xff] }
  0x16   : > { %s397_s27 = sshll.u32 %s191_s26, 6  ;;  %s456_s26 = scalar_lea.vmem %s640_s11, 256 }
  0x17   : > { %s197_s5 = scalar_lea.vmem %s697_s0, %s397_s27  ;;  %p457_p12 = scmp.ne.s32.totalorder %s640_s11, %s456_s26 }
  0x18   : > { %v200_v2 = vld [vmem:[%s197_s5] sm:$0xff]  ;;  %v201_v3 = vld [vmem:[%s197_s5 + $0x8] sm:$0xff]  ;;  %v202_v4 = vld [vmem:[%s197_s5 + $0x10] sm:$0xff]  ;;  %s534_s27 = smov [#allocation3]  }
  0x19   : > { %v215_v5 = vmul.f32 %v390_v0, %v200_v2  ;;  %v216_v6 = vmul.f32 %v390_v0, %v201_v3  ;;  %v203_v7 = vld [vmem:[%s197_s5 + $0x18] sm:$0xff]  ;;  %v217_v8 = vmul.f32 %v390_v0, %v202_v4  ;;  %v204_v9 = vld [vmem:[%s197_s5 + $0x20] sm:$0xff]  ;;  %v205_v10 = vld [vmem:[%s197_s5 + $0x28] sm:$0xff]  ;;  %p458_p13 = pnand %p457_p12, %p597_p4  ;;  %s460_s28 = sshll.u32 %s534_s27, 4  ;;  %s461_s28 = int_to_ptr.vmem [resolvable:$false] %s460_s28 }
  0x1a   : > { %v218_v11 = vmul.f32 %v390_v0, %v203_v7  ;;  %v219_v12 = vmul.f32 %v390_v0, %v204_v9  ;;  %v220_v13 = vmul.f32 %v390_v0, %v205_v10  ;;  %v206_v14 = vld [vmem:[%s197_s5 + $0x30] sm:$0xff]  ;;  %v207_v15 = vld [vmem:[%s197_s5 + $0x38] sm:$0xff]  ;;  %s462_s29 = scalar_lea.vmem %s461_s28, 512  ;;  %p463_p1 = scmp.lt.s32.totalorder %s640_s11, %s461_s28 }
  0x1b   : > { %v230_v16 = vadd.f32 %v391_v1, %v215_v5  ;;  %v231_v17 = vadd.f32 %v391_v1, %v216_v6  ;;  %v232_v18 = vadd.f32 %v391_v1, %v217_v8  ;;  %v221_v19 = vmul.f32 %v390_v0, %v206_v14  ;;  %p459_p0 = pneg %p458_p13  ;;  %p464_p2 = scmp.lt.s32.totalorder %s462_s29, %s456_s26 }
  0x1c   : > { %v233_v20 = vadd.f32 %v391_v1, %v218_v11  ;;  %v234_v21 = vadd.f32 %v391_v1, %v219_v12  ;;  %v235_v22 = vadd.f32 %v391_v1, %v220_v13  ;;  %v222_v23 = vmul.f32 %v390_v0, %v207_v15 }
  0x1d   : > { %v238_v24 = vmax.f32 %v230_v16, 0.0  ;;  %v239_v25 = vmax.f32 %v231_v17, 0.0  ;;  %v240_v26 = vmax.f32 %v232_v18, 0.0  ;;  %v236_v27 = vadd.f32 %v391_v1, %v221_v19  ;;  %p465_p3 = por %p464_p2, %p463_p1 }
  0x1e   : > { %v241_v28 = vmax.f32 %v233_v20, 0.0  ;;  %v242_v29 = vmax.f32 %v234_v21, 0.0  ;;  %v243_v30 = vmax.f32 %v235_v22, 0.0  ;;  %v237_v31 = vadd.f32 %v391_v1, %v222_v23 }
  0x1f   : > { %v247_v32 = vsel %vm246_vm0, %v238_v24, -inf  ;;  %v248_v33 = vsel %vm246_vm0, %v239_v25, -inf  ;;  %v250_v34 = vsel %vm246_vm0, %v240_v26, -inf  ;;  %v244_v35 = vmax.f32 %v236_v27, 0.0  ;;  %p466_p5 = pnand %p465_p3, %p459_p0 }
  0x20   : > { %v249_v36 = vmax.f32 %v247_v32, %v248_v33  ;;  %v251_v37 = vsel %vm246_vm0, %v241_v28, -inf  ;;  %v253_v38 = vsel %vm246_vm0, %v242_v29, -inf  ;;  %v254_v39 = vsel %vm246_vm0, %v243_v30, -inf }
  0x21   : > { %v252_v40 = vmax.f32 %v250_v34, %v251_v37  ;;  %v255_v41 = vmax.f32 %v253_v38, %v254_v39  ;;  %v245_v42 = vmax.f32 %v237_v31, 0.0  ;;  %v256_v43 = vsel %vm246_vm0, %v244_v35, -inf }
  0x22   : > { %259 = vst.msk [vmem:[#allocation2] sm:$0xff] %vm246_vm0, %v249_v36 }
  0x23   : > { %260 = vst.msk [vmem:[#allocation2 + $0x8] sm:$0xff] %vm246_vm0, %v252_v40  ;;  %261 = vst.msk [vmem:[#allocation2 + $0x10] sm:$0xff] %vm246_vm0, %v255_v41  ;;  %v257_v44 = vsel %vm246_vm0, %v245_v42, -inf }
  0x24   : > { %v258_v45 = vmax.f32 %v256_v43, %v257_v44 }
  0x26   : > { %262 = vst.msk [vmem:[#allocation2 + $0x18] sm:$0xff] %vm246_vm0, %v258_v45 }
  0x29   : > { %v263_v46 = vld [vmem:[#allocation2] ss:$2 sm:$0xf]  ;;  %v271_v47 = vld [vmem:[#allocation2 + $0x1] ss:$2 sm:$0xf] }
  0x2a   : > { %v278_v48 = vmax.f32 %v263_v46, %v271_v47  ;;  %v265_v49 = vld [vmem:[#allocation2 + $0x8] ss:$2 sm:$0xf]  ;;  %v273_v50 = vld [vmem:[#allocation2 + $0x9] ss:$2 sm:$0xf] }
  0x2b   : > { %v279_v51 = vmax.f32 %v265_v49, %v273_v50  ;;  %v267_v52 = vld [vmem:[#allocation2 + $0x10] ss:$2 sm:$0xf]  ;;  %v275_v53 = vld [vmem:[#allocation2 + $0x11] ss:$2 sm:$0xf] }
  0x2c   : > { %283 = vst.msk [vmem:[%s188_s10] sm:$0xf] %vm282_vm1, %v278_v48  ;;  %v280_v54 = vmax.f32 %v267_v52, %v275_v53 }
  0x2d   : > { %284 = vst.msk [vmem:[%s188_s10 + $0x4] sm:$0xf] %vm282_vm1, %v279_v51  ;;  %v269_v55 = vld [vmem:[#allocation2 + $0x18] ss:$2 sm:$0xf] }
  0x2e   : > { %v277_v56 = vld [vmem:[#allocation2 + $0x19] ss:$2 sm:$0xf]  ;;  %285 = vst.msk [vmem:[%s188_s10 + $0x8] sm:$0xf] %vm282_vm1, %v280_v54 }
  0x2f   : > { %v281_v57 = vmax.f32 %v269_v55, %v277_v56 }
  0x31   : > { %286 = vst.msk [vmem:[%s188_s10 + $0xc] sm:$0xf] %vm282_vm1, %v281_v57 }
  0x32   : > { %469 = shalt.err (!%p466_p5)
}
  0x33   : > { %s470_s30 = scalar_lea.hbm %s646_s21, 256  ;;  %s474_s6 = scalar_lea.hbm %s700_s3, 512 }
  0x34   : > { %p471_p6 = scmp.ne.s32.totalorder %s646_s21, %s470_s30  ;;  %p475_p10 = scmp.lt.s32.totalorder %s646_s21, %s700_s3 }
  0x35   : > { %p476_p11 = scmp.lt.s32.totalorder %s474_s6, %s470_s30 }
  0x36   : > { %p472_p7 = pnand %p471_p6, %p597_p4 }
  0x37   : > { %p477_p12 = por %p476_p11, %p475_p10 }
  0x38   : > { %p473_p9 = pneg %p472_p7 }
  0x3a   : > { %p478_p13 = pnand %p477_p12, %p473_p9 }
  0x3c   : > { %481 = shalt.err (!%p478_p13)
}
  0x3d   : > { %s535_s9 = smov 64   ;;  %s536_s10 = smov 4  }
  0x3e   : > { %399 = dma.vmem_to_hbm [thread:$0]  (%p597_p4), %s640_s11, 256, %s646_s21, %s652_s23, %s535_s9, %s535_s9, %s536_s10  }
  0x3f PF: > { %p405_p0 = scmp.ge.s32.totalorder %s532_s17, 2  ;;  %s318_s18 = sand.u32 1, %s512_s12  }
  0x40   : > { %s319_s15 = scalar_lea.sflag [#allocation4], %s318_s18 }
  0x41   : > { %p402_p1 = pnand %p405_p0, %p604_p8 }
  0x43   : > { %p403_p2 = pneg %p402_p1 }
  0x45   : > { %507 = dma.done.wait (%p403_p2), %s319_s15, 256  }
  0x46   : > { %509 = vsyncadd (%p403_p2), %s319_s15, 4294967040  ;;  %s16_s17 = sadd.s32 1, %s532_s17   ;;  %s703_s12 = smov %s516_s13 }
  0x47   : > { %p13_p3 = scmp.ge.s32.totalorder %s16_s17, 4   ;;  %s704_s13 = smov %s520_s14 }
  0x48   : > { %s705_s14 = smov %s610_s25  ;;  %s706_s15 = smov %s528_s16 }
  0x49   : > { %s707_s16 = smov %s709_s20  ;;  %15 = sbr.rel (!%p13_p3) target bundleno = 4 (0x4), region = 74 }
  0x4e   :  { %324 = vsyncpa [#allocation4], 1 }
  0x4f   :  { %326 = vsyncpa [#allocation4 + $0x1], 1 }

// kernel: conv_block_forward.6
= control target key start
LH: loop header
LB: loop body
LE: loop exit
PB: predicated region body
PF: predicated region fallthrough
CT: control target
= control target key end

     0   :  { %s2433_s15 = smov 0   ;;  %s2435_s16 = smov 0   ;;  %s2926_s0 = inlined_call_operand.vmem [shape: f32[2,82,8], index: 0, kind: input, shape index: {}]   ;;  %s2927_s1 = inlined_call_operand.vmem [shape: f32[9,8,8], index: 1, kind: input, shape index: {}]   ;;  %s2928_s2 = inlined_call_operand.vmem [shape: f32[2,64,8], index: 2, kind: output, shape index: {0}]   ;;  %s2929_s3 = inlined_call_operand.vmem [shape: f32[2,1,1,8], index: 3, kind: output, shape index: {1}]   ;;  %s2930_s4 = inlined_call_operand.vmem [shape: f32[2,1,1,8], index: 4, kind: output, shape index: {2}]  }
   0x1   :  { %s2437_s17 = smov 0  }
   0x2 LB: > { %s27_s18 = sadd.s32 1, %s2402_s16  ;;  %p1999_p0 = scmp.ge.s32.totalorder %s2406_s17, 1  ;;  %s2406_s17 = sphi %s2437_s17, %s15_s17   ;;  %s2402_s16 = sphi %s2435_s16, %s3055_s16   ;;  %s2398_s15 = sphi %s2433_s15, %s3054_s15  }
   0x3   : > { %p29_p1 = scmp.ge.s32.totalorder %s27_s18, 2  ;;  %p185_p2 = scmp.lt.s32.totalorder %s2406_s17, 3 }
   0x5   : > { %s3057_s18 = smov (%p29_p1, %s27_s18), 0  ;;  %p186_p3 = pnand %p1999_p0, %p185_p2 }
   0x6   : > { %p227_p4 = scmp.lt.s32.totalorder (!%p186_p3), %s2398_s15, 1 }
   0x7   : > { %189 = sbr.rel (%p186_p3) target bundleno = 306 (0x132), region = 28 }
   0xc   : > { %v2011_v0 = vld [vmem:[%s2927_s1 + $0x8] sm:$0xff]  ;;  %v393_v1 = vld [vmem:[%s2927_s1] sm:$0xff]  ;;  %v2036_v2 = vld [vmem:[%s2927_s1 + $0x10] sm:$0xff]  ;;  %v254_v3 = vlaneseq  ;;  %s3059_s15 = smov (!%p227_p4, %s2398_s15), 1  ;;  %vm2931_vm0 = vcmask 64512   ;;  %v2954_v38 = vmov 0 }
   0xd   : > { %2357 = vmatprep.subr.mxu1 %v2011_v0  ;;  %2231 = vmatprep.subr.mxu0 %v2011_v0  ;;  %s2359_s25 = smul.u32 88, %s3059_s15  ;;  %v2053_v20 = vld [vmem:[%s2927_s1 + $0x18] sm:$0xff]  ;;  %v2070_v21 = vld [vmem:[%s2927_s1 + $0x20] sm:$0xff]  ;;  %v2958_v46 = vmov 0  ;;  %v2962_v52 = vmov 0  ;;  %v2087_v55 = vld [vmem:[%s2927_s1 + $0x28] sm:$0xff] }
   0xe   : > { %2358 = vmatpush3.msra.mxu1 %v2011_v0  ;;  %2232 = vmatpush3.msra.mxu0 %v2011_v0  ;;  %v255_v4 = vshrl.u32 %v254_v3, 7  ;;  %v2104_v56 = vld [vmem:[%s2927_s1 + $0x30] sm:$0xff]  ;;  %v2966_v63 = vmov 0  ;;  %s2149_s19 = sshll.u32 %s3059_s15, 6 }
   0xf   : > { %2245 = vmatprep.subr.mxu1 %v393_v1  ;;  %2259 = vmatprep.subr.mxu0 %v2036_v2  ;;  %s2466_s28 = scalar_lea.vmem %s2926_s0, %s2359_s25  ;;  %s2871_s22 = scalar_lea.vmem %s2928_s2, %s2149_s19 }
  0x10   : > { %v267_v5 = vand.u32 7, %v255_v4  ;;  %v256_v6 = vadd.s32 8, %v255_v4  ;;  %v257_v7 = vadd.s32 16, %v255_v4  ;;  %v258_v8 = vadd.s32 24, %v255_v4  ;;  %v2003_v10 = vld [vmem:[%s2466_s28 + $0x1] sm:$0xff]  ;;  %v2473_v12 = vld [vmem:[%s2466_s28 + $0x9] sm:$0xff]  ;;  %s247_s25 = scalar_lea.vmem %s2929_s3, %s3059_s15 }
  0x11   : > { %v259_v9 = vadd.s32 32, %v255_v4  ;;  %v2470_v11 = vld [vmem:[%s2466_s28 + $0x21] sm:$0xff]  ;;  %2233 = vmatprep.mubr.msk.f32.mxu0 %vm2931_vm0, %v2003_v10  ;;  %v2479_v14 = vld [vmem:[%s2466_s28 + $0x29] sm:$0xff]  ;;  %v2482_v15 = vld [vmem:[%s2466_s28 + $0x11] sm:$0xff]  ;;  %v260_v28 = vadd.s32 40, %v255_v4  ;;  %v261_v35 = vadd.s32 48, %v255_v4 }
  0x12   : > { %v274_v13 = vand.u32 7, %v256_v6  ;;  %2239 = vmatprep.mubr.msk.f32.mxu1 %vm2931_vm0, %v2470_v11  ;;  %v2485_v16 = vld [vmem:[%s2466_s28 + $0x31] sm:$0xff]  ;;  %vm2487_vm1 = vcmp.eq.s32.totalorder %v267_v5, 0  ;;  %vm2491_vm2 = vcmp.eq.s32.totalorder %v267_v5, 7  ;;  %2234 = vmatmul.mubr.msk.f32.vlgmr.msra.gmra.mxu0 %vm2931_vm0, %v2473_v12  ;;  %v377_v19 = vld [vmem:[%s2466_s28] sm:$0xff]  ;;  %v281_v22 = vand.u32 7, %v257_v7 }
  0x13   : > { %2240 = vmatmul.mubr.msk.f32.vlgmr.msra.gmra.mxu1 %vm2931_vm0, %v2479_v14  ;;  %2260 = vmatpush3.msra.mxu0 %v2036_v2  ;;  %v2507_v23 = vld [vmem:[%s2466_s28 + $0x19] sm:$0xff]  ;;  %v2028_v25 = vld [vmem:[%s2466_s28 + $0x2] sm:$0xff]  ;;  %v288_v26 = vand.u32 7, %v258_v8  ;;  %v295_v27 = vand.u32 7, %v259_v9  ;;  %v385_v29 = vsel %vm2487_vm1, 0.0, %v377_v19  ;;  %v2533_v34 = vld [vmem:[%s2466_s28 + $0xa] sm:$0xff] }
  0x14   : > { %2246 = vmatpush3.msra.mxu1 %v393_v1  ;;  %v2510_v24 = vld [vmem:[%s2466_s28 + $0x39] sm:$0xff]  ;;  %2236 = vmatprep.mubr.msk.f32.mxu0 %vm2931_vm0, %v2482_v15  ;;  %v675_v30 = vsel %vm2491_vm2, 0.0, %v2028_v25  ;;  %vm2521_vm3 = vcmp.eq.s32.totalorder %v274_v13, 0  ;;  %v2526_v32 = vld [vmem:[%s2466_s28 + $0x8] sm:$0xff]  ;;  %vm2528_vm4 = vcmp.eq.s32.totalorder %v274_v13, 7  ;;  %vm2539_vm5 = vcmp.eq.s32.totalorder %v281_v22, 0 }
  0x15   : > { %2242 = vmatprep.mubr.msk.f32.mxu1 %vm2931_vm0, %v2485_v16  ;;  %2273 = vmatprep.subr.mxu1 %v2053_v20  ;;  %v2544_v37 = vld [vmem:[%s2466_s28 + $0x10] sm:$0xff]  ;;  %vm2546_vm6 = vcmp.eq.s32.totalorder %v281_v22, 7  ;;  %v386_v40 = vsel %vm2521_vm3, 0.0, %v2526_v32  ;;  %v676_v41 = vsel %vm2528_vm4, 0.0, %v2533_v34  ;;  %v302_v42 = vand.u32 7, %v260_v28  ;;  %v2566_v45 = vld [vmem:[%s2466_s28 + $0x18] sm:$0xff] }
  0x16   : > { %2287 = vmatprep.subr.mxu0 %v2070_v21  ;;  %2237 = vmatmul.mubr.msk.f32.gmra.mxu0 %vm2931_vm0, %v2507_v23  ;;  %v2955_v38 = vsel %vm2546_vm6, 4294967295, %v2954_v38  ;;  %v2551_v39 = vld [vmem:[%s2466_s28 + $0x12] sm:$0xff]  ;;  %v262_v43 = vadd.s32 56, %v255_v4  ;;  %vm2561_vm7 = vcmp.eq.s32.totalorder %v288_v26, 0  ;;  %vm2568_vm8 = vcmp.eq.s32.totalorder %v288_v26, 7  ;;  %v2573_v47 = vld [vmem:[%s2466_s28 + $0x1a] sm:$0xff] }
  0x17   : > { %2243 = vmatmul.mubr.msk.f32.gmra.mxu1 %vm2931_vm0, %v2510_v24  ;;  %2261 = vmatprep.mubr.msk.f32.mxu0 %vm2931_vm0, %v675_v30  ;;  %v2959_v46 = vsel %vm2568_vm8, 4294967295, %v2958_v46  ;;  %vm2575_vm9 = vcmp.eq.s32.totalorder %v295_v27, 0  ;;  %v2580_v49 = vld [vmem:[%s2466_s28 + $0x20] sm:$0xff]  ;;  %v387_v50 = vsel %vm2539_vm5, 0.0, %v2544_v37  ;;  %v677_v51 = vsel %vm2546_vm6, 0.0, %v2551_v39  ;;  %v2622_v62 = vld [vmem:[%s2466_s28 + $0x28] sm:$0xff] }
  0x18   : > { %2247 = vmatprep.mubr.msk.f32.mxu1 %vm2931_vm0, %v385_v29  ;;  %vm2588_vm10 = vcmp.eq.s32.totalorder %v295_v27, 7  ;;  %v2593_v53 = vld [vmem:[%s2466_s28 + $0x22] sm:$0xff]  ;;  %v309_v54 = vand.u32 7, %v261_v35  ;;  %v388_v57 = vsel %vm2561_vm7, 0.0, %v2566_v45  ;;  %v678_v58 = vsel %vm2568_vm8, 0.0, %v2573_v47  ;;  %v2629_v0 = vld [vmem:[%s2466_s28 + $0x2a] sm:$0xff] }
  0x19   : > { %v2963_v52 = vsel %vm2588_vm10, 4294967295, %v2962_v52  ;;  %v389_v59 = vsel %vm2575_vm9, 0.0, %v2580_v49  ;;  %v679_v60 = vsel %vm2588_vm10, 0.0, %v2593_v53  ;;  %vm2617_vm11 = vcmp.eq.s32.totalorder %v302_v42, 0  ;;  %v2636_v3 = vld [vmem:[%s2466_s28 + $0x30] sm:$0xff]  ;;  %v2666_v13 = vld [vmem:[%s2466_s28 + $0x38] sm:$0xff] }
  0x1a   : > { %2262 = vmatmul.mubr.msk.f32.vlgmr.msra.gmra.mxu0 %vm2931_vm0, %v676_v41  ;;  %vm2624_vm12 = vcmp.eq.s32.totalorder %v302_v42, 7  ;;  %v316_v1 = vand.u32 7, %v262_v43  ;;  %vm2631_vm13 = vcmp.eq.s32.totalorder %v309_v54, 0  ;;  %vm2638_vm14 = vcmp.eq.s32.totalorder %v309_v54, 7  ;;  %v2643_v5 = vld [vmem:[%s2466_s28 + $0x32] sm:$0xff]  ;;  %v2069_v42 = vld [vmem:[%s2466_s28 + $0x41] sm:$0xff] }
  0x1b   : > { %2248 = vmatmul.mubr.msk.f32.vlgmr.msra.gmra.mxu1 %vm2931_vm0, %v386_v40  ;;  %2288 = vmatpush3.msra.mxu0 %v2070_v21  ;;  %v2967_v63 = vsel %vm2624_vm12, 4294967295, %v2966_v63  ;;  %v2970_v4 = vmov 0  ;;  %v390_v6 = vsel %vm2617_vm11, 0.0, %v2622_v62  ;;  %v680_v7 = vsel %vm2624_vm12, 0.0, %v2629_v0  ;;  %v2121_v28 = vld [vmem:[%s2927_s1 + $0x38] sm:$0xff]  ;;  %v2052_v40 = vld [vmem:[%s2466_s28 + $0x40] sm:$0xff] }
  0x1c   : > { %2274 = vmatpush3.msra.mxu1 %v2053_v20  ;;  %2250 = vmatprep.mubr.msk.f32.mxu1 %vm2931_vm0, %v387_v50  ;;  %v2971_v4 = vsel %vm2638_vm14, 4294967295, %v2970_v4  ;;  %v391_v8 = vsel %vm2631_vm13, 0.0, %v2636_v3  ;;  %v681_v9 = vsel %vm2638_vm14, 0.0, %v2643_v5  ;;  %vm2661_vm15 = vcmp.eq.s32.totalorder %v316_v1, 0  ;;  %v2673_v20 = vld [vmem:[%s2466_s28 + $0x3a] sm:$0xff]  ;;  %v2137_v33 = vld [vmem:[%s2466_s28 + $0x4a] sm:$0xff] }
  0x1d   : > { %2264 = vmatprep.mubr.msk.f32.mxu0 %vm2931_vm0, %v677_v51  ;;  %2301 = vmatprep.subr.mxu1 %v2087_v55  ;;  %v2974_v19 = vmov 0  ;;  %vm2976_vm12 = vcmask 64512   ;;  %v392_v21 = vsel %vm2661_vm15, 0.0, %v2666_v13  ;;  %v834_v25 = vsel %vm2487_vm1, 0.0, %v2526_v32 }
  0x1e   : > { %2315 = vmatprep.subr.mxu0 %v2104_v56  ;;  %2265 = vmatmul.mubr.msk.f32.gmra.mxu0 %vm2931_vm0, %v678_v58  ;;  %vm2977_vm10 = vmmov %vm2976_vm12  ;;  %v835_v26 = vsel %vm2521_vm3, 0.0, %v2544_v37  ;;  %v836_v27 = vsel %vm2539_vm5, 0.0, %v2566_v45  ;;  %v837_v29 = vsel %vm2561_vm7, 0.0, %v2580_v49  ;;  %v838_v30 = vsel %vm2575_vm9, 0.0, %v2622_v62 }
  0x1f   : > { %2251 = vmatmul.mubr.msk.f32.gmra.mxu1 %vm2931_vm0, %v388_v57  ;;  %2267 = vmatprep.mubr.msk.f32.mxu0 %vm2931_vm0, %v679_v60  ;;  %vm2978_vm8 = vmmov %vm2977_vm10  ;;  %v839_v32 = vsel %vm2617_vm11, 0.0, %v2636_v3  ;;  %v840_v35 = vsel %vm2631_vm13, 0.0, %v2666_v13  ;;  %v841_v41 = vsel %vm2661_vm15, 0.0, %v2052_v40  ;;  %v1140_v43 = vsel %vm2491_vm2, 0.0, %v2533_v34  ;;  %v2103_v57 = vld [vmem:[%s2466_s28 + $0x48] sm:$0xff] }
  0x20   : > { %2253 = vmatprep.mubr.msk.f32.mxu1 %vm2931_vm0, %v389_v59  ;;  %vm2668_vm0 = vcmp.eq.s32.totalorder %v316_v1, 7  ;;  %vm2979_vm6 = vmmov %vm2978_vm8  ;;  %v1298_v50 = vsel %vm2487_vm1, 0.0, %v2544_v37  ;;  %v1141_v51 = vsel %vm2528_vm4, 0.0, %v2551_v39  ;;  %v1299_v34 = vsel %vm2521_vm3, 0.0, %v2566_v45 }
  0x21   : > { %v2975_v19 = vsel %vm2668_vm0, 4294967295, %v2974_v19  ;;  %v682_v22 = vsel %vm2668_vm0, 0.0, %v2673_v20  ;;  %vm2980_vm14 = vmmov %vm2979_vm6  ;;  %v1300_v37 = vsel %vm2539_vm5, 0.0, %v2580_v49  ;;  %v1301_v45 = vsel %vm2561_vm7, 0.0, %v2622_v62 }
  0x22   : > { %2268 = vmatmul.mubr.msk.f32.gmra.mxu0 %vm2977_vm10, %v680_v7  ;;  %vm2982_vm10 = vmmov %vm2979_vm6  ;;  %vm3003_vm5 = vnez %v2963_v52  ;;  %v1302_v49 = vsel %vm2575_vm9, 0.0, %v2636_v3  ;;  %vm3007_vm7 = vnez %v2967_v63  ;;  %v1303_v54 = vsel %vm2617_vm11, 0.0, %v2666_v13 }
  0x23   : > { %2254 = vmatmul.mubr.msk.f32.gmra.mxu1 %vm2976_vm12, %v390_v6  ;;  %2270 = vmatprep.mubr.msk.f32.mxu0 %vm2979_vm6, %v681_v9  ;;  %vm2981_vm12 = vmmov %vm2979_vm6  ;;  %v1144_v36 = vsel %vm3003_vm5, 0.0, %v2629_v0  ;;  %v1145_v44 = vsel %vm3007_vm7, 0.0, %v2643_v5  ;;  %v1305_v59 = vsel %vm2661_vm15, 0.0, %v2103_v57  ;;  %v1604_v60 = vsel %vm2491_vm2, 0.0, %v2551_v39 }
  0x24   : > { %2256 = vmatprep.mubr.msk.f32.mxu1 %vm2978_vm8, %v391_v8  ;;  %vm2983_vm8 = vmmov %vm2979_vm6  ;;  %v1605_v61 = vsel %vm2528_vm4, 0.0, %v2573_v47  ;;  %v1608_v18 = vsel %vm3003_vm5, 0.0, %v2643_v5 }
  0x25   : > { %vm2984_vm0 = vmmov %vm2979_vm6 }
  0x26   : > { %2271 = vmatmul.mubr.msk.f32.gmra.mxu0 %vm2981_vm12, %v682_v22  ;;  %vm2986_vm12 = vmmov %vm2984_vm0 }
  0x27   : > { %2257 = vmatmul.mubr.msk.f32.gmra.mxu1 %vm2980_vm14, %v392_v21  ;;  %2289 = vmatprep.mubr.msk.f32.mxu0 %vm2979_vm6, %v2473_v12  ;;  %v2138_v12 = vld [vmem:[%s2927_s1 + $0x40] sm:$0xff]  ;;  %vm2985_vm14 = vmmov %vm2984_vm0 }
  0x28   : > { %2275 = vmatprep.mubr.msk.f32.mxu1 %vm2982_vm10, %v834_v25  ;;  %vm2987_vm10 = vmmov %vm2984_vm0 }
  0x29   : > { %vm2988_vm6 = vmmov %vm2984_vm0 }
  0x2a   : > { %2290 = vmatmul.mubr.msk.f32.vlgmr.msra.gmra.mxu0 %vm2984_vm0, %v2482_v15 }
  0x2b   : > { %2276 = vmatmul.mubr.msk.f32.vlgmr.msra.gmra.mxu1 %vm2983_vm8, %v835_v26  ;;  %2316 = vmatpush3.msra.mxu0 %v2104_v56  ;;  %vm2989_vm8 = vmmov %vm2984_vm0  ;;  %v2086_v56 = vld [vmem:[%s2466_s28 + $0x42] sm:$0xff] }
  0x2c   : > { %2302 = vmatpush3.msra.mxu1 %v2087_v55  ;;  %2278 = vmatprep.mubr.msk.f32.mxu1 %vm2985_vm14, %v836_v27  ;;  %vm2990_vm14 = vmmov %vm2984_vm0  ;;  %v1304_v55 = vsel %vm2631_vm13, 0.0, %v2052_v40 }
  0x2d   : > { %2292 = vmatprep.mubr.msk.f32.mxu0 %vm2986_vm12, %v2507_v23  ;;  %2329 = vmatprep.subr.mxu1 %v2121_v28  ;;  %vm2991_vm12 = vmmov %vm2984_vm0 }
  0x2e   : > { %2343 = vmatprep.subr.mxu0 %v2138_v12  ;;  %2293 = vmatmul.mubr.msk.f32.gmra.mxu0 %vm2987_vm10, %v2470_v11  ;;  %vm2992_vm10 = vmmov %vm2984_vm0 }
  0x2f   : > { %2279 = vmatmul.mubr.msk.f32.gmra.mxu1 %vm2984_vm0, %v837_v29  ;;  %2295 = vmatprep.mubr.msk.f32.mxu0 %vm2989_vm8, %v2479_v14  ;;  %vm2994_vm8 = vmmov %vm2984_vm0 }
  0x30   : > { %2281 = vmatprep.mubr.msk.f32.mxu1 %vm2988_vm6, %v838_v30  ;;  %vm2993_vm6 = vmmov %vm2984_vm0 }
  0x31   : > { %vm2998_vm1 = vmmov %vm2993_vm6 }
  0x32   : > { %2296 = vmatmul.mubr.msk.f32.gmra.mxu0 %vm2991_vm12, %v2485_v16  ;;  %vm2996_vm12 = vmmov %vm2984_vm0 }
  0x33   : > { %2282 = vmatmul.mubr.msk.f32.gmra.mxu1 %vm2990_vm14, %v839_v32  ;;  %2298 = vmatprep.mubr.msk.f32.mxu0 %vm2992_vm10, %v2510_v24  ;;  %vm2995_vm14 = vmmov %vm2984_vm0 }
  0x34   : > { %2284 = vmatprep.mubr.msk.f32.mxu1 %vm2984_vm0, %v840_v35  ;;  %vm2997_vm0 = vnez %v2955_v38  ;;  %vm2999_vm10 = vmmov %vm2998_vm1 }
  0x35   : > { %v1142_v17 = vsel %vm2997_vm0, 0.0, %v2573_v47  ;;  %vm3001_vm3 = vmmov %vm2998_vm1  ;;  %v1606_v62 = vsel %vm2997_vm0, 0.0, %v2593_v53 }
  0x36   : > { %2299 = vmatmul.mubr.msk.f32.gmra.mxu0 %vm2994_vm8, %v2069_v42  ;;  %vm3002_vm8 = vmmov %vm2998_vm1 }
  0x37   : > { %2285 = vmatmul.mubr.msk.f32.gmra.mxu1 %vm2993_vm6, %v841_v41  ;;  %2317 = vmatprep.mubr.msk.f32.mxu0 %vm2996_vm12, %v1298_v50  ;;  %vm3000_vm6 = vnez %v2959_v46  ;;  %vm3005_vm12 = vmmov %vm2998_vm1 }
  0x38   : > { %2303 = vmatprep.mubr.msk.f32.mxu1 %vm2995_vm14, %v1140_v43  ;;  %v1143_v31 = vsel %vm3000_vm6, 0.0, %v2593_v53  ;;  %vm3004_vm14 = vmmov %vm2998_vm1 }
  0x39   : > { %vm3009_vm9 = vmmov %vm2998_vm1 }
  0x3a   : > { %2318 = vmatmul.mubr.msk.f32.vlgmr.msra.gmra.mxu0 %vm2999_vm10, %v1299_v34  ;;  %vm3006_vm10 = vmmov %vm2998_vm1 }
  0x3b   : > { %2304 = vmatmul.mubr.msk.f32.vlgmr.msra.gmra.mxu1 %vm2998_vm1, %v1141_v51  ;;  %2344 = vmatpush3.msra.mxu0 %v2138_v12 }
  0x3c   : > { %2330 = vmatpush3.msra.mxu1 %v2121_v28  ;;  %2306 = vmatprep.mubr.msk.f32.mxu1 %vm3001_vm3, %v1142_v17  ;;  %vm3008_vm3 = vnez %v2971_v4 }
  0x3d   : > { %2320 = vmatprep.mubr.msk.f32.mxu0 %vm3002_vm8, %v1300_v37  ;;  %v1146_v48 = vsel %vm3008_vm3, 0.0, %v2673_v20  ;;  %vm3010_vm8 = vmmov %vm2998_vm1 }
  0x3e   : > { %2321 = vmatmul.mubr.msk.f32.gmra.mxu0 %vm3005_vm12, %v1301_v45  ;;  %vm3012_vm12 = vmmov %vm2998_vm1 }
  0x3f   : > { %2307 = vmatmul.mubr.msk.f32.gmra.mxu1 %vm3004_vm14, %v1143_v31  ;;  %2323 = vmatprep.mubr.msk.f32.mxu0 %vm3006_vm10, %v1302_v49  ;;  %vm3011_vm14 = vmmov %vm2998_vm1 }
  0x40   : > { %2309 = vmatprep.mubr.msk.f32.mxu1 %vm2998_vm1, %v1144_v36  ;;  %vm3013_vm1 = vnez %v2975_v19  ;;  %vm3014_vm11 = vmmov %vm3010_vm8 }
  0x41   : > { %v1147_v58 = vsel %vm3013_vm1, 0.0, %v2086_v56  ;;  %vm3015_vm13 = vmmov %vm3010_vm8 }
  0x42   : > { %2324 = vmatmul.mubr.msk.f32.gmra.mxu0 %vm3010_vm8, %v1303_v54  ;;  %vm3016_vm10 = vmmov %vm3010_vm8 }
  0x43   : > { %2310 = vmatmul.mubr.msk.f32.gmra.mxu1 %vm3009_vm9, %v1145_v44  ;;  %2326 = vmatprep.mubr.msk.f32.mxu0 %vm3012_vm12, %v1304_v55  ;;  %vm3017_vm9 = vmmov %vm3010_vm8 }
  0x44   : > { %2312 = vmatprep.mubr.msk.f32.mxu1 %vm3011_vm14, %v1146_v48  ;;  %vm3018_vm2 = vmmov %vm3010_vm8 }
  0x45   : > { %vm3019_vm15 = vmmov %vm3018_vm2 }
  0x46   : > { %2327 = vmatmul.mubr.msk.f32.gmra.mxu0 %vm3015_vm13, %v1305_v59  ;;  %vm3020_vm8 = vmmov %vm3018_vm2 }
  0x47   : > { %2313 = vmatmul.mubr.msk.f32.gmra.mxu1 %vm3014_vm11, %v1147_v58  ;;  %2345 = vmatprep.mubr.msk.f32.mxu0 %vm3017_vm9, %v1604_v60  ;;  %vm3021_vm14 = vmmov %vm3018_vm2 }
  0x48   : > { %2331 = vmatprep.mubr.msk.f32.mxu1 %vm3016_vm10, %v2482_v15  ;;  %v1607_v15 = vsel %vm3000_vm6, 0.0, %v2629_v0  ;;  %vm3022_vm4 = vmmov %vm3018_vm2 }
  0x49   : > { %vm3023_vm0 = vmmov %vm3018_vm2 }
  0x4a   : > { %2346 = vmatmul.mubr.msk.f32.vlgmr.msra.gmra.mxu0 %vm3019_vm15, %v1605_v61  ;;  %vm3024_vm12 = vmmov %vm3023_vm0 }
  0x4b   : > { %2332 = vmatmul.mubr.msk.f32.vlgmr.msra.gmra.mxu1 %vm3018_vm2, %v2507_v23  ;;  %2348 = vmatprep.mubr.msk.f32.mxu0 %vm3021_vm14, %v1606_v62  ;;  %vm3025_vm11 = vmmov %vm3023_vm0  ;;  %v1610_v23 = vsel %vm3008_vm3, 0.0, %v2086_v56 }
  0x4c   : > { %2334 = vmatprep.mubr.msk.f32.mxu1 %vm3020_vm8, %v2470_v11  ;;  %v1609_v11 = vsel %vm3007_vm7, 0.0, %v2673_v20  ;;  %vm3026_vm6 = vmmov %vm3023_vm0 }
  0x4d   : > { %vm3027_vm5 = vmmov %vm3023_vm0 }
  0x4e   : > { %2349 = vmatmul.mubr.msk.f32.gmra.mxu0 %vm3023_vm0, %v1607_v15  ;;  %vm3028_vm13 = vmmov %vm3023_vm0 }
  0x4f   : > { %2335 = vmatmul.mubr.msk.f32.gmra.mxu1 %vm3022_vm4, %v2479_v14  ;;  %2351 = vmatprep.mubr.msk.f32.mxu0 %vm3025_vm11, %v1608_v18  ;;  %vm3029_vm10 = vmmov %vm3023_vm0  ;;  %v2120_v14 = vld [vmem:[%s2466_s28 + $0x49] sm:$0xff]  ;;  %s253_s28 = scalar_lea.vmem %s2930_s4, %s3059_s15 }
  0x50   : > { %2337 = vmatprep.mubr.msk.f32.mxu1 %vm3024_vm12, %v2485_v16  ;;  %v1611_v16 = vsel %vm3013_vm1, 0.0, %v2137_v33  ;;  %vm3030_vm9 = vmmov %vm3023_vm0 }
  0x51   : > { %vm3031_vm7 = vmmov %vm3023_vm0 }
  0x52   : > { %2352 = vmatmul.mubr.msk.f32.gmra.mxu0 %vm3027_vm5, %v1609_v11  ;;  %vm3032_vm3 = vmmov %vm3023_vm0 }
  0x53   : > { %2338 = vmatmul.mubr.msk.f32.gmra.mxu1 %vm3026_vm6, %v2510_v24  ;;  %2354 = vmatprep.mubr.msk.f32.mxu0 %vm3029_vm10, %v1610_v23  ;;  %vm3033_vm1 = vmmov %vm3023_vm0 }
  0x54   : > { %2340 = vmatprep.mubr.msk.f32.mxu1 %vm3028_vm13, %v2069_v42  ;;  %vm3034_vm2 = vmmov %vm3023_vm0 }
  0x55   : > { %vm3035_vm15 = vmmov %vm3023_vm0 }
  0x56   : > { %2355 = vmatmul.mubr.msk.f32.gmra.mxu0 %vm3031_vm7, %v1611_v16  ;;  %vm3036_vm8 = vmmov %vm3023_vm0 }
  0x57   : > { %2341 = vmatmul.mubr.msk.f32.gmra.mxu1 %vm3030_vm9, %v2120_v14  ;;  %vm3037_vm14 = vmmov %vm3023_vm0 }
  0x58   : > { %vm3038_vm4 = vmmov %vm3023_vm0 }
  0x59   : > { %vm3039_vm12 = vmmov %vm3023_vm0 }
  0x5a   : > { %vm3040_vm11 = vmmov %vm3023_vm0 }
  0x5b   : > { %vm3041_vm6 = vmmov %vm3023_vm0 }
  0x5c   : > { %vm3042_vm5 = vmmov %vm3023_vm0 }
  0x5d   : > { %vm3043_vm13 = vmmov %vm3023_vm0 }
  0x5e   : > { %vm3044_vm10 = vmmov %vm3023_vm0 }
  0x5f   : > { %vm3045_vm9 = vmmov %vm3023_vm0 }
  0x60   : > { %vm3046_vm7 = vmmov %vm3023_vm0 }
  0xd2   : > { %v2235_v38 = vpop.f32.mrf.mxu0 }
  0xd3   : > { %v2241_v39 = vpop.f32.mrf.mxu1 }
  0xd4   : > { %v497_v46 = vpop.f32.mrf.mxu0 }
  0xd5   : > { %v517_v47 = vpop.f32.mrf.mxu1 }
  0xd6   : > { %v2238_v52 = vpop.f32.mrf.mxu0 }
  0xd7   : > { %v2850_v24 = vpop.f32.mrf.mxu1 }
  0xd8   : > { %v507_v53 = vpop.f32.mrf.mxu0 }
  0xd9   : > { %v2852_v63 = vpop.f32.mrf.mxu1 }
  0xda   : > { %v2263_v1 = vpop.f32.mrf.mxu0 }
  0xdb   : > { %v2249_v0 = vpop.f32.mrf.mxu1 }
  0xdc   : > { %v775_v3 = vpop.f32.mrf.mxu0  ;;  %v632_v17 = vadd.f32 %v2249_v0, %v2235_v38 }
  0xdd   : > { %v626_v2 = vpop.f32.mrf.mxu1 }
  0xde   : > { %v2266_v5 = vpop.f32.mrf.mxu0  ;;  %v627_v45 = vadd.f32 %v626_v2, %v497_v46  ;;  %v815_v44 = vadd.f32 %v2263_v1, %v632_v17 }
  0xdf   : > { %v2252_v4 = vpop.f32.mrf.mxu1 }
  0xe0   : > { %v785_v7 = vpop.f32.mrf.mxu0  ;;  %v642_v54 = vadd.f32 %v2252_v4, %v2238_v52  ;;  %v814_v56 = vadd.f32 %v775_v3, %v627_v45 }
  0xe1   : > { %v636_v6 = vpop.f32.mrf.mxu1 }
  0xe2   : > { %v2269_v9 = vpop.f32.mrf.mxu0  ;;  %v637_v58 = vadd.f32 %v636_v6, %v507_v53  ;;  %v817_v61 = vadd.f32 %v2266_v5, %v642_v54 }
  0xe3   : > { %v2255_v8 = vpop.f32.mrf.mxu1 }
  0xe4   : > { %v795_v13 = vpop.f32.mrf.mxu0  ;;  %v652_v62 = vadd.f32 %v2255_v8, %v2241_v39  ;;  %v816_v16 = vadd.f32 %v785_v7, %v637_v58 }
  0xe5   : > { %v646_v10 = vpop.f32.mrf.mxu1 }
  0xe6   : > { %v2854_v20 = vpop.f32.mrf.mxu0  ;;  %v647_v18 = vadd.f32 %v646_v10, %v517_v47  ;;  %v819_v0 = vadd.f32 %v2269_v9, %v652_v62 }
  0xe7   : > { %v2258_v19 = vpop.f32.mrf.mxu1 }
  0xe8   : > { %v805_v22 = vpop.f32.mrf.mxu0  ;;  %v818_v2 = vadd.f32 %v795_v13, %v647_v18  ;;  %v662_v53 = vadd.f32 %v2258_v19, %v2850_v24 }
  0xe9   : > { %v656_v21 = vpop.f32.mrf.mxu1 }
  0xea   : > { %v2291_v26 = vpop.f32.mrf.mxu0  ;;  %v657_v3 = vadd.f32 %v656_v21, %v2852_v63  ;;  %v821_v13 = vadd.f32 %v2854_v20, %v662_v53 }
  0xeb   : > { %v2277_v25 = vpop.f32.mrf.mxu1 }
  0xec   : > { %v1083_v28 = vpop.f32.mrf.mxu0  ;;  %v974_v57 = vadd.f32 %v2277_v25, %v815_v44 }
  0xed   : > { %v934_v27 = vpop.f32.mrf.mxu1 }
  0xee   : > { %v2294_v29 = vpop.f32.mrf.mxu0  ;;  %v973_v15 = vadd.f32 %v934_v27, %v814_v56  ;;  %v1123_v33 = vadd.f32 %v2291_v26, %v974_v57  ;;  %v820_v27 = vadd.f32 %v805_v22, %v657_v3 }
  0xef   : > { %v2280_v12 = vpop.f32.mrf.mxu1 }
  0xf0   : > { %v1093_v32 = vpop.f32.mrf.mxu0  ;;  %v976_v14 = vadd.f32 %v2280_v12, %v817_v61  ;;  %v1122_v52 = vadd.f32 %v1083_v28, %v973_v15 }
  0xf1   : > { %v944_v30 = vpop.f32.mrf.mxu1 }
  0xf2   : > { %v2297_v40 = vpop.f32.mrf.mxu0  ;;  %v975_v4 = vadd.f32 %v944_v30, %v816_v16  ;;  %v1125_v47 = vadd.f32 %v2294_v29, %v976_v14 }
  0xf3   : > { %v2283_v35 = vpop.f32.mrf.mxu1 }
  0xf4   : > { %v1103_v42 = vpop.f32.mrf.mxu0  ;;  %v978_v6 = vadd.f32 %v2283_v35, %v819_v0  ;;  %v1124_v24 = vadd.f32 %v1093_v32, %v975_v4 }
  0xf5   : > { %v954_v41 = vpop.f32.mrf.mxu1 }
  0xf6   : > { %v2856_v50 = vpop.f32.mrf.mxu0  ;;  %v977_v10 = vadd.f32 %v954_v41, %v818_v2  ;;  %v1127_v21 = vadd.f32 %v2297_v40, %v978_v6 }
  0xf7   : > { %v2286_v43 = vpop.f32.mrf.mxu1 }
  0xf8   : > { %v2858_v34 = vpop.f32.mrf.mxu0  ;;  %v1126_v30 = vadd.f32 %v1103_v42, %v977_v10  ;;  %v980_v29 = vadd.f32 %v2286_v43, %v821_v13 }
  0xf9   : > { %v964_v51 = vpop.f32.mrf.mxu1 }
  0xfa   : > { %v2319_v31 = vpop.f32.mrf.mxu0  ;;  %v979_v35 = vadd.f32 %v964_v51, %v820_v27  ;;  %v1129_v51 = vadd.f32 %v2856_v50, %v980_v29 }
  0xfb   : > { %v2305_v37 = vpop.f32.mrf.mxu1 }
  0xfc   : > { %v1398_v49 = vpop.f32.mrf.mxu0  ;;  %v1280_v1 = vadd.f32 %v2305_v37, %v1123_v33 }
  0xfd   : > { %v1240_v36 = vpop.f32.mrf.mxu1 }
  0xfe   : > { %v2322_v55 = vpop.f32.mrf.mxu0  ;;  %v1279_v8 = vadd.f32 %v1240_v36, %v1122_v52  ;;  %v1438_v9 = vadd.f32 %v2319_v31, %v1280_v1 }
  0xff   : > { %v2308_v48 = vpop.f32.mrf.mxu1 }
 0x100   : > { %v1408_v60 = vpop.f32.mrf.mxu0  ;;  %v1282_v26 = vadd.f32 %v2308_v48, %v1125_v47  ;;  %v1437_v28 = vadd.f32 %v1398_v49, %v1279_v8  ;;  %v1128_v48 = vadd.f32 %v2858_v34, %v979_v35 }
 0x101   : > { %v1250_v59 = vpop.f32.mrf.mxu1 }
 0x102   : > { %v2325_v23 = vpop.f32.mrf.mxu0  ;;  %v1281_v17 = vadd.f32 %v1250_v59, %v1124_v24  ;;  %v1440_v20 = vadd.f32 %v2322_v55, %v1282_v26 }
 0x103   : > { %v2311_v11 = vpop.f32.mrf.mxu1 }
 0x104   : > { %v1418_v46 = vpop.f32.mrf.mxu0  ;;  %v1284_v22 = vadd.f32 %v2311_v11, %v1127_v21  ;;  %v1439_v49 = vadd.f32 %v1408_v60, %v1281_v17 }
 0x105   : > { %v1260_v38 = vpop.f32.mrf.mxu1 }
 0x106   : > { %v2862_v5 = vpop.f32.mrf.mxu0  ;;  %v1283_v36 = vadd.f32 %v1260_v38, %v1126_v30  ;;  %v1442_v55 = vadd.f32 %v2325_v23, %v1284_v22 }
 0x107   : > { %v2314_v39 = vpop.f32.mrf.mxu1 }
 0x108   : > { %v2864_v25 = vpop.f32.mrf.mxu0  ;;  %v1286_v58 = vadd.f32 %v2314_v39, %v1129_v51  ;;  %v1441_v50 = vadd.f32 %v1418_v46, %v1283_v36 }
 0x109   : > { %v1270_v7 = vpop.f32.mrf.mxu1 }
 0x10a   : > { %v2347_v63 = vpop.f32.mrf.mxu0  ;;  %v1285_v11 = vadd.f32 %v1270_v7, %v1128_v48  ;;  %v1444_v2 = vadd.f32 %v2862_v5, %v1286_v58 }
 0x10b   : > { %v2333_v19 = vpop.f32.mrf.mxu1 }
 0x10c   : > { %v1587_v12 = vadd.f32 %v2333_v19, %v1438_v9  ;;  %v1704_v37 = vpop.f32.mrf.mxu0  ;;  %v1443_v10 = vadd.f32 %v2864_v25, %v1285_v11 }
 0x10d   : > { %v1547_v41 = vpop.f32.mrf.mxu1 }
 0x10e   : > { %v1744_v32 = vadd.f32 %v2347_v63, %v1587_v12  ;;  %v1586_v31 = vadd.f32 %v1547_v41, %v1437_v28  ;;  %v2350_v45 = vpop.f32.mrf.mxu0 }
 0x10f   : > { %v2336_v40 = vpop.f32.mrf.mxu1 }
 0x110   : > { %1752 = vst.msk [vmem:[%s2871_s22 + $0x8] sm:$0xff] %vm3032_vm3, %v1744_v32  ;;  %v1743_v42 = vadd.f32 %v1704_v37, %v1586_v31  ;;  %v1589_v43 = vadd.f32 %v2336_v40, %v1440_v20  ;;  %v1714_v54 = vpop.f32.mrf.mxu0  ;;  %v1783_v59 = vmul.f32 %v1744_v32, %v1744_v32  ;;  %v1760_v34 = vsel %vm3036_vm8, %v1744_v32, 0.0  ;;  %vm3047_vm3 = vmmov %vm3023_vm0 }
 0x111   : > { %v1557_v44 = vpop.f32.mrf.mxu1  ;;  %vm3051_vm8 = vmmov %vm3023_vm0 }
 0x112   : > { %1751 = vst.msk [vmem:[%s2871_s22] sm:$0xff] %vm3033_vm1, %v1743_v42  ;;  %v1782_v56 = vmul.f32 %v1743_v42, %v1743_v42  ;;  %v1746_v57 = vadd.f32 %v2350_v45, %v1589_v43  ;;  %v1759_v61 = vsel %vm3034_vm2, %v1743_v42, 0.0  ;;  %v1588_v62 = vadd.f32 %v1557_v44, %v1439_v49  ;;  %v2353_v18 = vpop.f32.mrf.mxu0  ;;  %vm3048_vm1 = vmmov %vm3023_vm0 }
 0x113   : > { %v2339_v15 = vpop.f32.mrf.mxu1  ;;  %v1761_v38 = vadd.f32 %v1760_v34, %v1759_v61  ;;  %v1791_v46 = vsel %vm3038_vm4, %v1783_v59, 0.0  ;;  %vm3049_vm2 = vmmov %vm3023_vm0 }
 0x114   : > { %1754 = vst.msk [vmem:[%s2871_s22 + $0x18] sm:$0xff] %vm3035_vm15, %v1746_v57  ;;  %v1591_v60 = vadd.f32 %v2339_v15, %v1442_v55  ;;  %v1790_v23 = vsel %vm3037_vm14, %v1782_v56, 0.0  ;;  %v1745_v33 = vadd.f32 %v1714_v54, %v1588_v62  ;;  %v1724_v16 = vpop.f32.mrf.mxu0  ;;  %v1785_v0 = vmul.f32 %v1746_v57, %v1746_v57  ;;  %vm3050_vm15 = vmmov %vm3023_vm0 }
 0x115   : > { %v1567_v14 = vpop.f32.mrf.mxu1  ;;  %v1792_v39 = vadd.f32 %v1791_v46, %v1790_v23  ;;  %v1764_v7 = vsel %vm3041_vm6, %v1746_v57, 0.0  ;;  %vm3052_vm14 = vmmov %vm3023_vm0 }
 0x116   : > { %v1748_v52 = vadd.f32 %v2353_v18, %v1591_v60  ;;  %v1590_v1 = vadd.f32 %v1567_v14, %v1441_v50  ;;  %1753 = vst.msk [vmem:[%s2871_s22 + $0x10] sm:$0xff] %vm3023_vm0, %v1745_v33  ;;  %v1762_v53 = vsel %vm3039_vm12, %v1745_v33, 0.0  ;;  %v1784_v3 = vmul.f32 %v1745_v33, %v1745_v33  ;;  %v2356_v8 = vpop.f32.mrf.mxu0  ;;  %vm3053_vm4 = vmmov %vm3023_vm0 }
 0x117   : > { %v2342_v4 = vpop.f32.mrf.mxu1  ;;  %v1763_v47 = vadd.f32 %v1762_v53, %v1761_v38  ;;  %v1795_v13 = vsel %vm3043_vm13, %v1785_v0, 0.0  ;;  %vm1780_vm12 = vcmask 57344  }
 0x118   : > { %1756 = vst.msk [vmem:[%s2871_s22 + $0x28] sm:$0xff] %vm3040_vm11, %v1748_v52  ;;  %v1747_v6 = vadd.f32 %v1724_v16, %v1590_v1  ;;  %v1793_v5 = vsel %vm3042_vm5, %v1784_v3, 0.0  ;;  %v1593_v9 = vadd.f32 %v2342_v4, %v1444_v2  ;;  %v1787_v63 = vmul.f32 %v1748_v52, %v1748_v52  ;;  %v1734_v29 = vpop.f32.mrf.mxu0 }
 0x119   : > { %v1577_v26 = vpop.f32.mrf.mxu1  ;;  %v1794_v27 = vadd.f32 %v1793_v5, %v1792_v39  ;;  %v1765_v24 = vadd.f32 %v1764_v7, %v1763_v47  ;;  %v1768_v35 = vsel %vm3046_vm7, %v1748_v52, 0.0 }
 0x11a   : > { %1755 = vst.msk [vmem:[%s2871_s22 + $0x20] sm:$0xff] %vm3044_vm10, %v1747_v6  ;;  %v1766_v19 = vsel %vm3045_vm9, %v1747_v6, 0.0  ;;  %v1786_v21 = vmul.f32 %v1747_v6, %v1747_v6  ;;  %v1750_v28 = vadd.f32 %v2356_v8, %v1593_v9  ;;  %v1592_v25 = vadd.f32 %v1577_v26, %v1443_v10 }
 0x11b   : > { %v1767_v12 = vadd.f32 %v1766_v19, %v1765_v24  ;;  %v1796_v30 = vadd.f32 %v1795_v13, %v1794_v27  ;;  %v1799_v22 = vsel %vm3049_vm2, %v1787_v63, 0.0 }
 0x11c   : > { %v1797_v17 = vsel %vm3047_vm3, %v1786_v21, 0.0  ;;  %1758 = vst.msk [vmem:[%s2871_s22 + $0x38] sm:$0xff] %vm3048_vm1, %v1750_v28  ;;  %v1749_v41 = vadd.f32 %v1734_v29, %v1592_v25  ;;  %v1789_v32 = vmul.f32 %v1750_v28, %v1750_v28  ;;  %v1772_v42 = vsel %vm3052_vm14, %v1750_v28, 0.0 }
 0x11d   : > { %v1798_v37 = vadd.f32 %v1797_v17, %v1796_v30  ;;  %v1769_v20 = vadd.f32 %v1768_v35, %v1767_v12 }
 0x11e   : > { %1757 = vst.msk [vmem:[%s2871_s22 + $0x30] sm:$0xff] %vm3050_vm15, %v1749_v41  ;;  %v1770_v31 = vsel %vm3051_vm8, %v1749_v41, 0.0  ;;  %v1788_v40 = vmul.f32 %v1749_v41, %v1749_v41  ;;  %v1803_v44 = vsel %vm3023_vm0, %v1789_v32, 0.0 }
 0x11f   : > { %v1771_v45 = vadd.f32 %v1770_v31, %v1769_v20  ;;  %v1800_v36 = vadd.f32 %v1799_v22, %v1798_v37 }
 0x120   : > { %v1801_v43 = vsel %vm3053_vm4, %v1788_v40, 0.0 }
 0x121   : > { %v1773_v51 = vadd.f32 %v1772_v42, %v1771_v45  ;;  %v1802_v49 = vadd.f32 %v1801_v43, %v1800_v36 }
 0x123   : > { %v1774_v54 = vrot.slane %v1773_v51, 4  ;;  %v1804_v48 = vadd.f32 %v1803_v44, %v1802_v49 }
 0x125   : > { %v1775_v55 = vadd.f32 %v1774_v54, %v1773_v51  ;;  %v1805_v56 = vrot.slane %v1804_v48, 4 }
 0x127   : > { %v1776_v57 = vrot.slane %v1775_v55, 2  ;;  %v1806_v58 = vadd.f32 %v1805_v56, %v1804_v48 }
 0x129   : > { %v1777_v59 = vadd.f32 %v1776_v57, %v1775_v55  ;;  %v1807_v61 = vrot.slane %v1806_v58, 2 }
 0x12b   : > { %v1778_v62 = vrot.slane %v1777_v59, 1  ;;  %v1808_v15 = vadd.f32 %v1807_v61, %v1806_v58 }
 0x12d   : > { %v1779_v18 = vadd.f32 %v1778_v62, %v1777_v59  ;;  %v1809_v50 = vrot.slane %v1808_v15, 1 }
 0x12f   : > { %1781 = vst.msk [vmem:[%s247_s25] sm:$0x1] %vm1780_vm12, %v1779_v18  ;;  %v1810_v60 = vadd.f32 %v1809_v50, %v1808_v15 }
 0x131   : > { %1811 = vst.msk [vmem:[%s253_s28] sm:$0x1] %vm1780_vm12, %v1810_v60 }
 0x132 PF: > { %s15_s17 = sadd.s32 1, %s2406_s17   ;;  %s3054_s15 = smov %s2402_s16 }
 0x133   : > { %p12_p5 = scmp.ge.s32.totalorder %s15_s17, 4   ;;  %s3055_s16 = smov %s3057_s18 }
 0x135   :  { %14 = sbr.rel (!%p12_p5) target bundleno = 2 (0x2), region = 99 }

// kernel: conv_block_forward.4
= control target key start
LH: loop header
LB: loop body
LE: loop exit
PB: predicated region body
PF: predicated region fallthrough
CT: control target
= control target key end

     0   :  { %s6179_s15 = smov 0   ;;  %s6181_s16 = smov 0   ;;  %s8196_s0 = inlined_call_operand.vmem [shape: f32[2,290,4], index: 0, kind: input, shape index: {}]   ;;  %s8197_s1 = inlined_call_operand.vmem [shape: f32[9,4,8], index: 1, kind: input, shape index: {}]   ;;  %s8198_s2 = inlined_call_operand.vmem [shape: f32[2,256,8], index: 2, kind: output, shape index: {0}]   ;;  %s8199_s3 = inlined_call_operand.vmem [shape: f32[2,1,1,8], index: 3, kind: output, shape index: {1}]   ;;  %s8200_s4 = inlined_call_operand.vmem [shape: f32[2,1,1,8], index: 4, kind: output, shape index: {2}]  }
   0x1   :  { %s6183_s17 = smov 0  }
   0x2 LB: > { %s27_s18 = sadd.s32 1, %s6148_s16  ;;  %p4788_p0 = scmp.ge.s32.totalorder %s6152_s17, 1  ;;  %s6152_s17 = sphi %s6183_s17, %s15_s17   ;;  %s6148_s16 = sphi %s6181_s16, %s8860_s16   ;;  %s6144_s15 = sphi %s6179_s15, %s8859_s15  }
   0x3   : > { %p29_p1 = scmp.ge.s32.totalorder %s27_s18, 2  ;;  %p185_p2 = scmp.lt.s32.totalorder %s6152_s17, 3 }
   0x5   : > { %s8862_s18 = smov (%p29_p1, %s27_s18), 0  ;;  %p186_p3 = pnand %p4788_p0, %p185_p2 }
   0x7   : > { %189 = sbr.rel (%p186_p3) target bundleno = 524 (0x20c), region = 28 }
   0xc   : > { %v4824_v0 = vld [vmem:[%s8197_s1 + $0x4] sm:$0xf]  ;;  %vm8223_vm0 = vcmask 1043456   ;;  %p227_p4 = scmp.lt.s32.totalorder %s6144_s15, 1  ;;  %v801_v1 = vld [vmem:[%s8197_s1] sm:$0xf]  ;;  %v254_v23 = vlaneseq }
   0xd   : > { %6103 = vmatprep.subr.msk.mxu1 %vm8223_vm0, %v4824_v0  ;;  %5653 = vmatprep.subr.msk.mxu0 %vm8223_vm0, %v4824_v0  ;;  %v4923_v2 = vld [vmem:[%s8197_s1 + $0x8] sm:$0xf]  ;;  %vm8227_vm1 = vcmask 31744   ;;  %v6243_v9 = vld [vmem:[%s8197_s1 + $0xc] sm:$0xf]  ;;  %v8354_v50 = vmov 0 }
   0xe   : > { %6104 = vmatpush3.msk.msra.mxu1 %vm8223_vm0, %v4824_v0  ;;  %5654 = vmatpush3.msk.msra.mxu0 %vm8223_vm0, %v4824_v0  ;;  %s8864_s15 = smov (!%p227_p4, %s6144_s15), 1  ;;  %v6248_v10 = vld [vmem:[%s8197_s1 + $0x10] sm:$0xf]  ;;  %v6332_v28 = vshrl.u32 %v254_v23, 7  ;;  %v8359_v61 = vmov 0 }
   0xf   : > { %5703 = vmatprep.subr.msk.mxu1 %vm8223_vm0, %v801_v1  ;;  %5753 = vmatprep.subr.msk.mxu0 %vm8223_vm0, %v4923_v2  ;;  %s6105_s25 = smul.u32 296, %s8864_s15  ;;  %s5355_s19 = sshll.u32 %s8864_s15, 8 }
  0x10   : > { %v256_v33 = vadd.s32 8, %v6332_v28  ;;  %v291_v34 = vand.u32 15, %v6332_v28  ;;  %v257_v35 = vadd.s32 16, %v6332_v28  ;;  %v258_v41 = vadd.s32 24, %v6332_v28  ;;  %s7931_s22 = scalar_lea.vmem %s8198_s2, %s5355_s19 }
  0x11   : > { %s6218_s28 = scalar_lea.vmem %s8196_s0, %s6105_s25  ;;  %v259_v44 = vadd.s32 32, %v6332_v28  ;;  %v260_v53 = vadd.s32 40, %v6332_v28  ;;  %v261_v55 = vadd.s32 48, %v6332_v28  ;;  %v262_v60 = vadd.s32 56, %v6332_v28  ;;  %s247_s25 = scalar_lea.vmem %s8199_s3, %s8864_s15 }
  0x12   : > { %v4792_v3 = vld [vmem:[%s6218_s28 + $0x1] sm:$0xff]  ;;  %v4793_v5 = vld [vmem:[%s6218_s28 + $0x9] sm:$0xff]  ;;  %v6232_v7 = vld [vmem:[%s6218_s28 + $0x11] sm:$0xff]  ;;  %v298_v40 = vand.u32 15, %v256_v33  ;;  %vm6378_vm2 = vcmp.eq.s32.totalorder %v291_v34, 0  ;;  %v305_v45 = vand.u32 15, %v257_v35 }
  0x13   : > { %v6222_v4 = vld [vmem:[%s6218_s28 + $0x81] sm:$0xff]  ;;  %5655 = vmatprep.mubr.msk.f32.mxu0 %vm8227_vm1, %v4792_v3  ;;  %v6229_v6 = vld [vmem:[%s6218_s28 + $0x89] sm:$0xff]  ;;  %v6235_v8 = vld [vmem:[%s6218_s28 + $0x91] sm:$0xff]  ;;  %v312_v52 = vand.u32 15, %v258_v41  ;;  %v319_v54 = vand.u32 15, %v259_v44  ;;  %v326_v63 = vand.u32 15, %v260_v53 }
  0x14   : > { %5679 = vmatprep.mubr.msk.f32.mxu1 %vm8227_vm1, %v6222_v4  ;;  %8338 = vst [vmem:[#allocation2_spill] sm:$0xff] %v6235_v8  ;;  %5656 = vmatmul.mubr.msk.f32.vlgmr.msra.gmra.mxu0 %vm8227_vm1, %v4793_v5  ;;  %v6253_v11 = vld [vmem:[%s6218_s28 + $0x19] sm:$0xff]  ;;  %v6263_v13 = vld [vmem:[%s6218_s28 + $0x21] sm:$0xff]  ;;  %v6281_v15 = vld [vmem:[%s6218_s28 + $0x29] sm:$0xff]  ;;  %vm6401_vm3 = vcmp.eq.s32.totalorder %v298_v40, 15  ;;  %vm6412_vm4 = vcmp.eq.s32.totalorder %v305_v45, 0 }
  0x15   : > { %5680 = vmatmul.mubr.msk.f32.vlgmr.msra.gmra.mxu1 %vm8227_vm1, %v6229_v6  ;;  %5754 = vmatpush3.msk.msra.mxu0 %vm8223_vm0, %v4923_v2  ;;  %v6256_v12 = vld [vmem:[%s6218_s28 + $0x99] sm:$0xff]  ;;  %v6266_v14 = vld [vmem:[%s6218_s28 + $0xa1] sm:$0xff]  ;;  %v6284_v16 = vld [vmem:[%s6218_s28 + $0xa9] sm:$0xff]  ;;  %v8355_v50 = vsel %vm6401_vm3, 4294967295, %v8354_v50  ;;  %vm6425_vm5 = vcmp.eq.s32.totalorder %v312_v52, 15  ;;  %vm6438_vm6 = vcmp.eq.s32.totalorder %v319_v54, 0 }
  0x16   : > { %5704 = vmatpush3.msk.msra.mxu1 %vm8223_vm0, %v801_v1  ;;  %8339 = vst [vmem:[#allocation3_spill] sm:$0xff] %v6256_v12  ;;  %5658 = vmatprep.mubr.msk.f32.mxu0 %vm8227_vm1, %v6232_v7  ;;  %8340 = vst [vmem:[#allocation4_spill] sm:$0xff] %v6266_v14  ;;  %v6287_v17 = vld [vmem:[%s6218_s28 + $0x31] sm:$0xff]  ;;  %v6301_v19 = vld [vmem:[%s6218_s28 + $0x39] sm:$0xff]  ;;  %v8360_v61 = vsel %vm6425_vm5, 4294967295, %v8359_v61  ;;  %v8364_v2 = vmov 0 }
  0x17   : > { %5682 = vmatprep.mubr.msk.f32.mxu1 %vm8227_vm1, %v6235_v8  ;;  %5803 = vmatprep.subr.msk.mxu1 %vm8223_vm0, %v6243_v9  ;;  %8341 = vst [vmem:[#allocation5_spill] sm:$0xff] %v6284_v16  ;;  %v6290_v18 = vld [vmem:[%s6218_s28 + $0xb1] sm:$0xff]  ;;  %v6304_v20 = vld [vmem:[%s6218_s28 + $0xb9] sm:$0xff]  ;;  %v6307_v21 = vld [vmem:[%s6218_s28 + $0x41] sm:$0xff]  ;;  %v8365_v2 = vsel %vm6438_vm6, 4294967295, %v8364_v2  ;;  %v333_v5 = vand.u32 15, %v261_v55 }
  0x18   : > { %5853 = vmatprep.subr.msk.mxu0 %vm8223_vm0, %v6248_v10  ;;  %5659 = vmatmul.mubr.msk.f32.gmra.mxu0 %vm8227_vm1, %v6253_v11  ;;  %8342 = vst [vmem:[#allocation6_spill] sm:$0xff] %v6290_v18  ;;  %8343 = vst [vmem:[#allocation7_spill] sm:$0xff] %v6304_v20  ;;  %v6310_v22 = vld [vmem:[%s6218_s28 + $0xc1] sm:$0xff]  ;;  %v6321_v24 = vld [vmem:[%s6218_s28 + $0x49] sm:$0xff]  ;;  %v263_v23 = vadd.s32 64, %v6332_v28  ;;  %v340_v41 = vand.u32 15, %v262_v60 }
  0x19   : > { %5683 = vmatmul.mubr.msk.f32.gmra.mxu1 %vm8227_vm1, %v6256_v12  ;;  %5661 = vmatprep.mubr.msk.f32.mxu0 %vm8227_vm1, %v6263_v13  ;;  %8344 = vst [vmem:[#allocation8_spill] sm:$0xff] %v6310_v22  ;;  %v6324_v25 = vld [vmem:[%s6218_s28 + $0xc9] sm:$0xff]  ;;  %v6327_v26 = vld [vmem:[%s6218_s28 + $0x51] sm:$0xff]  ;;  %v6343_v29 = vld [vmem:[%s6218_s28 + $0x59] sm:$0xff]  ;;  %vm6478_vm7 = vcmp.eq.s32.totalorder %v326_v63, 15  ;;  %v8367_v44 = vmov 0 }
  0x1a   : > { %5685 = vmatprep.mubr.msk.f32.mxu1 %vm8227_vm1, %v6266_v14  ;;  %8345 = vst [vmem:[#allocation9_spill] sm:$0xff] %v6324_v25  ;;  %v6330_v27 = vld [vmem:[%s6218_s28 + $0xd1] sm:$0xff]  ;;  %v6346_v30 = vld [vmem:[%s6218_s28 + $0xd9] sm:$0xff]  ;;  %v6349_v31 = vld [vmem:[%s6218_s28 + $0x61] sm:$0xff]  ;;  %v8368_v44 = vsel %vm6478_vm7, 4294967295, %v8367_v44  ;;  %vm6485_vm8 = vcmp.eq.s32.totalorder %v333_v5, 0 }
  0x1b   : > { %8346 = vst [vmem:[#allocation10_spill] sm:$0xff] %v6330_v27  ;;  %8347 = vst [vmem:[#allocation11_spill] sm:$0xff] %v6346_v30  ;;  %v6352_v32 = vld [vmem:[%s6218_s28 + $0xe1] sm:$0xff]  ;;  %v6366_v36 = vld [vmem:[%s6218_s28 + $0x69] sm:$0xff]  ;;  %v265_v52 = vadd.s32 80, %v6332_v28  ;;  %vm6509_vm9 = vcmp.eq.s32.totalorder %v340_v41, 15 }
  0x1c   : > { %5662 = vmatmul.mubr.msk.f32.gmra.mxu0 %vm8227_vm1, %v6281_v15  ;;  %8348 = vst [vmem:[#allocation12_spill] sm:$0xff] %v6352_v32  ;;  %v6369_v37 = vld [vmem:[%s6218_s28 + $0xe9] sm:$0xff]  ;;  %v6372_v38 = vld [vmem:[%s6218_s28 + $0x71] sm:$0xff]  ;;  %v737_v43 = vld [vmem:[%s6218_s28] sm:$0xff]  ;;  %v8373_v55 = vmov 0  ;;  %v8441_v12 = vmov 0 }
  0x1d   : > { %5686 = vmatmul.mubr.msk.f32.gmra.mxu1 %vm8227_vm1, %v6284_v16  ;;  %5664 = vmatprep.mubr.msk.f32.mxu0 %vm8227_vm1, %v6287_v17  ;;  %8349 = vst [vmem:[#allocation13_spill] sm:$0xff] %v6369_v37  ;;  %v6375_v39 = vld [vmem:[%s6218_s28 + $0xf1] sm:$0xff]  ;;  %v6393_v46 = vld [vmem:[%s6218_s28 + $0x79] sm:$0xff]  ;;  %v769_v48 = vsel %vm6378_vm2, 0.0, %v737_v43  ;;  %v4891_v49 = vld [vmem:[%s6218_s28 + $0x2] sm:$0xff]  ;;  %v264_v43 = vadd.s32 72, %v6332_v28 }
  0x1e   : > { %5688 = vmatprep.mubr.msk.f32.mxu1 %vm8227_vm1, %v6290_v18  ;;  %8350 = vst [vmem:[#allocation14_spill] sm:$0xff] %v6375_v39  ;;  %v6396_v47 = vld [vmem:[%s6218_s28 + $0xf9] sm:$0xff]  ;;  %8356 = vst [vmem:[#allocation16_spill] sm:$0xff] %v8355_v50  ;;  %v4892_v51 = vld [vmem:[%s6218_s28 + $0xa] sm:$0xff]  ;;  %v8374_v55 = vsel %vm6509_vm9, 4294967295, %v8373_v55  ;;  %v283_v8 = vadd.s32 224, %v6332_v28 }
  0x1f   : > { %8353 = vst [vmem:[#allocation15_spill] sm:$0xff] %v6396_v47  ;;  %v6417_v57 = vld [vmem:[%s6218_s28 + $0x10] sm:$0xff]  ;;  %v738_v58 = vld [vmem:[%s6218_s28 + $0x8] sm:$0xff]  ;;  %v1523_v59 = vsel %vm6401_vm3, 0.0, %v4892_v51  ;;  %8361 = vst [vmem:[#allocation17_spill] sm:$0xff] %v8360_v61  ;;  %v347_v51 = vand.u32 15, %v263_v23 }
  0x20   : > { %5665 = vmatmul.mubr.msk.f32.gmra.mxu0 %vm8227_vm1, %v6301_v19  ;;  %v6430_v62 = vld [vmem:[%s6218_s28 + $0x1a] sm:$0xff]  ;;  %v771_v0 = vsel %vm6412_vm4, 0.0, %v6417_v57  ;;  %v6436_v1 = vld [vmem:[%s6218_s28 + $0x12] sm:$0xff]  ;;  %8369 = vst [vmem:[#allocation21_spill] sm:$0xff] %v8368_v44  ;;  %v6483_v45 = vld [vmem:[%s6218_s28 + $0x2a] sm:$0xff]  ;;  %v269_v61 = vadd.s32 112, %v6332_v28 }
  0x21   : > { %5689 = vmatmul.mubr.msk.f32.gmra.mxu1 %vm8227_vm1, %v6304_v20  ;;  %5667 = vmatprep.mubr.msk.f32.mxu0 %vm8227_vm1, %v6307_v21  ;;  %8362 = vst [vmem:[#allocation18_spill] sm:$0xff] %v6430_v62  ;;  %8363 = vst [vmem:[#allocation19_spill] sm:$0xff] %v6436_v1  ;;  %v6443_v3 = vld [vmem:[%s6218_s28 + $0x20] sm:$0xff]  ;;  %v6451_v33 = vld [vmem:[%s8197_s1 + $0x14] sm:$0xf]  ;;  %v1525_v40 = vsel %vm6425_vm5, 0.0, %v6430_v62 }
  0x22   : > { %5691 = vmatprep.mubr.msk.f32.mxu1 %vm8227_vm1, %v6310_v22  ;;  %v6456_v34 = vld [vmem:[%s8197_s1 + $0x18] sm:$0xf]  ;;  %8370 = vst [vmem:[#allocation22_spill] sm:$0xff] %v6483_v45  ;;  %v6504_v53 = vld [vmem:[%s6218_s28 + $0x28] sm:$0xff]  ;;  %v1527_v54 = vsel %vm6478_vm7, 0.0, %v6483_v45  ;;  %8375 = vst [vmem:[#allocation23_spill] sm:$0xff] %v8374_v55 }
  0x23   : > { %v6463_v35 = vld [vmem:[%s6218_s28 + $0x18] sm:$0xff]  ;;  %v6524_v5 = vld [vmem:[%s6218_s28 + $0x40] sm:$0xff]  ;;  %vm6532_vm10 = vcmp.eq.s32.totalorder %v347_v51, 0  ;;  %v6544_v23 = vld [vmem:[%s6218_s28 + $0x50] sm:$0xff]  ;;  %v8388_v45 = vmov 0  ;;  %v271_v62 = vadd.s32 128, %v6332_v28 }
  0x24   : > { %5668 = vmatmul.mubr.msk.f32.gmra.mxu0 %vm8227_vm1, %v6321_v24  ;;  %v6518_v63 = vld [vmem:[%s6218_s28 + $0x32] sm:$0xff]  ;;  %v8424_v22 = vmov 0  ;;  %v6754_v20 = vld [vmem:[%s6218_s28 + $0x9a] sm:$0xff] }
  0x25   : > { %5692 = vmatmul.mubr.msk.f32.gmra.mxu1 %vm8227_vm1, %v6324_v25  ;;  %5670 = vmatprep.mubr.msk.f32.mxu0 %vm8227_vm1, %v6327_v26  ;;  %8376 = vst [vmem:[#allocation24_spill] sm:$0xff] %v6518_v63  ;;  %v6550_v51 = vld [vmem:[%s6218_s28 + $0x38] sm:$0xff]  ;;  %v6717_v25 = vld [vmem:[%s6218_s28 + $0x8a] sm:$0xff]  ;;  %8428 = vst [vmem:[#allocation45_spill] sm:$0xff] %v6754_v20 }
  0x26   : > { %5694 = vmatprep.mubr.msk.f32.mxu1 %vm8227_vm1, %v6330_v27  ;;  %v6710_v27 = vld [vmem:[%s6218_s28 + $0x82] sm:$0xff]  ;;  %8416 = vst [vmem:[#allocation40_spill] sm:$0xff] %v6717_v25  ;;  %v6778_v16 = vld [vmem:[%s6218_s28 + $0xb0] sm:$0xff] }
  0x27   : > { %8412 = vst [vmem:[#allocation38_spill] sm:$0xff] %v6710_v27  ;;  %8435 = vst [vmem:[#allocation47_spill] sm:$0xff] %v6778_v16  ;;  %v8608_v56 = vld [vmem:[#allocation21_spill] sm:$0xff] }
  0x28   : > { %5671 = vmatmul.mubr.msk.f32.gmra.mxu0 %vm8227_vm1, %v6343_v29 }
  0x29   : > { %5695 = vmatmul.mubr.msk.f32.gmra.mxu1 %vm8227_vm1, %v6346_v30  ;;  %5673 = vmatprep.mubr.msk.f32.mxu0 %vm8227_vm1, %v6349_v31  ;;  %v8406_v30 = vmov 0  ;;  %v8594_v42 = vld [vmem:[#allocation22_spill] sm:$0xff] }
  0x2a   : > { %5697 = vmatprep.mubr.msk.f32.mxu1 %vm8227_vm1, %v6352_v32  ;;  %v275_v32 = vadd.s32 160, %v6332_v28 }
  0x2c   : > { %5674 = vmatmul.mubr.msk.f32.gmra.mxu0 %vm8227_vm1, %v6366_v36 }
  0x2d   : > { %5698 = vmatmul.mubr.msk.f32.gmra.mxu1 %vm8227_vm1, %v6369_v37  ;;  %5676 = vmatprep.mubr.msk.f32.mxu0 %vm8227_vm1, %v6372_v38  ;;  %v6674_v37 = vld [vmem:[%s6218_s28 + $0x72] sm:$0xff] }
  0x2e   : > { %5700 = vmatprep.mubr.msk.f32.mxu1 %vm8227_vm1, %v6375_v39  ;;  %v273_v39 = vadd.s32 144, %v6332_v28  ;;  %8401 = vst [vmem:[#allocation35_spill] sm:$0xff] %v6674_v37 }
  0x30   : > { %5677 = vmatmul.mubr.msk.f32.gmra.mxu0 %vm8227_vm1, %v6393_v46 }
  0x31   : > { %5701 = vmatmul.mubr.msk.f32.gmra.mxu1 %vm8227_vm1, %v6396_v47  ;;  %5755 = vmatprep.mubr.msk.f32.mxu0 %vm8227_vm1, %v4891_v49  ;;  %v6490_v49 = vld [vmem:[%s6218_s28 + $0x30] sm:$0xff]  ;;  %v8399_v47 = vmov 0 }
  0x32   : > { %5705 = vmatprep.mubr.msk.f32.mxu1 %vm8227_vm1, %v769_v48  ;;  %v775_v60 = vsel %vm6485_vm8, 0.0, %v6490_v49 }
  0x34   : > { %5756 = vmatmul.mubr.msk.f32.vlgmr.msra.gmra.mxu0 %vm8227_vm1, %v1523_v59  ;;  %v266_v59 = vadd.s32 88, %v6332_v28 }
  0x35   : > { %5706 = vmatmul.mubr.msk.f32.vlgmr.msra.gmra.mxu1 %vm8227_vm1, %v738_v58  ;;  %5854 = vmatpush3.msk.msra.mxu0 %vm8223_vm0, %v6248_v10  ;;  %v6476_v10 = vld [vmem:[%s6218_s28 + $0x22] sm:$0xff]  ;;  %v354_v58 = vand.u32 15, %v264_v43  ;;  %v361_v43 = vand.u32 15, %v265_v52 }
  0x36   : > { %5804 = vmatpush3.msk.msra.mxu1 %vm8223_vm0, %v6243_v9  ;;  %5708 = vmatprep.mubr.msk.f32.mxu1 %vm8227_vm1, %v771_v0  ;;  %v773_v9 = vsel %vm6438_vm6, 0.0, %v6443_v3  ;;  %8366 = vst [vmem:[#allocation20_spill] sm:$0xff] %v6476_v10  ;;  %v6521_v0 = vld [vmem:[%s6218_s28 + $0x3a] sm:$0xff]  ;;  %v368_v55 = vand.u32 15, %v266_v59  ;;  %v6587_v59 = vld [vmem:[%s6218_s28 + $0x48] sm:$0xff] }
  0x37   : > { %5758 = vmatprep.mubr.msk.f32.mxu0 %vm8227_vm1, %v6436_v1  ;;  %5903 = vmatprep.subr.msk.mxu1 %vm8223_vm0, %v6451_v33  ;;  %8377 = vst [vmem:[#allocation25_spill] sm:$0xff] %v6521_v0  ;;  %v1529_v52 = vsel %vm6509_vm9, 0.0, %v6521_v0  ;;  %vm6564_vm11 = vcmp.eq.s32.totalorder %v354_v58, 15  ;;  %v268_v0 = vadd.s32 104, %v6332_v28  ;;  %vm6572_vm12 = vcmp.eq.s32.totalorder %v361_v43, 0  ;;  %v6581_v58 = vld [vmem:[%s6218_s28 + $0x60] sm:$0xff] }
  0x38   : > { %5953 = vmatprep.subr.msk.mxu0 %vm8223_vm0, %v6456_v34  ;;  %5759 = vmatmul.mubr.msk.f32.gmra.mxu0 %vm8227_vm1, %v1525_v40  ;;  %v8381_v40 = vmov 0  ;;  %vm6601_vm13 = vcmp.eq.s32.totalorder %v368_v55, 15  ;;  %v6618_v55 = vld [vmem:[%s6218_s28 + $0x70] sm:$0xff]  ;;  %v8395_v1 = vmov 0  ;;  %v8622_v48 = vsel %vm6532_vm10, 0.0, %v6581_v58 }
  0x39   : > { %5709 = vmatmul.mubr.msk.f32.gmra.mxu1 %vm8227_vm1, %v6463_v35  ;;  %5761 = vmatprep.mubr.msk.f32.mxu0 %vm8227_vm1, %v6476_v10  ;;  %v8382_v40 = vsel %vm6564_vm11, 4294967295, %v8381_v40  ;;  %v8389_v45 = vsel %vm6601_vm13, 4294967295, %v8388_v45  ;;  %v8630_v41 = vsel %vm6572_vm12, 0.0, %v6618_v55 }
  0x3a   : > { %5711 = vmatprep.mubr.msk.f32.mxu1 %vm8227_vm1, %v773_v9  ;;  %v267_v9 = vadd.s32 96, %v6332_v28  ;;  %8383 = vst [vmem:[#allocation27_spill] sm:$0xff] %v8382_v40  ;;  %8390 = vst [vmem:[#allocation30_spill] sm:$0xff] %v8389_v45  ;;  %v382_v40 = vand.u32 15, %v268_v0  ;;  %v403_v0 = vand.u32 15, %v271_v62 }
  0x3c   : > { %5762 = vmatmul.mubr.msk.f32.gmra.mxu0 %vm8227_vm1, %v1527_v54  ;;  %v777_v54 = vsel %vm6532_vm10, 0.0, %v6524_v5  ;;  %v375_v44 = vand.u32 15, %v267_v9  ;;  %v389_v9 = vand.u32 15, %v269_v61  ;;  %vm6638_vm15 = vcmp.eq.s32.totalorder %v382_v40, 15  ;;  %v6655_v40 = vld [vmem:[%s6218_s28 + $0x80] sm:$0xff] }
  0x3d   : > { %5712 = vmatmul.mubr.msk.f32.gmra.mxu1 %vm8227_vm1, %v6504_v53  ;;  %5764 = vmatprep.mubr.msk.f32.mxu0 %vm8227_vm1, %v6518_v63  ;;  %v6569_v63 = vld [vmem:[%s6218_s28 + $0x4a] sm:$0xff]  ;;  %v8396_v1 = vsel %vm6638_vm15, 4294967295, %v8395_v1 }
  0x3e   : > { %5714 = vmatprep.mubr.msk.f32.mxu1 %vm8227_vm1, %v775_v60  ;;  %v6562_v60 = vld [vmem:[%s6218_s28 + $0x42] sm:$0xff]  ;;  %8384 = vst [vmem:[#allocation28_spill] sm:$0xff] %v6569_v63  ;;  %v1531_v43 = vsel %vm6564_vm11, 0.0, %v6569_v63  ;;  %v270_v63 = vadd.s32 120, %v6332_v28  ;;  %vm6609_vm14 = vcmp.eq.s32.totalorder %v375_v44, 0  ;;  %v6624_v44 = vld [vmem:[%s6218_s28 + $0x58] sm:$0xff] }
  0x3f   : > { %8380 = vst [vmem:[#allocation26_spill] sm:$0xff] %v6562_v60  ;;  %8397 = vst [vmem:[#allocation33_spill] sm:$0xff] %v8396_v1  ;;  %vm6646_vm0 = vcmp.eq.s32.totalorder %v389_v9, 0  ;;  %v274_v9 = vadd.s32 152, %v6332_v28  ;;  %v6681_v1 = vld [vmem:[%s6218_s28 + $0x7a] sm:$0xff]  ;;  %v8639_v10 = vsel %vm6609_vm14, 0.0, %v6655_v40 }
  0x40   : > { %5765 = vmatmul.mubr.msk.f32.gmra.mxu0 %vm8227_vm1, %v1529_v52  ;;  %v779_v52 = vsel %vm6572_vm12, 0.0, %v6544_v23  ;;  %v396_v45 = vand.u32 15, %v270_v63  ;;  %v8400_v47 = vsel %vm6646_vm0, 4294967295, %v8399_v47  ;;  %v6661_v63 = vld [vmem:[%s6218_s28 + $0x68] sm:$0xff]  ;;  %8405 = vst [vmem:[#allocation37_spill] sm:$0xff] %v6681_v1 }
  0x41   : > { %5715 = vmatmul.mubr.msk.f32.gmra.mxu1 %vm8227_vm1, %v6550_v51  ;;  %5767 = vmatprep.mubr.msk.f32.mxu0 %vm8227_vm1, %v6562_v60  ;;  %v6606_v60 = vld [vmem:[%s6218_s28 + $0x5a] sm:$0xff] }
  0x42   : > { %5717 = vmatprep.mubr.msk.f32.mxu1 %vm8227_vm1, %v777_v54  ;;  %v6599_v54 = vld [vmem:[%s6218_s28 + $0x52] sm:$0xff]  ;;  %8391 = vst [vmem:[#allocation31_spill] sm:$0xff] %v6606_v60  ;;  %v1533_v61 = vsel %vm6601_vm13, 0.0, %v6606_v60  ;;  %v272_v60 = vadd.s32 136, %v6332_v28  ;;  %vm8408_vm13 = vcmask 31744  }
  0x43   : > { %8387 = vst [vmem:[#allocation29_spill] sm:$0xff] %v6599_v54  ;;  %vm8409_vm11 = vmmov %vm8408_vm13 }
  0x44   : > { %5768 = vmatmul.mubr.msk.f32.gmra.mxu0 %vm8227_vm1, %v1531_v43  ;;  %v781_v43 = vsel %vm6609_vm14, 0.0, %v6581_v58  ;;  %vm8410_vm9 = vmmov %vm8409_vm11 }
  0x45   : > { %5718 = vmatmul.mubr.msk.f32.gmra.mxu1 %vm8227_vm1, %v6587_v59  ;;  %5770 = vmatprep.mubr.msk.f32.mxu0 %vm8227_vm1, %v6599_v54  ;;  %v6643_v54 = vld [vmem:[%s6218_s28 + $0x6a] sm:$0xff]  ;;  %vm8411_vm7 = vmmov %vm8410_vm9 }
  0x46   : > { %5720 = vmatprep.mubr.msk.f32.mxu1 %vm8227_vm1, %v779_v52  ;;  %v6636_v52 = vld [vmem:[%s6218_s28 + $0x62] sm:$0xff]  ;;  %8398 = vst [vmem:[#allocation34_spill] sm:$0xff] %v6643_v54  ;;  %v1535_v62 = vsel %vm6638_vm15, 0.0, %v6643_v54  ;;  %v410_v54 = vand.u32 15, %v272_v60  ;;  %vm6684_vm15 = vcmp.eq.s32.totalorder %v403_v0, 0  ;;  %v6698_v60 = vld [vmem:[%s6218_s28 + $0x78] sm:$0xff] }
  0x47   : > { %8394 = vst [vmem:[#allocation32_spill] sm:$0xff] %v6636_v52  ;;  %v8407_v30 = vsel %vm6684_vm15, 4294967295, %v8406_v30 }
  0x48   : > { %5771 = vmatmul.mubr.msk.f32.gmra.mxu0 %vm8227_vm1, %v1533_v61  ;;  %v417_v61 = vand.u32 15, %v273_v39  ;;  %v424_v39 = vand.u32 15, %v274_v9  ;;  %v276_v9 = vadd.s32 168, %v6332_v28 }
  0x49   : > { %5721 = vmatmul.mubr.msk.f32.gmra.mxu1 %vm8227_vm1, %v6624_v44  ;;  %5773 = vmatprep.mubr.msk.f32.mxu0 %vm8227_vm1, %v6636_v52  ;;  %v8402_v52 = vmov 0 }
  0x4a   : > { %5723 = vmatprep.mubr.msk.f32.mxu1 %vm8227_vm1, %v781_v43  ;;  %v783_v43 = vsel %vm6646_vm0, 0.0, %v6618_v55  ;;  %vm6676_vm1 = vcmp.eq.s32.totalorder %v396_v45, 15  ;;  %v6692_v45 = vld [vmem:[%s6218_s28 + $0x90] sm:$0xff]  ;;  %vm6740_vm3 = vcmp.eq.s32.totalorder %v424_v39, 15  ;;  %v8429_v39 = vmov 0 }
  0x4b   : > { %v8403_v52 = vsel %vm6676_vm1, 4294967295, %v8402_v52  ;;  %v1537_v0 = vsel %vm6676_vm1, 0.0, %v6681_v1  ;;  %v8417_v1 = vmov 0  ;;  %vm8422_vm1 = vmmov %vm8409_vm11  ;;  %v8425_v22 = vsel %vm6740_vm3, 4294967295, %v8424_v22 }
  0x4c   : > { %8404 = vst [vmem:[#allocation36_spill] sm:$0xff] %v8403_v52  ;;  %5774 = vmatmul.mubr.msk.f32.gmra.mxu0 %vm8409_vm11, %v1535_v62  ;;  %v431_v52 = vand.u32 15, %v275_v32  ;;  %v277_v62 = vadd.s32 176, %v6332_v28  ;;  %vm8423_vm5 = vmmov %vm8422_vm1  ;;  %v6735_v32 = vld [vmem:[%s6218_s28 + $0x88] sm:$0xff] }
  0x4d   : > { %5724 = vmatmul.mubr.msk.f32.gmra.mxu1 %vm8408_vm13, %v6661_v63  ;;  %5776 = vmatprep.mubr.msk.f32.mxu0 %vm8411_vm7, %v6674_v37  ;;  %v8413_v37 = vmov 0  ;;  %vm6720_vm7 = vcmp.eq.s32.totalorder %v417_v61, 0  ;;  %vm8420_vm13 = vmmov %vm8409_vm11  ;;  %8426 = vst [vmem:[#allocation43_spill] sm:$0xff] %v8425_v22  ;;  %v280_v22 = vadd.s32 200, %v6332_v28 }
  0x4e   : > { %5726 = vmatprep.mubr.msk.f32.mxu1 %vm8410_vm9, %v783_v43  ;;  %v785_v43 = vsel %vm6684_vm15, 0.0, %v6655_v40  ;;  %vm6712_vm9 = vcmp.eq.s32.totalorder %v410_v54, 15  ;;  %v8418_v1 = vsel %vm6720_vm7, 4294967295, %v8417_v1  ;;  %v6729_v54 = vld [vmem:[%s6218_s28 + $0xa0] sm:$0xff]  ;;  %v445_v18 = vand.u32 15, %v277_v62 }
  0x4f   : > { %v8414_v37 = vsel %vm6712_vm9, 4294967295, %v8413_v37  ;;  %8419 = vst [vmem:[#allocation41_spill] sm:$0xff] %v8418_v1  ;;  %8421 = vst [vmem:[#allocation42_spill] sm:$0xff] %v6729_v54  ;;  %v1539_v61 = vsel %vm6712_vm9, 0.0, %v6717_v25  ;;  %v278_v25 = vadd.s32 184, %v6332_v28 }
  0x50   : > { %8415 = vst [vmem:[#allocation39_spill] sm:$0xff] %v8414_v37  ;;  %5777 = vmatmul.mubr.msk.f32.gmra.mxu0 %vm8420_vm13, %v1537_v0  ;;  %v438_v37 = vand.u32 15, %v276_v9  ;;  %v279_v0 = vadd.s32 192, %v6332_v28  ;;  %vm8432_vm13 = vmmov %vm8423_vm5  ;;  %v1541_v9 = vsel %vm6740_vm3, 0.0, %v6754_v20  ;;  %v282_v20 = vadd.s32 216, %v6332_v28 }
  0x51   : > { %5727 = vmatmul.mubr.msk.f32.gmra.mxu1 %vm8409_vm11, %v6698_v60  ;;  %5779 = vmatprep.mubr.msk.f32.mxu0 %vm8423_vm5, %v6710_v27  ;;  %v6751_v27 = vld [vmem:[%s6218_s28 + $0x92] sm:$0xff]  ;;  %vm8431_vm11 = vmmov %vm8423_vm5  ;;  %v452_v14 = vand.u32 15, %v278_v25  ;;  %v6806_v25 = vld [vmem:[%s6218_s28 + $0xa8] sm:$0xff] }
  0x52   : > { %5729 = vmatprep.mubr.msk.f32.mxu1 %vm8422_vm1, %v785_v43  ;;  %v787_v43 = vsel %vm6720_vm7, 0.0, %v6692_v45  ;;  %8427 = vst [vmem:[#allocation44_spill] sm:$0xff] %v6751_v27  ;;  %vm6756_vm1 = vcmp.eq.s32.totalorder %v431_v52, 0  ;;  %vm8433_vm9 = vmmov %vm8423_vm5  ;;  %v6769_v52 = vld [vmem:[%s6218_s28 + $0x98] sm:$0xff] }
  0x53   : > { %v8430_v39 = vsel %vm6756_vm1, 4294967295, %v8429_v39  ;;  %8434 = vst [vmem:[#allocation46_spill] sm:$0xff] %v6769_v52  ;;  %v789_v62 = vsel %vm6756_vm1, 0.0, %v6729_v54  ;;  %v459_v54 = vand.u32 15, %v279_v0  ;;  %vm8445_vm3 = vmmov %vm8431_vm11  ;;  %v6812_v0 = vld [vmem:[%s6218_s28 + $0xc0] sm:$0xff] }
  0x54   : > { %5780 = vmatmul.mubr.msk.f32.gmra.mxu0 %vm8431_vm11, %v1539_v61  ;;  %v6781_v61 = vld [vmem:[%s6218_s28 + $0xa2] sm:$0xff]  ;;  %vm8446_vm15 = vmmov %vm8445_vm3  ;;  %8447 = vst [vmem:[#allocation52_spill] sm:$0xff] %v6806_v25 }
  0x55   : > { %5730 = vmatmul.mubr.msk.f32.gmra.mxu1 %vm8423_vm5, %v6735_v32  ;;  %5782 = vmatprep.mubr.msk.f32.mxu0 %vm8433_vm9, %v6751_v27  ;;  %8436 = vst [vmem:[#allocation48_spill] sm:$0xff] %v6781_v61  ;;  %vm6783_vm5 = vcmp.eq.s32.totalorder %v438_v37, 15  ;;  %v6788_v27 = vld [vmem:[%s6218_s28 + $0xaa] sm:$0xff]  ;;  %vm6794_vm9 = vcmp.eq.s32.totalorder %v445_v18, 0  ;;  %v281_v37 = vadd.s32 208, %v6332_v28  ;;  %8448 = vst [vmem:[#allocation53_spill] sm:$0xff] %v6812_v0 }
  0x56   : > { %5732 = vmatprep.mubr.msk.f32.mxu1 %vm8432_vm13, %v787_v43  ;;  %v8437_v43 = vmov 0  ;;  %8440 = vst [vmem:[#allocation50_spill] sm:$0xff] %v6788_v27  ;;  %v8442_v12 = vsel %vm6794_vm9, 4294967295, %v8441_v12  ;;  %vm8444_vm13 = vmmov %vm8431_vm11  ;;  %v1543_v18 = vsel %vm6783_vm5, 0.0, %v6788_v27 }
  0x57   : > { %v8438_v43 = vsel %vm6783_vm5, 4294967295, %v8437_v43  ;;  %8443 = vst [vmem:[#allocation51_spill] sm:$0xff] %v8442_v12  ;;  %vm8457_vm5 = vmmov %vm8431_vm11 }
  0x58   : > { %8439 = vst [vmem:[#allocation49_spill] sm:$0xff] %v8438_v43  ;;  %5783 = vmatmul.mubr.msk.f32.gmra.mxu0 %vm8444_vm13, %v1541_v9  ;;  %v791_v9 = vsel %vm6794_vm9, 0.0, %v6778_v16  ;;  %v466_v43 = vand.u32 15, %v280_v22  ;;  %v473_v16 = vand.u32 15, %v281_v37  ;;  %vm8456_vm13 = vmmov %vm8431_vm11  ;;  %v480_v37 = vand.u32 15, %v282_v20  ;;  %v6890_v20 = vld [vmem:[%s6218_s28 + $0xe0] sm:$0xff] }
  0x59   : > { %5733 = vmatmul.mubr.msk.f32.gmra.mxu1 %vm8431_vm11, %v6769_v52  ;;  %5785 = vmatprep.mubr.msk.f32.mxu0 %vm8446_vm15, %v6781_v61  ;;  %v8450_v61 = vmov 0  ;;  %v6826_v52 = vld [vmem:[%s6218_s28 + $0xba] sm:$0xff]  ;;  %vm6831_vm15 = vcmp.eq.s32.totalorder %v459_v54, 0  ;;  %vm8458_vm7 = vmmov %vm8457_vm5  ;;  %v6849_v54 = vld [vmem:[%s6218_s28 + $0xd0] sm:$0xff] }
  0x5a   : > { %5735 = vmatprep.mubr.msk.f32.mxu1 %vm8445_vm3, %v789_v62  ;;  %v6819_v62 = vld [vmem:[%s6218_s28 + $0xb2] sm:$0xff]  ;;  %vm6821_vm3 = vcmp.eq.s32.totalorder %v452_v14, 15  ;;  %8453 = vst [vmem:[#allocation56_spill] sm:$0xff] %v6826_v52  ;;  %v793_v27 = vsel %vm6831_vm15, 0.0, %v6812_v0  ;;  %v487_v0 = vand.u32 15, %v283_v8  ;;  %vm6885_vm9 = vcmp.eq.s32.totalorder %v480_v37, 15 }
  0x5b   : > { %8449 = vst [vmem:[#allocation54_spill] sm:$0xff] %v6819_v62  ;;  %v8451_v61 = vsel %vm6821_vm3, 4294967295, %v8450_v61  ;;  %v6843_v14 = vld [vmem:[%s6218_s28 + $0xb8] sm:$0xff]  ;;  %v1545_v22 = vsel %vm6821_vm3, 0.0, %v6826_v52  ;;  %v8465_v52 = vmov 0  ;;  %vm8468_vm3 = vmmov %vm8431_vm11  ;;  %v8470_v8 = vmov 0 }
  0x5c   : > { %8452 = vst [vmem:[#allocation55_spill] sm:$0xff] %v8451_v61  ;;  %5786 = vmatmul.mubr.msk.f32.gmra.mxu0 %vm8456_vm13, %v1543_v18  ;;  %8459 = vst [vmem:[#allocation57_spill] sm:$0xff] %v6843_v14  ;;  %v6855_v18 = vld [vmem:[%s6218_s28 + $0xc2] sm:$0xff]  ;;  %v284_v61 = vadd.s32 232, %v6332_v28  ;;  %v8471_v8 = vsel %vm6885_vm9, 4294967295, %v8470_v8  ;;  %v6935_v37 = vld [vmem:[%s6218_s28 + $0xea] sm:$0xff] }
  0x5d   : > { %5736 = vmatmul.mubr.msk.f32.gmra.mxu1 %vm8431_vm11, %v6806_v25  ;;  %5788 = vmatprep.mubr.msk.f32.mxu0 %vm8458_vm7, %v6819_v62  ;;  %8460 = vst [vmem:[#allocation58_spill] sm:$0xff] %v6855_v18  ;;  %v6862_v62 = vld [vmem:[%s6218_s28 + $0xca] sm:$0xff]  ;;  %vm6868_vm7 = vcmp.eq.s32.totalorder %v473_v16, 0  ;;  %vm8467_vm13 = vmmov %vm8431_vm11 }
  0x5e   : > { %5738 = vmatprep.mubr.msk.f32.mxu1 %vm8457_vm5, %v791_v9  ;;  %vm6857_vm5 = vcmp.eq.s32.totalorder %v466_v43, 15  ;;  %v8461_v9 = vmov 0  ;;  %8464 = vst [vmem:[#allocation60_spill] sm:$0xff] %v6862_v62  ;;  %v8466_v52 = vsel %vm6868_vm7, 4294967295, %v8465_v52  ;;  %v285_v43 = vadd.s32 240, %v6332_v28  ;;  %vm8469_vm1 = vmmov %vm8468_vm3  ;;  %v6880_v25 = vld [vmem:[%s6218_s28 + $0xc8] sm:$0xff] }
  0x5f   : > { %v8462_v9 = vsel %vm6857_vm5, 4294967295, %v8461_v9  ;;  %v1547_v16 = vsel %vm6857_vm5, 0.0, %v6862_v62  ;;  %8472 = vst [vmem:[#allocation61_spill] sm:$0xff] %v8471_v8  ;;  %v286_v62 = vadd.s32 248, %v6332_v28  ;;  %vm8480_vm5 = vmmov %vm8468_vm3  ;;  %v6916_v28 = vld [vmem:[%s6218_s28 + $0xd8] sm:$0xff] }
  0x60   : > { %8463 = vst [vmem:[#allocation59_spill] sm:$0xff] %v8462_v9  ;;  %5789 = vmatmul.mubr.msk.f32.gmra.mxu0 %vm8467_vm13, %v1545_v22  ;;  %v6896_v22 = vld [vmem:[%s6218_s28 + $0xd2] sm:$0xff]  ;;  %v494_v9 = vand.u32 15, %v284_v61  ;;  %v501_v12 = vand.u32 15, %v285_v43  ;;  %vm8479_vm13 = vmmov %vm8468_vm3 }
  0x61   : > { %5739 = vmatmul.mubr.msk.f32.gmra.mxu1 %vm8431_vm11, %v6843_v14  ;;  %5791 = vmatprep.mubr.msk.f32.mxu0 %vm8469_vm1, %v6855_v18  ;;  %8473 = vst [vmem:[#allocation62_spill] sm:$0xff] %v6896_v22  ;;  %v6899_v18 = vld [vmem:[%s6218_s28 + $0xda] sm:$0xff]  ;;  %vm6905_vm1 = vcmp.eq.s32.totalorder %v487_v0, 0  ;;  %v8475_v14 = vmov 0  ;;  %vm8478_vm11 = vmmov %vm8468_vm3  ;;  %v6922_v0 = vld [vmem:[%s6218_s28 + $0xf0] sm:$0xff] }
  0x62   : > { %5741 = vmatprep.mubr.msk.f32.mxu1 %vm8468_vm3, %v793_v27  ;;  %v795_v27 = vsel %vm6868_vm7, 0.0, %v6849_v54  ;;  %8474 = vst [vmem:[#allocation63_spill] sm:$0xff] %v6899_v18  ;;  %v8476_v14 = vsel %vm6905_vm1, 4294967295, %v8475_v14  ;;  %v1549_v61 = vsel %vm6885_vm9, 0.0, %v6899_v18  ;;  %v797_v43 = vsel %vm6905_vm1, 0.0, %v6890_v20  ;;  %vm8487_vm9 = vmmov %vm8478_vm11  ;;  %v6960_v8 = vld [vmem:[%s6218_s28 + $0xf2] sm:$0xff] }
  0x63   : > { %8477 = vst [vmem:[#allocation64_spill] sm:$0xff] %v8476_v14  ;;  %v8484_v18 = vmov 0  ;;  %vm8488_vm1 = vmmov %vm8487_vm9  ;;  %v8489_v14 = vmov 0 }
  0x64   : > { %5792 = vmatmul.mubr.msk.f32.gmra.mxu0 %vm8478_vm11, %v1547_v16  ;;  %v6928_v16 = vld [vmem:[%s6218_s28 + $0xe2] sm:$0xff] }
  0x65   : > { %5742 = vmatmul.mubr.msk.f32.gmra.mxu1 %vm8468_vm3, %v6880_v25  ;;  %5794 = vmatprep.mubr.msk.f32.mxu0 %vm8480_vm5, %v6896_v22  ;;  %vm6930_vm3 = vcmp.eq.s32.totalorder %v494_v9, 15  ;;  %v508_v22 = vand.u32 15, %v286_v62  ;;  %vm6940_vm5 = vcmp.eq.s32.totalorder %v501_v12, 0  ;;  %v6951_v62 = vld [vmem:[%s6218_s28 + $0xe8] sm:$0xff] }
  0x66   : > { %5744 = vmatprep.mubr.msk.f32.mxu1 %vm8479_vm13, %v795_v27  ;;  %v8481_v27 = vmov 0  ;;  %v8485_v18 = vsel %vm6940_vm5, 4294967295, %v8484_v18  ;;  %vm8486_vm13 = vmmov %vm8478_vm11  ;;  %v1551_v9 = vsel %vm6930_vm3, 0.0, %v6935_v37  ;;  %v799_v12 = vsel %vm6940_vm5, 0.0, %v6922_v0 }
  0x67   : > { %v8482_v27 = vsel %vm6930_vm3, 4294967295, %v8481_v27  ;;  %vm8493_vm3 = vmmov %vm8488_vm1 }
  0x68   : > { %8483 = vst [vmem:[#allocation65_spill] sm:$0xff] %v8482_v27  ;;  %5795 = vmatmul.mubr.msk.f32.gmra.mxu0 %vm8486_vm13, %v1549_v61  ;;  %v6967_v61 = vld [vmem:[%s6218_s28 + $0xfa] sm:$0xff]  ;;  %vm8492_vm13 = vmmov %vm8488_vm1  ;;  %v1948_v27 = vsel %vm6378_vm2, 0.0, %v6417_v57 }
  0x69   : > { %5745 = vmatmul.mubr.msk.f32.gmra.mxu1 %vm8478_vm11, %v6916_v28  ;;  %5797 = vmatprep.mubr.msk.f32.mxu0 %vm8488_vm1, %v6928_v16  ;;  %vm6962_vm11 = vcmp.eq.s32.totalorder %v508_v22, 15  ;;  %vm8494_vm5 = vmmov %vm8488_vm1  ;;  %v7000_v57 = vld [vmem:[%s8197_s1 + $0x1c] sm:$0xf] }
  0x6a   : > { %5747 = vmatprep.mubr.msk.f32.mxu1 %vm8487_vm9, %v797_v43  ;;  %v8490_v14 = vsel %vm6962_vm11, 4294967295, %v8489_v14  ;;  %vm8491_vm9 = vmmov %vm8488_vm1  ;;  %v6976_v43 = vld [vmem:[%s6218_s28 + $0xf8] sm:$0xff]  ;;  %v1553_v22 = vsel %vm6962_vm11, 0.0, %v6967_v61 }
  0x6b   : > { %vm8498_vm11 = vmmov %vm8488_vm1 }
  0x6c   : > { %5798 = vmatmul.mubr.msk.f32.gmra.mxu0 %vm8488_vm1, %v1551_v9  ;;  %v1950_v9 = vsel %vm6412_vm4, 0.0, %v6443_v3 }
  0x6d   : > { %5748 = vmatmul.mubr.msk.f32.gmra.mxu1 %vm8491_vm9, %v6951_v62  ;;  %5800 = vmatprep.mubr.msk.f32.mxu0 %vm8493_vm3, %v6960_v8  ;;  %vm8495_vm9 = vmmov %vm8488_vm1 }
  0x6e   : > { %5750 = vmatprep.mubr.msk.f32.mxu1 %vm8492_vm13, %v799_v12  ;;  %vm8496_vm13 = vmmov %vm8488_vm1  ;;  %v8549_v12 = vld [vmem:[#allocation53_spill] sm:$0xff] }
  0x6f   : > { %vm8497_vm3 = vmmov %vm8488_vm1 }
  0x70   : > { %5801 = vmatmul.mubr.msk.f32.gmra.mxu0 %vm8495_vm9, %v1553_v22  ;;  %v8550_v22 = vld [vmem:[#allocation51_spill] sm:$0xff] }
  0x71   : > { %5751 = vmatmul.mubr.msk.f32.gmra.mxu1 %vm8494_vm5, %v6976_v43  ;;  %5855 = vmatprep.mubr.msk.f32.mxu0 %vm8496_vm13, %v6232_v7  ;;  %vm8499_vm5 = vcmask 1043456   ;;  %v1952_v7 = vsel %vm6438_vm6, 0.0, %v6490_v49  ;;  %vm8509_vm6 = vmmov %vm8488_vm1 }
  0x72   : > { %5805 = vmatprep.mubr.msk.f32.mxu1 %vm8488_vm1, %v1948_v27  ;;  %v7005_v27 = vld [vmem:[%s8197_s1 + $0x20] sm:$0xf]  ;;  %vm8500_vm9 = vmmov %vm8499_vm5 }
  0x73   : > { %vm8502_vm13 = vmmov %vm8499_vm5 }
  0x74   : > { %5856 = vmatmul.mubr.msk.f32.vlgmr.msra.gmra.mxu0 %vm8498_vm11, %v6253_v11  ;;  %vm8501_vm11 = vmmov %vm8488_vm1  ;;  %v1954_v11 = vsel %vm6485_vm8, 0.0, %v6524_v5 }
  0x75   : > { %5806 = vmatmul.mubr.msk.f32.vlgmr.msra.gmra.mxu1 %vm8497_vm3, %v6463_v35  ;;  %5954 = vmatpush3.msk.msra.mxu0 %vm8500_vm9, %v6456_v34  ;;  %vm8503_vm3 = vmmov %vm8499_vm5  ;;  %v8544_v34 = vld [vmem:[#allocation5_spill] sm:$0xff]  ;;  %v8547_v35 = vld [vmem:[#allocation6_spill] sm:$0xff] }
  0x76   : > { %5904 = vmatpush3.msk.msra.mxu1 %vm8499_vm5, %v6451_v33  ;;  %5808 = vmatprep.mubr.msk.f32.mxu1 %vm8488_vm1, %v1950_v9  ;;  %vm8504_vm5 = vmmov %vm8488_vm1  ;;  %v8542_v33 = vld [vmem:[#allocation52_spill] sm:$0xff] }
  0x77   : > { %5858 = vmatprep.mubr.msk.f32.mxu0 %vm8501_vm11, %v6263_v13  ;;  %6003 = vmatprep.subr.msk.mxu1 %vm8502_vm13, %v7000_v57  ;;  %vm8505_vm9 = vmmov %vm8488_vm1  ;;  %v1956_v13 = vsel %vm6532_vm10, 0.0, %v6544_v23 }
  0x78   : > { %6053 = vmatprep.subr.msk.mxu0 %vm8503_vm3, %v7005_v27  ;;  %5859 = vmatmul.mubr.msk.f32.gmra.mxu0 %vm8505_vm9, %v6281_v15  ;;  %vm8506_vm11 = vmmov %vm8488_vm1  ;;  %v1958_v15 = vsel %vm6572_vm12, 0.0, %v6581_v58  ;;  %v8632_v58 = vld [vmem:[#allocation34_spill] sm:$0xff] }
  0x79   : > { %5809 = vmatmul.mubr.msk.f32.gmra.mxu1 %vm8504_vm5, %v6504_v53  ;;  %5861 = vmatprep.mubr.msk.f32.mxu0 %vm8506_vm11, %v6287_v17  ;;  %vm8507_vm13 = vmmov %vm8488_vm1  ;;  %v1960_v17 = vsel %vm6609_vm14, 0.0, %v6618_v55  ;;  %v8641_v55 = vld [vmem:[#allocation37_spill] sm:$0xff] }
  0x7a   : > { %5811 = vmatprep.mubr.msk.f32.mxu1 %vm8488_vm1, %v1952_v7  ;;  %vm8508_vm3 = vmmov %vm8488_vm1  ;;  %v8552_v7 = vld [vmem:[#allocation57_spill] sm:$0xff] }
  0x7b   : > { %vm8510_vm5 = vmmov %vm8488_vm1 }
  0x7c   : > { %5862 = vmatmul.mubr.msk.f32.gmra.mxu0 %vm8508_vm3, %v6301_v19  ;;  %vm8511_vm9 = vmmov %vm8488_vm1  ;;  %v1962_v19 = vsel %vm6646_vm0, 0.0, %v6655_v40  ;;  %v8650_v40 = vld [vmem:[#allocation40_spill] sm:$0xff] }
  0x7d   : > { %5812 = vmatmul.mubr.msk.f32.gmra.mxu1 %vm8507_vm13, %v6550_v51  ;;  %5864 = vmatprep.mubr.msk.f32.mxu0 %vm8510_vm5, %v6307_v21  ;;  %vm8512_vm11 = vmmov %vm8488_vm1 }
  0x7e   : > { %5814 = vmatprep.mubr.msk.f32.mxu1 %vm8509_vm6, %v1954_v11  ;;  %vm8513_vm13 = vmmov %vm8488_vm1  ;;  %v8553_v11 = vld [vmem:[#allocation7_spill] sm:$0xff] }
  0x7f   : > { %vm8514_vm6 = vmmov %vm8488_vm1 }
  0x80   : > { %5865 = vmatmul.mubr.msk.f32.gmra.mxu0 %vm8488_vm1, %v6321_v24  ;;  %vm8515_vm3 = vmmov %vm8488_vm1  ;;  %v8528_v24 = vld [vmem:[#allocation2_spill] sm:$0xff] }
  0x81   : > { %5815 = vmatmul.mubr.msk.f32.gmra.mxu1 %vm8511_vm9, %v6587_v59  ;;  %5867 = vmatprep.mubr.msk.f32.mxu0 %vm8513_vm13, %v6327_v26  ;;  %vm8516_vm5 = vmmov %vm8488_vm1  ;;  %v8530_v26 = vld [vmem:[#allocation42_spill] sm:$0xff] }
  0x82   : > { %5817 = vmatprep.mubr.msk.f32.mxu1 %vm8512_vm11, %v1956_v13  ;;  %vm8517_vm9 = vmmov %vm8488_vm1  ;;  %v8556_v13 = vld [vmem:[#allocation8_spill] sm:$0xff] }
  0x83   : > { %vm8518_vm11 = vmmov %vm8488_vm1 }
  0x84   : > { %5868 = vmatmul.mubr.msk.f32.gmra.mxu0 %vm8515_vm3, %v6343_v29  ;;  %vm8519_vm13 = vmmov %vm8488_vm1  ;;  %v8531_v29 = vld [vmem:[#allocation41_spill] sm:$0xff] }
  0x85   : > { %5818 = vmatmul.mubr.msk.f32.gmra.mxu1 %vm8514_vm6, %v6624_v44  ;;  %5870 = vmatprep.mubr.msk.f32.mxu0 %vm8517_vm9, %v6349_v31  ;;  %vm8520_vm6 = vmmov %vm8488_vm1 }
  0x86   : > { %5820 = vmatprep.mubr.msk.f32.mxu1 %vm8516_vm5, %v1958_v15  ;;  %vm8521_vm3 = vmmov %vm8488_vm1  ;;  %v1972_v15 = vsel %vm6831_vm15, 0.0, %v6849_v54 }
  0x87   : > { %vm8522_vm5 = vmmov %vm8488_vm1 }
  0x88   : > { %5871 = vmatmul.mubr.msk.f32.gmra.mxu0 %vm8518_vm11, %v6366_v36  ;;  %vm8523_vm9 = vmmov %vm8488_vm1  ;;  %vm8524_vm11 = vnez %v8407_v30  ;;  %v8535_v36 = vld [vmem:[#allocation3_spill] sm:$0xff] }
  0x89   : > { %5821 = vmatmul.mubr.msk.f32.gmra.mxu1 %vm8488_vm1, %v6661_v63  ;;  %5873 = vmatprep.mubr.msk.f32.mxu0 %vm8520_vm6, %v6372_v38  ;;  %v1964_v21 = vsel %vm8524_vm11, 0.0, %v6692_v45  ;;  %vm8526_vm6 = vmmov %vm8488_vm1  ;;  %v8538_v38 = vld [vmem:[#allocation4_spill] sm:$0xff] }
  0x8a   : > { %5823 = vmatprep.mubr.msk.f32.mxu1 %vm8519_vm13, %v1960_v17  ;;  %vm8525_vm13 = vmmov %vm8488_vm1  ;;  %v8559_v17 = vld [vmem:[#allocation9_spill] sm:$0xff] }
  0x8b   : > { %vm8527_vm0 = vmmov %vm8488_vm1 }
  0x8c   : > { %5874 = vmatmul.mubr.msk.f32.gmra.mxu0 %vm8522_vm5, %v6393_v46  ;;  %vm8532_vm5 = vnez %v8531_v29  ;;  %vm8537_vm11 = vmmov %vm8527_vm0 }
  0x8d   : > { %5824 = vmatmul.mubr.msk.f32.gmra.mxu1 %vm8521_vm3, %v6698_v60  ;;  %5876 = vmatprep.mubr.msk.f32.mxu0 %vm8488_vm1, %v6222_v4  ;;  %vm8529_vm3 = vmmov %vm8527_vm0  ;;  %v1966_v31 = vsel %vm8532_vm5, 0.0, %v8530_v26  ;;  %v8533_v4 = vld [vmem:[#allocation46_spill] sm:$0xff] }
  0x8e   : > { %5826 = vmatprep.mubr.msk.f32.mxu1 %vm8523_vm9, %v1962_v19  ;;  %vm8534_vm9 = vmmov %vm8527_vm0  ;;  %v8561_v19 = vld [vmem:[#allocation10_spill] sm:$0xff] }
  0x8f   : > { %vm8536_vm1 = vmmov %vm8527_vm0 }
  0x90   : > { %5877 = vmatmul.mubr.msk.f32.gmra.mxu0 %vm8526_vm6, %v6229_v6  ;;  %v8540_v6 = vld [vmem:[#allocation47_spill] sm:$0xff]  ;;  %vm8543_vm6 = vmmov %vm8536_vm1 }
  0x91   : > { %5827 = vmatmul.mubr.msk.f32.gmra.mxu1 %vm8525_vm13, %v6735_v32  ;;  %5879 = vmatprep.mubr.msk.f32.mxu0 %vm8529_vm3, %v8528_v24  ;;  %vm8539_vm13 = vmmov %vm8527_vm0  ;;  %v8564_v24 = vld [vmem:[#allocation11_spill] sm:$0xff] }
  0x92   : > { %5829 = vmatprep.mubr.msk.f32.mxu1 %vm8527_vm0, %v1964_v21  ;;  %vm8541_vm0 = vnez %v8430_v39  ;;  %vm8545_vm3 = vmmov %vm8536_vm1  ;;  %v1974_v21 = vsel %vm6868_vm7, 0.0, %v6890_v20  ;;  %v8681_v39 = vld [vmem:[#allocation58_spill] sm:$0xff] }
  0x93   : > { %v1968_v46 = vsel %vm8541_vm0, 0.0, %v8540_v6  ;;  %vm8546_vm5 = vmmov %vm8536_vm1 }
  0x94   : > { %5880 = vmatmul.mubr.msk.f32.gmra.mxu0 %vm8536_vm1, %v8535_v36  ;;  %v8569_v36 = vld [vmem:[#allocation64_spill] sm:$0xff] }
  0x95   : > { %5830 = vmatmul.mubr.msk.f32.gmra.mxu1 %vm8534_vm9, %v8533_v4  ;;  %5882 = vmatprep.mubr.msk.f32.mxu0 %vm8539_vm13, %v8538_v38  ;;  %vm8548_vm9 = vmmov %vm8536_vm1 }
  0x96   : > { %5832 = vmatprep.mubr.msk.f32.mxu1 %vm8537_vm11, %v1966_v31  ;;  %vm8551_vm11 = vnez %v8550_v22  ;;  %vm8554_vm13 = vmmov %vm8536_vm1  ;;  %v8567_v31 = vld [vmem:[#allocation12_spill] sm:$0xff]  ;;  %v8692_v22 = vsel %vm6831_vm15, 0.0, %v6890_v20  ;;  %v8701_v20 = vld [vmem:[#allocation61_spill] sm:$0xff] }
  0x97   : > { %v1970_v9 = vsel %vm8551_vm11, 0.0, %v8549_v12 }
  0x98   : > { %5883 = vmatmul.mubr.msk.f32.gmra.mxu0 %vm8545_vm3, %v8544_v34  ;;  %vm8557_vm3 = vmmov %vm8536_vm1  ;;  %v8572_v34 = vld [vmem:[#allocation13_spill] sm:$0xff] }
  0x99   : > { %5833 = vmatmul.mubr.msk.f32.gmra.mxu1 %vm8543_vm6, %v8542_v33  ;;  %5885 = vmatprep.mubr.msk.f32.mxu0 %vm8548_vm9, %v8547_v35  ;;  %vm8555_vm6 = vmmov %vm8536_vm1  ;;  %v8575_v35 = vld [vmem:[#allocation14_spill] sm:$0xff] }
  0x9a   : > { %5835 = vmatprep.mubr.msk.f32.mxu1 %vm8546_vm5, %v1968_v46  ;;  %vm8558_vm5 = vmmov %vm8536_vm1  ;;  %v7142_v46 = vld [vmem:[%s6218_s28 + $0x100] sm:$0xff] }
  0x9b   : > { %vm8560_vm9 = vmmov %vm8536_vm1 }
  0x9c   : > { %5886 = vmatmul.mubr.msk.f32.gmra.mxu0 %vm8554_vm13, %v8553_v11  ;;  %vm8562_vm13 = vmmov %vm8536_vm1  ;;  %v7155_v11 = vld [vmem:[%s6218_s28 + $0x101] sm:$0xff] }
  0x9d   : > { %5836 = vmatmul.mubr.msk.f32.gmra.mxu1 %vm8536_vm1, %v8552_v7  ;;  %5888 = vmatprep.mubr.msk.f32.mxu0 %vm8557_vm3, %v8556_v13  ;;  %vm8565_vm3 = vmmov %vm8536_vm1  ;;  %v8578_v13 = vld [vmem:[#allocation15_spill] sm:$0xff] }
  0x9e   : > { %5838 = vmatprep.mubr.msk.f32.mxu1 %vm8555_vm6, %v1970_v9  ;;  %vm8563_vm6 = vmmov %vm8536_vm1 }
  0x9f   : > { %vm8574_vm7 = vmmov %vm8565_vm3 }
  0xa0   : > { %5889 = vmatmul.mubr.msk.f32.gmra.mxu0 %vm8560_vm9, %v8559_v17  ;;  %vm8568_vm9 = vmmov %vm8536_vm1  ;;  %v7168_v17 = vld [vmem:[%s6218_s28 + $0x109] sm:$0xff] }
  0xa1   : > { %5839 = vmatmul.mubr.msk.f32.gmra.mxu1 %vm8558_vm5, %v6880_v25  ;;  %5891 = vmatprep.mubr.msk.f32.mxu0 %vm8562_vm13, %v8561_v19  ;;  %vm8566_vm5 = vmmov %vm8536_vm1  ;;  %v8584_v19 = vld [vmem:[#allocation19_spill] sm:$0xff] }
  0xa2   : > { %5841 = vmatprep.mubr.msk.f32.mxu1 %vm8536_vm1, %v1972_v15  ;;  %vm8570_vm1 = vnez %v8569_v36  ;;  %vm8571_vm13 = vmmov %vm8565_vm3  ;;  %v7165_v15 = vld [vmem:[%s6218_s28 + $0x108] sm:$0xff] }
  0xa3   : > { %v1976_v38 = vsel %vm8570_vm1, 0.0, %v6922_v0  ;;  %vm8579_vm1 = vmmov %vm8565_vm3 }
  0xa4   : > { %5892 = vmatmul.mubr.msk.f32.gmra.mxu0 %vm8565_vm3, %v8564_v24  ;;  %v8587_v24 = vld [vmem:[#allocation18_spill] sm:$0xff] }
  0xa5   : > { %5842 = vmatmul.mubr.msk.f32.gmra.mxu1 %vm8563_vm6, %v6916_v28  ;;  %5894 = vmatprep.mubr.msk.f32.mxu0 %vm8568_vm9, %v8567_v31  ;;  %vm8573_vm6 = vmmov %vm8565_vm3  ;;  %v8588_v31 = vld [vmem:[#allocation16_spill] sm:$0xff] }
  0xa6   : > { %5844 = vmatprep.mubr.msk.f32.mxu1 %vm8566_vm5, %v1974_v21  ;;  %vm8576_vm5 = vnez %v8485_v18  ;;  %vm8577_vm9 = vmmov %vm8565_vm3  ;;  %v8586_v21 = vsel %vm6378_vm2, 0.0, %v6443_v3 }
  0xa7   : > { %v1978_v9 = vsel %vm8576_vm5, 0.0, %v7142_v46 }
  0xa8   : > { %5895 = vmatmul.mubr.msk.f32.gmra.mxu0 %vm8573_vm6, %v8572_v34  ;;  %vm8581_vm6 = vmmov %vm8579_vm1  ;;  %v8595_v34 = vld [vmem:[#allocation17_spill] sm:$0xff] }
  0xa9   : > { %5845 = vmatmul.mubr.msk.f32.gmra.mxu1 %vm8571_vm13, %v6951_v62  ;;  %5897 = vmatprep.mubr.msk.f32.mxu0 %vm8565_vm3, %v8575_v35  ;;  %vm8580_vm13 = vmmov %vm8579_vm1  ;;  %vm8596_vm2 = vnez %v8595_v34  ;;  %v8597_v35 = vld [vmem:[#allocation20_spill] sm:$0xff] }
  0xaa   : > { %5847 = vmatprep.mubr.msk.f32.mxu1 %vm8574_vm7, %v1976_v38  ;;  %vm8582_vm7 = vmmov %vm8579_vm1  ;;  %v2767_v3 = vsel %vm8596_vm2, 0.0, %v8594_v42 }
  0xab   : > { %vm8583_vm3 = vmmov %vm8579_vm1 }
  0xac   : > { %5898 = vmatmul.mubr.msk.f32.gmra.mxu0 %vm8579_vm1, %v8578_v13  ;;  %vm8606_vm2 = vmmov %vm8579_vm1  ;;  %v8612_v13 = vld [vmem:[#allocation26_spill] sm:$0xff] }
  0xad   : > { %5848 = vmatmul.mubr.msk.f32.gmra.mxu1 %vm8577_vm9, %v6976_v43  ;;  %5900 = vmatprep.mubr.msk.f32.mxu0 %vm8581_vm6, %v7155_v11  ;;  %vm8585_vm9 = vmmov %vm8579_vm1 }
  0xae   : > { %5850 = vmatprep.mubr.msk.f32.mxu1 %vm8580_vm13, %v1978_v9  ;;  %vm8589_vm13 = vnez %v8588_v31  ;;  %vm8590_vm6 = vmmov %vm8579_vm1  ;;  %v8598_v9 = vsel %vm6412_vm4, 0.0, %v6490_v49 }
  0xaf   : > { %v2765_v38 = vsel %vm8589_vm13, 0.0, %v8587_v24  ;;  %vm8604_vm13 = vnez %v8365_v2  ;;  %vm8610_vm4 = vmmov %vm8606_vm2  ;;  %v8614_v2 = vsel %vm6485_vm8, 0.0, %v6544_v23  ;;  %v8624_v23 = vld [vmem:[#allocation31_spill] sm:$0xff] }
  0xb0   : > { %5901 = vmatmul.mubr.msk.f32.gmra.mxu0 %vm8583_vm3, %v7168_v17  ;;  %vm8592_vm3 = vcmask 1043456  }
  0xb1   : > { %5851 = vmatmul.mubr.msk.f32.gmra.mxu1 %vm8582_vm7, %v7165_v15  ;;  %5955 = vmatprep.mubr.msk.f32.mxu0 %vm8579_vm1, %v8586_v21  ;;  %vm8591_vm7 = vmmov %vm8579_vm1  ;;  %v8620_v21 = vld [vmem:[#allocation29_spill] sm:$0xff] }
  0xb2   : > { %5905 = vmatprep.mubr.msk.f32.mxu1 %vm8585_vm9, %v8584_v19  ;;  %vm8593_vm9 = vmmov %vm8592_vm3 }
  0xb4   : > { %5956 = vmatmul.mubr.msk.f32.vlgmr.msra.gmra.mxu0 %vm8591_vm7, %v6504_v53  ;;  %vm8600_vm7 = vmmov %vm8579_vm1  ;;  %v8602_v53 = vld [vmem:[#allocation24_spill] sm:$0xff] }
  0xb5   : > { %5906 = vmatmul.mubr.msk.f32.vlgmr.msra.gmra.mxu1 %vm8590_vm6, %v2765_v38  ;;  %6054 = vmatpush3.msk.msra.mxu0 %vm8593_vm9, %v7005_v27  ;;  %vm8599_vm6 = vmmov %vm8579_vm1  ;;  %v8607_v27 = vld [vmem:[#allocation25_spill] sm:$0xff]  ;;  %v8629_v38 = vld [vmem:[#allocation32_spill] sm:$0xff] }
  0xb6   : > { %6004 = vmatpush3.msk.msra.mxu1 %vm8592_vm3, %v7000_v57  ;;  %5908 = vmatprep.mubr.msk.f32.mxu1 %vm8579_vm1, %v8597_v35  ;;  %vm8601_vm3 = vmmov %vm8579_vm1  ;;  %v8605_v57 = vsel %vm8604_vm13, 0.0, %v6524_v5  ;;  %v8616_v5 = vld [vmem:[#allocation28_spill] sm:$0xff] }
  0xb7   : > { %5958 = vmatprep.mubr.msk.f32.mxu0 %vm8599_vm6, %v8598_v9  ;;  %vm8603_vm9 = vmmov %vm8579_vm1  ;;  %vm8609_vm1 = vnez %v8608_v56  ;;  %v8645_v9 = vld [vmem:[#allocation38_spill] sm:$0xff] }
  0xb8   : > { %5959 = vmatmul.mubr.msk.f32.gmra.mxu0 %vm8601_vm3, %v6550_v51  ;;  %v2769_v49 = vsel %vm8609_vm1, 0.0, %v8607_v27  ;;  %vm8611_vm6 = vmmov %vm8606_vm2  ;;  %v8617_v51 = vld [vmem:[#allocation23_spill] sm:$0xff] }
  0xb9   : > { %5909 = vmatmul.mubr.msk.f32.gmra.mxu1 %vm8600_vm7, %v2767_v3  ;;  %5961 = vmatprep.mubr.msk.f32.mxu0 %vm8606_vm2, %v8605_v57  ;;  %vm8613_vm7 = vmmov %vm8606_vm2  ;;  %vm8618_vm13 = vnez %v8617_v51  ;;  %v8637_v3 = vld [vmem:[#allocation35_spill] sm:$0xff]  ;;  %v8654_v57 = vld [vmem:[#allocation44_spill] sm:$0xff] }
  0xba   : > { %5911 = vmatprep.mubr.msk.f32.mxu1 %vm8603_vm9, %v8602_v53  ;;  %vm8615_vm3 = vmmov %vm8606_vm2  ;;  %v2771_v19 = vsel %vm8618_vm13, 0.0, %v8616_v5 }
  0xbb   : > { %vm8619_vm9 = vmmov %vm8606_vm2 }
  0xbc   : > { %5962 = vmatmul.mubr.msk.f32.gmra.mxu0 %vm8611_vm6, %v6587_v59  ;;  %vm8623_vm6 = vmmov %vm8606_vm2  ;;  %v8625_v59 = vld [vmem:[#allocation27_spill] sm:$0xff] }
  0xbd   : > { %5912 = vmatmul.mubr.msk.f32.gmra.mxu1 %vm8610_vm4, %v2769_v49  ;;  %5964 = vmatprep.mubr.msk.f32.mxu0 %vm8615_vm3, %v8614_v2  ;;  %vm8621_vm4 = vmmov %vm8606_vm2  ;;  %vm8626_vm8 = vnez %v8625_v59  ;;  %v8669_v2 = vld [vmem:[#allocation43_spill] sm:$0xff] }
  0xbe   : > { %5914 = vmatprep.mubr.msk.f32.mxu1 %vm8613_vm7, %v8612_v13  ;;  %v2773_v24 = vsel %vm8626_vm8, 0.0, %v8624_v23  ;;  %vm8627_vm7 = vmmov %vm8606_vm2  ;;  %v8676_v23 = vld [vmem:[#allocation56_spill] sm:$0xff] }
  0xbf   : > { %vm8628_vm3 = vmmov %vm8606_vm2 }
  0xc0   : > { %5965 = vmatmul.mubr.msk.f32.gmra.mxu0 %vm8619_vm9, %v6624_v44  ;;  %vm8631_vm9 = vmmov %vm8606_vm2  ;;  %v8633_v44 = vld [vmem:[#allocation30_spill] sm:$0xff] }
  0xc1   : > { %5915 = vmatmul.mubr.msk.f32.gmra.mxu1 %vm8606_vm2, %v2771_v19  ;;  %5967 = vmatprep.mubr.msk.f32.mxu0 %vm8623_vm6, %v8622_v48  ;;  %vm8634_vm10 = vnez %v8633_v44  ;;  %vm8636_vm6 = vmmov %vm8606_vm2 }
  0xc2   : > { %5917 = vmatprep.mubr.msk.f32.mxu1 %vm8621_vm4, %v8620_v21  ;;  %v2775_v42 = vsel %vm8634_vm10, 0.0, %v8632_v58  ;;  %vm8635_vm4 = vmmov %vm8606_vm2 }
  0xc4   : > { %5968 = vmatmul.mubr.msk.f32.gmra.mxu0 %vm8628_vm3, %v6661_v63  ;;  %vm8640_vm3 = vmmov %vm8606_vm2  ;;  %v8642_v63 = vld [vmem:[#allocation33_spill] sm:$0xff] }
  0xc5   : > { %5918 = vmatmul.mubr.msk.f32.gmra.mxu1 %vm8627_vm7, %v2773_v24  ;;  %5970 = vmatprep.mubr.msk.f32.mxu0 %vm8631_vm9, %v8630_v41  ;;  %vm8638_vm7 = vmmov %vm8606_vm2  ;;  %vm8643_vm12 = vnez %v8642_v63  ;;  %v8677_v24 = vld [vmem:[#allocation49_spill] sm:$0xff] }
  0xc6   : > { %5920 = vmatprep.mubr.msk.f32.mxu1 %vm8606_vm2, %v8629_v38  ;;  %v2777_v35 = vsel %vm8643_vm12, 0.0, %v8641_v55  ;;  %vm8644_vm9 = vmmov %vm8606_vm2 }
  0xc7   : > { %vm8658_vm12 = vmmov %vm8606_vm2 }
  0xc8   : > { %5971 = vmatmul.mubr.msk.f32.gmra.mxu0 %vm8636_vm6, %v6698_v60  ;;  %vm8647_vm6 = vnez %v8400_v47  ;;  %v8651_v60 = vld [vmem:[#allocation36_spill] sm:$0xff] }
  0xc9   : > { %5921 = vmatmul.mubr.msk.f32.gmra.mxu1 %vm8635_vm4, %v2775_v42  ;;  %5973 = vmatprep.mubr.msk.f32.mxu0 %vm8640_vm3, %v8639_v10  ;;  %vm8646_vm4 = vmmov %vm8606_vm2  ;;  %v8648_v50 = vsel %vm8647_vm6, 0.0, %v6692_v45  ;;  %vm8652_vm14 = vnez %v8651_v60  ;;  %v8659_v45 = vld [vmem:[#allocation45_spill] sm:$0xff]  ;;  %v8686_v10 = vld [vmem:[#allocation55_spill] sm:$0xff] }
  0xca   : > { %5923 = vmatprep.mubr.msk.f32.mxu1 %vm8638_vm7, %v8637_v3  ;;  %vm8649_vm7 = vmmov %vm8606_vm2  ;;  %v2779_v53 = vsel %vm8652_vm14, 0.0, %v8650_v40  ;;  %v8685_v3 = vld [vmem:[#allocation60_spill] sm:$0xff]  ;;  %v8693_v40 = vld [vmem:[#allocation63_spill] sm:$0xff] }
  0xcb   : > { %vm8653_vm3 = vmmov %vm8606_vm2 }
  0xcc   : > { %5974 = vmatmul.mubr.msk.f32.gmra.mxu0 %vm8644_vm9, %v6735_v32  ;;  %vm8655_vm9 = vmmov %vm8606_vm2  ;;  %v8660_v32 = vld [vmem:[#allocation39_spill] sm:$0xff] }
  0xcd   : > { %5924 = vmatmul.mubr.msk.f32.gmra.mxu1 %vm8606_vm2, %v2777_v35  ;;  %5976 = vmatprep.mubr.msk.f32.mxu0 %vm8649_vm7, %v8648_v50  ;;  %vm8661_vm6 = vnez %v8660_v32  ;;  %vm8662_vm7 = vmmov %vm8606_vm2 }
  0xce   : > { %5926 = vmatprep.mubr.msk.f32.mxu1 %vm8646_vm4, %v8645_v9  ;;  %vm8656_vm4 = vnez %v8407_v30  ;;  %v2781_v27 = vsel %vm8661_vm6, 0.0, %v8659_v45 }
  0xcf   : > { %v8657_v47 = vsel %vm8656_vm4, 0.0, %v8530_v26  ;;  %v8668_v26 = vld [vmem:[#allocation50_spill] sm:$0xff]  ;;  %vm8670_vm4 = vnez %v8669_v2 }
  0xd0   : > { %5977 = vmatmul.mubr.msk.f32.gmra.mxu0 %vm8606_vm2, %v8533_v4  ;;  %v8664_v4 = vld [vmem:[#allocation48_spill] sm:$0xff]  ;;  %v2783_v5 = vsel %vm8670_vm4, 0.0, %v8668_v26 }
  0xd1   : > { %5927 = vmatmul.mubr.msk.f32.gmra.mxu1 %vm8653_vm3, %v2779_v53  ;;  %5979 = vmatprep.mubr.msk.f32.mxu0 %vm8658_vm12, %v8657_v47  ;;  %vm8663_vm3 = vmmov %vm8606_vm2  ;;  %v8694_v53 = vld [vmem:[#allocation59_spill] sm:$0xff] }
  0xd2   : > { %5929 = vmatprep.mubr.msk.f32.mxu1 %vm8655_vm9, %v8654_v57  ;;  %vm8665_vm9 = vnez %v8531_v29  ;;  %vm8667_vm12 = vmmov %vm8606_vm2  ;;  %v8673_v29 = vld [vmem:[#allocation54_spill] sm:$0xff] }
  0xd3   : > { %v8666_v30 = vsel %vm8665_vm9, 0.0, %v8540_v6  ;;  %v8674_v6 = vsel %vm8541_vm0, 0.0, %v8549_v12  ;;  %vm8675_vm9 = vmmov %vm8606_vm2  ;;  %v8683_v12 = vsel %vm8551_vm11, 0.0, %v6849_v54  ;;  %v8690_v54 = vld [vmem:[#allocation62_spill] sm:$0xff] }
  0xd4   : > { %v7292_v49 = vpop.f32.mrf.mxu0  ;;  %5980 = vmatmul.mubr.msk.f32.gmra.mxu0 %vm8663_vm3, %v8542_v33  ;;  %vm8672_vm3 = vmmov %vm8606_vm2 }
  0xd5   : > { %v7294_v13 = vpop.f32.mrf.mxu1  ;;  %5930 = vmatmul.mubr.msk.f32.gmra.mxu1 %vm8662_vm7, %v2781_v27  ;;  %5982 = vmatprep.mubr.msk.f32.mxu0 %vm8667_vm12, %v8666_v30  ;;  %vm8671_vm7 = vmmov %vm8606_vm2  ;;  %vm8678_vm12 = vnez %v8677_v24 }
  0xd6   : > { %5932 = vmatprep.mubr.msk.f32.mxu1 %vm8606_vm2, %v8664_v4  ;;  %v7309_v19 = vpop.f32.mrf.mxu0  ;;  %v2785_v38 = vsel %vm8678_vm12, 0.0, %v8676_v23  ;;  %vm8682_vm0 = vmmov %vm8606_vm2 }
  0xd7   : > { %v7311_v21 = vpop.f32.mrf.mxu1  ;;  %vm8691_vm11 = vmmov %vm8682_vm0 }
  0xd8   : > { %v7313_v48 = vpop.f32.mrf.mxu0  ;;  %5983 = vmatmul.mubr.msk.f32.gmra.mxu0 %vm8672_vm3, %v8552_v7  ;;  %vm8680_vm3 = vmmov %vm8606_vm2 }
  0xd9   : > { %v7315_v33 = vpop.f32.mrf.mxu1  ;;  %5933 = vmatmul.mubr.msk.f32.gmra.mxu1 %vm8671_vm7, %v2783_v5  ;;  %5985 = vmatprep.mubr.msk.f32.mxu0 %vm8675_vm9, %v8674_v6  ;;  %vm8679_vm7 = vmmov %vm8606_vm2  ;;  %vm8687_vm9 = vnez %v8686_v10  ;;  %v7424_v6 = vld [vmem:[%s6218_s28 + $0x10a] sm:$0xff] }
  0xda   : > { %5935 = vmatprep.mubr.msk.f32.mxu1 %vm8606_vm2, %v8673_v29  ;;  %v7330_v41 = vpop.f32.mrf.mxu0  ;;  %vm8684_vm2 = vmmov %vm8682_vm0  ;;  %v2787_v55 = vsel %vm8687_vm9, 0.0, %v8685_v3  ;;  %v7419_v29 = vld [vmem:[%s6218_s28 + $0x102] sm:$0xff]  ;;  %v5288_v3 = vld [vmem:[%s6218_s28 + $0x2a] sm:$0xff] }
  0xdb   : > { %v7332_v58 = vpop.f32.mrf.mxu1  ;;  %vm8698_vm15 = vmmov %vm8682_vm0 }
  0xdc   : > { %v7334_v42 = vpop.f32.mrf.mxu0  ;;  %5986 = vmatmul.mubr.msk.f32.gmra.mxu0 %vm8680_vm3, %v6880_v25  ;;  %vm8689_vm3 = vmmov %vm8682_vm0 }
  0xdd   : > { %v7336_v7 = vpop.f32.mrf.mxu1  ;;  %5936 = vmatmul.mubr.msk.f32.gmra.mxu1 %vm8679_vm7, %v2785_v38  ;;  %5988 = vmatprep.mubr.msk.f32.mxu0 %vm8684_vm2, %v8683_v12  ;;  %vm8688_vm7 = vmmov %vm8682_vm0  ;;  %vm8695_vm2 = vnez %v8694_v53  ;;  %v5221_v12 = vld [vmem:[%s6218_s28 + $0x21] sm:$0xff] }
  0xde   : > { %5938 = vmatprep.mubr.msk.f32.mxu1 %vm8682_vm0, %v8681_v39  ;;  %v7351_v35 = vpop.f32.mrf.mxu0  ;;  %v2789_v57 = vsel %vm8695_vm2, 0.0, %v8693_v40  ;;  %vm8702_vm2 = vnez %v8701_v20 }
  0xdf   : > { %v7353_v9 = vpop.f32.mrf.mxu1  ;;  %v2791_v4 = vsel %vm8702_vm2, 0.0, %v6935_v37  ;;  %v8707_v37 = vld [vmem:[#allocation65_spill] sm:$0xff] }
  0xe0   : > { %v7355_v50 = vpop.f32.mrf.mxu0  ;;  %5989 = vmatmul.mubr.msk.f32.gmra.mxu0 %vm8689_vm3, %v6916_v28  ;;  %vm8697_vm3 = vmmov %vm8682_vm0  ;;  %vm8708_vm2 = vnez %v8707_v37 }
  0xe1   : > { %v7357_v25 = vpop.f32.mrf.mxu1  ;;  %5939 = vmatmul.mubr.msk.f32.gmra.mxu1 %vm8688_vm7, %v2787_v55  ;;  %5991 = vmatprep.mubr.msk.f32.mxu0 %vm8682_vm0, %v8692_v22  ;;  %vm8696_vm7 = vmmov %vm8682_vm0  ;;  %v5222_v22 = vld [vmem:[%s6218_s28 + $0x29] sm:$0xff] }
  0xe2   : > { %5941 = vmatprep.mubr.msk.f32.mxu1 %vm8691_vm11, %v8690_v54  ;;  %v7372_v47 = vpop.f32.mrf.mxu0  ;;  %vm8699_vm11 = vnez %v8466_v52 }
  0xe3   : > { %v7374_v45 = vpop.f32.mrf.mxu1  ;;  %v8700_v1 = vsel %vm8699_vm11, 0.0, %v6922_v0  ;;  %vm8706_vm11 = vmmov %vm8682_vm0 }
  0xe4   : > { %v7376_v27 = vpop.f32.mrf.mxu0  ;;  %5992 = vmatmul.mubr.msk.f32.gmra.mxu0 %vm8697_vm3, %v6951_v62  ;;  %v5185_v62 = vld [vmem:[%s6218_s28 + $0x110] sm:$0xff]  ;;  %vm8704_vm3 = vmmov %vm8682_vm0 }
  0xe5   : > { %v7378_v28 = vpop.f32.mrf.mxu1  ;;  %5942 = vmatmul.mubr.msk.f32.gmra.mxu1 %vm8696_vm7, %v2789_v57  ;;  %5994 = vmatprep.mubr.msk.f32.mxu0 %vm8682_vm0, %v8700_v1  ;;  %vm8703_vm7 = vnez %v8569_v36  ;;  %v2793_v36 = vsel %vm8708_vm2, 0.0, %v6967_v61  ;;  %v5186_v61 = vld [vmem:[%s6218_s28 + $0x118] sm:$0xff] }
  0xe6   : > { %5944 = vmatprep.mubr.msk.f32.mxu1 %vm8698_vm15, %v6928_v16  ;;  %v7393_v30 = vpop.f32.mrf.mxu0  ;;  %v3217_v16 = vsel %vm8703_vm7, 0.0, %v7142_v46  ;;  %vm8705_vm15 = vmmov %vm8682_vm0 }
  0xe7   : > { %v7395_v26 = vpop.f32.mrf.mxu1  ;;  %vm8709_vm7 = vmmov %vm8682_vm0 }
  0xe8   : > { %v7401_v52 = vpop.f32.mrf.mxu0  ;;  %5995 = vmatmul.mubr.msk.f32.gmra.mxu0 %vm8705_vm15, %v6976_v43  ;;  %v3219_v43 = vsel %vm8576_vm5, 0.0, %v5185_v62  ;;  %vm8711_vm15 = vmmov %vm8682_vm0  ;;  %vm8713_vm5 = vnez %v8490_v14  ;;  %v5290_v62 = vld [vmem:[%s6218_s28 + $0x3a] sm:$0xff] }
  0xe9   : > { %v7403_v0 = vpop.f32.mrf.mxu1  ;;  %5945 = vmatmul.mubr.msk.f32.gmra.mxu1 %vm8704_vm3, %v2791_v4  ;;  %5997 = vmatprep.mubr.msk.f32.mxu0 %vm8682_vm0, %v3217_v16  ;;  %vm8710_vm3 = vmmov %vm8682_vm0  ;;  %v2795_v18 = vsel %vm8713_vm5, 0.0, %v7424_v6  ;;  %v5223_v4 = vld [vmem:[%s6218_s28 + $0x31] sm:$0xff] }
  0xea   : > { %5947 = vmatprep.mubr.msk.f32.mxu1 %vm8706_vm11, %v6960_v8  ;;  %v7414_v46 = vpop.f32.mrf.mxu0  ;;  %vm8712_vm11 = vmmov %vm8682_vm0  ;;  %v5289_v16 = vld [vmem:[%s6218_s28 + $0x32] sm:$0xff] }
  0xeb   : > { %v7416_v5 = vpop.f32.mrf.mxu1 }
  0xec   : > { %v7426_v8 = vpop.f32.mrf.mxu0  ;;  %5998 = vmatmul.mubr.msk.f32.gmra.mxu0 %vm8710_vm3, %v7165_v15  ;;  %v5287_v15 = vld [vmem:[%s6218_s28 + $0x22] sm:$0xff]  ;;  %vm8716_vm3 = vmmov %vm8682_vm0 }
  0xed   : > { %v7428_v23 = vpop.f32.mrf.mxu1  ;;  %5948 = vmatmul.mubr.msk.f32.gmra.mxu1 %vm8709_vm7, %v2793_v36  ;;  %6000 = vmatprep.mubr.msk.f32.mxu0 %vm8712_vm11, %v3219_v43  ;;  %vm8715_vm7 = vmmov %vm8682_vm0  ;;  %vm8718_vm11 = vnez %v8588_v31  ;;  %v5224_v31 = vld [vmem:[%s6218_s28 + $0x39] sm:$0xff] }
  0xee   : > { %5950 = vmatprep.mubr.msk.f32.mxu1 %vm8711_vm15, %v7419_v29  ;;  %v7440_v38 = vpop.f32.mrf.mxu0  ;;  %vm8717_vm15 = vmmov %vm8682_vm0  ;;  %v4006_v40 = vsel %vm8718_vm11, 0.0, %v5288_v3  ;;  %vm8723_vm11 = vnez %v8595_v34  ;;  %v5225_v3 = vld [vmem:[%s6218_s28 + $0x41] sm:$0xff] }
  0xef   : > { %v7442_v39 = vpop.f32.mrf.mxu1 }
  0xf0   : > { %v7447_v55 = vpop.f32.mrf.mxu0  ;;  %6001 = vmatmul.mubr.msk.f32.gmra.mxu0 %vm8715_vm7, %v5186_v61  ;;  %vm8720_vm7 = vmmov %vm8682_vm0  ;;  %v4008_v61 = vsel %vm8723_vm11, 0.0, %v5290_v62  ;;  %v5226_v62 = vld [vmem:[%s6218_s28 + $0x49] sm:$0xff] }
  0xf1   : > { %v7449_v54 = vpop.f32.mrf.mxu1  ;;  %5951 = vmatmul.mubr.msk.f32.gmra.mxu1 %vm8682_vm0, %v2795_v18  ;;  %6055 = vmatprep.mubr.msk.f32.mxu0 %vm8717_vm15, %v5287_v15  ;;  %vm8722_vm15 = vmmov %vm8682_vm0 }
  0xf2   : > { %8714 = vst [vmem:[#allocation2_spill] sm:$0xff] %v7449_v54  ;;  %6005 = vmatprep.mubr.msk.f32.mxu1 %vm8716_vm3, %v5221_v12  ;;  %v7458_v57 = vpop.f32.mrf.mxu0  ;;  %vm8721_vm3 = vmmov %vm8682_vm0  ;;  %v5292_v54 = vld [vmem:[%s6218_s28 + $0x4a] sm:$0xff] }
  0xf3   : > { %v7460_v1 = vpop.f32.mrf.mxu1  ;;  %vm8727_vm11 = vmmov %vm8682_vm0 }
  0xf4   : > { %8719 = vst [vmem:[#allocation42_spill] sm:$0xff] %v7460_v1  ;;  %v5757_v43 = vpop.f32.mrf.mxu0  ;;  %6056 = vmatmul.mubr.msk.f32.vlgmr.msra.gmra.mxu0 %vm8720_vm7, %v4006_v40  ;;  %v5291_v1 = vld [vmem:[%s6218_s28 + $0x42] sm:$0xff]  ;;  %vm8724_vm7 = vmmov %vm8682_vm0 }
  0xf5   : > { %v5707_v36 = vpop.f32.mrf.mxu1  ;;  %6006 = vmatmul.mubr.msk.f32.vlgmr.msra.gmra.mxu1 %vm8682_vm0, %v5222_v22  ;;  %6058 = vmatprep.mubr.msk.f32.mxu0 %vm8722_vm15, %v5289_v16  ;;  %vm8726_vm15 = vmmov %vm8682_vm0 }
  0xf6   : > { %v1335_v18 = vadd.f32 %v5707_v36, %v7292_v49  ;;  %6008 = vmatprep.mubr.msk.f32.mxu1 %vm8721_vm3, %v5223_v4  ;;  %v1721_v15 = vpop.f32.mrf.mxu0  ;;  %vm8725_vm3 = vmmov %vm8682_vm0  ;;  %v4010_v36 = vsel %vm8609_vm1, 0.0, %v5292_v54 }
  0xf7   : > { %v1329_v12 = vpop.f32.mrf.mxu1  ;;  %vm8728_vm1 = vmmov %vm8682_vm0 }
  0xf8   : > { %v7476_v22 = vadd.f32 %v5757_v43, %v1335_v18  ;;  %v1330_v49 = vadd.f32 %v1329_v12, %v7309_v19  ;;  %v5760_v4 = vpop.f32.mrf.mxu0  ;;  %6059 = vmatmul.mubr.msk.f32.gmra.mxu0 %vm8724_vm7, %v4008_v61  ;;  %v5227_v18 = vld [vmem:[%s6218_s28 + $0x51] sm:$0xff]  ;;  %vm8729_vm7 = vmmov %vm8682_vm0 }
  0xf9   : > { %v5710_v40 = vpop.f32.mrf.mxu1  ;;  %6009 = vmatmul.mubr.msk.f32.gmra.mxu1 %vm8682_vm0, %v5224_v31  ;;  %6061 = vmatprep.mubr.msk.f32.mxu0 %vm8726_vm15, %v5291_v1  ;;  %v5293_v12 = vld [vmem:[%s6218_s28 + $0x52] sm:$0xff]  ;;  %v5294_v31 = vld [vmem:[%s6218_s28 + $0x5a] sm:$0xff]  ;;  %vm8731_vm15 = vmmov %vm8682_vm0 }
  0xfa   : > { %v7481_v34 = vadd.f32 %v1721_v15, %v1330_v49  ;;  %v1345_v16 = vadd.f32 %v5710_v40, %v7313_v48  ;;  %6011 = vmatprep.mubr.msk.f32.mxu1 %vm8725_vm3, %v5225_v3  ;;  %v1731_v43 = vpop.f32.mrf.mxu0  ;;  %v5228_v1 = vld [vmem:[%s6218_s28 + $0x59] sm:$0xff]  ;;  %v4012_v49 = vsel %vm8618_vm13, 0.0, %v5294_v31  ;;  %vm8730_vm3 = vmmov %vm8682_vm0 }
  0xfb   : > { %v1339_v19 = vpop.f32.mrf.mxu1  ;;  %vm8732_vm13 = vmmov %vm8682_vm0 }
  0xfc   : > { %v7492_v61 = vadd.f32 %v5760_v4, %v1345_v16  ;;  %v1340_v48 = vadd.f32 %v1339_v19, %v7330_v41  ;;  %v5763_v3 = vpop.f32.mrf.mxu0  ;;  %6062 = vmatmul.mubr.msk.f32.gmra.mxu0 %vm8682_vm0, %v4010_v36  ;;  %v5229_v4 = vld [vmem:[%s6218_s28 + $0x61] sm:$0xff] }
  0xfd   : > { %v5713_v15 = vpop.f32.mrf.mxu1  ;;  %6012 = vmatmul.mubr.msk.f32.gmra.mxu1 %vm8727_vm11, %v5226_v62  ;;  %6064 = vmatprep.mubr.msk.f32.mxu0 %vm8729_vm7, %v5293_v12  ;;  %v5295_v16 = vld [vmem:[%s6218_s28 + $0x62] sm:$0xff]  ;;  %v5296_v62 = vld [vmem:[%s6218_s28 + $0x6a] sm:$0xff]  ;;  %vm8733_vm11 = vmmov %vm8682_vm0 }
  0xfe   : > { %v7497_v56 = vadd.f32 %v1731_v43, %v1340_v48  ;;  %v1355_v54 = vadd.f32 %v5713_v15, %v7334_v42  ;;  %6014 = vmatprep.mubr.msk.f32.mxu1 %vm8728_vm1, %v5227_v18  ;;  %v1741_v40 = vpop.f32.mrf.mxu0  ;;  %v5230_v12 = vld [vmem:[%s6218_s28 + $0x69] sm:$0xff]  ;;  %v4014_v31 = vsel %vm8626_vm8, 0.0, %v5296_v62  ;;  %v5231_v15 = vld [vmem:[%s6218_s28 + $0x71] sm:$0xff]  ;;  %vm8734_vm1 = vmmov %vm8682_vm0 }
  0xff   : > { %v1349_v41 = vpop.f32.mrf.mxu1  ;;  %vm8735_vm8 = vmmov %vm8682_vm0 }
 0x100   : > { %v7508_v36 = vadd.f32 %v5763_v3, %v1355_v54  ;;  %v1350_v42 = vadd.f32 %v1349_v41, %v7351_v35  ;;  %v5766_v43 = vpop.f32.mrf.mxu0  ;;  %6065 = vmatmul.mubr.msk.f32.gmra.mxu0 %vm8731_vm15, %v4012_v49  ;;  %v5297_v3 = vld [vmem:[%s6218_s28 + $0x72] sm:$0xff]  ;;  %v5298_v54 = vld [vmem:[%s6218_s28 + $0x7a] sm:$0xff]  ;;  %vm8736_vm7 = vmmov %vm8682_vm0 }
 0x101   : > { %v5716_v19 = vpop.f32.mrf.mxu1  ;;  %6015 = vmatmul.mubr.msk.f32.gmra.mxu1 %vm8730_vm3, %v5228_v1  ;;  %6067 = vmatprep.mubr.msk.f32.mxu0 %vm8733_vm11, %v5295_v16  ;;  %v4016_v16 = vsel %vm8634_vm10, 0.0, %v5298_v54  ;;  %vm8737_vm3 = vmmov %vm8682_vm0  ;;  %vm8741_vm11 = vnez %v8642_v63  ;;  %v5235_v54 = vld [vmem:[%s6218_s28 + $0x91] sm:$0xff] }
 0x102   : > { %v7513_v51 = vadd.f32 %v1741_v40, %v1350_v42  ;;  %v1365_v18 = vadd.f32 %v5716_v19, %v7355_v50  ;;  %6017 = vmatprep.mubr.msk.f32.mxu1 %vm8732_vm13, %v5229_v4  ;;  %v1751_v48 = vpop.f32.mrf.mxu0  ;;  %v5232_v4 = vld [vmem:[%s6218_s28 + $0x79] sm:$0xff]  ;;  %v5233_v42 = vld [vmem:[%s6218_s28 + $0x81] sm:$0xff]  ;;  %vm8738_vm15 = vmmov %vm8682_vm0 }
 0x103   : > { %v1359_v35 = vpop.f32.mrf.mxu1  ;;  %v5299_v19 = vld [vmem:[%s6218_s28 + $0x82] sm:$0xff]  ;;  %vm8739_vm10 = vmmov %vm8682_vm0 }
 0x104   : > { %v7524_v1 = vadd.f32 %v5766_v43, %v1365_v18  ;;  %v1360_v50 = vadd.f32 %v1359_v35, %v7372_v47  ;;  %v5769_v41 = vpop.f32.mrf.mxu0  ;;  %6068 = vmatmul.mubr.msk.f32.gmra.mxu0 %vm8734_vm1, %v4014_v31  ;;  %v5300_v43 = vld [vmem:[%s6218_s28 + $0x8a] sm:$0xff]  ;;  %vm8740_vm13 = vmmov %vm8682_vm0 }
 0x105   : > { %v5719_v49 = vpop.f32.mrf.mxu1  ;;  %6018 = vmatmul.mubr.msk.f32.gmra.mxu1 %vm8682_vm0, %v5230_v12  ;;  %6070 = vmatprep.mubr.msk.f32.mxu0 %vm8736_vm7, %v5297_v3  ;;  %vm8742_vm1 = vmmov %vm8682_vm0 }
 0x106   : > { %v7529_v59 = vadd.f32 %v1751_v48, %v1360_v50  ;;  %v1375_v40 = vadd.f32 %v5719_v49, %v7376_v27  ;;  %6020 = vmatprep.mubr.msk.f32.mxu1 %vm8735_vm8, %v5231_v15  ;;  %v1761_v62 = vpop.f32.mrf.mxu0  ;;  %v5234_v48 = vld [vmem:[%s6218_s28 + $0x89] sm:$0xff]  ;;  %v4018_v15 = vsel %vm8741_vm11, 0.0, %v5300_v43  ;;  %v5301_v50 = vld [vmem:[%s6218_s28 + $0x92] sm:$0xff]  ;;  %v5302_v49 = vld [vmem:[%s6218_s28 + $0x9a] sm:$0xff] }
 0x107   : > { %v1369_v47 = vpop.f32.mrf.mxu1  ;;  %vm8743_vm8 = vmmov %vm8682_vm0  ;;  %v5303_v43 = vld [vmem:[%s6218_s28 + $0xa2] sm:$0xff] }
 0x108   : > { %v7540_v18 = vadd.f32 %v5769_v41, %v1375_v40  ;;  %v1370_v27 = vadd.f32 %v1369_v47, %v7393_v30  ;;  %v5772_v31 = vpop.f32.mrf.mxu0  ;;  %6071 = vmatmul.mubr.msk.f32.gmra.mxu0 %vm8738_vm15, %v4016_v16  ;;  %vm8744_vm7 = vmmov %vm8682_vm0  ;;  %v5236_v47 = vld [vmem:[%s6218_s28 + $0x99] sm:$0xff] }
 0x109   : > { %v5722_v12 = vpop.f32.mrf.mxu1  ;;  %6021 = vmatmul.mubr.msk.f32.gmra.mxu1 %vm8737_vm3, %v5232_v4  ;;  %6073 = vmatprep.mubr.msk.f32.mxu0 %vm8740_vm13, %v5299_v19  ;;  %v5237_v19 = vld [vmem:[%s6218_s28 + $0xa1] sm:$0xff]  ;;  %vm8745_vm3 = vmmov %vm8682_vm0 }
 0x10a   : > { %v7545_v44 = vadd.f32 %v1761_v62, %v1370_v27  ;;  %v1385_v35 = vadd.f32 %v5722_v12, %v7401_v52  ;;  %6023 = vmatprep.mubr.msk.f32.mxu1 %vm8739_vm10, %v5233_v42  ;;  %v1771_v3 = vpop.f32.mrf.mxu0  ;;  %v4020_v62 = vsel %vm8652_vm14, 0.0, %v5302_v49  ;;  %v5304_v27 = vld [vmem:[%s6218_s28 + $0xaa] sm:$0xff]  ;;  %vm8746_vm15 = vmmov %vm8682_vm0  ;;  %v5306_v49 = vld [vmem:[%s6218_s28 + $0xba] sm:$0xff] }
 0x10b   : > { %v1379_v30 = vpop.f32.mrf.mxu1  ;;  %vm8747_vm14 = vmmov %vm8682_vm0 }
 0x10c   : > { %v7556_v41 = vadd.f32 %v5772_v31, %v1385_v35  ;;  %v1380_v52 = vadd.f32 %v1379_v30, %v7414_v46  ;;  %v5775_v4 = vpop.f32.mrf.mxu0  ;;  %6074 = vmatmul.mubr.msk.f32.gmra.mxu0 %vm8742_vm1, %v4018_v15  ;;  %vm8748_vm10 = vmmov %vm8682_vm0  ;;  %v5238_v15 = vld [vmem:[%s6218_s28 + $0xa9] sm:$0xff]  ;;  %v4022_v30 = vsel %vm8661_vm6, 0.0, %v5304_v27 }
 0x10d   : > { %v5725_v40 = vpop.f32.mrf.mxu1  ;;  %6024 = vmatmul.mubr.msk.f32.gmra.mxu1 %vm8682_vm0, %v5234_v48  ;;  %6076 = vmatprep.mubr.msk.f32.mxu0 %vm8744_vm7, %v5301_v50  ;;  %v5305_v50 = vld [vmem:[%s6218_s28 + $0xb2] sm:$0xff]  ;;  %vm8749_vm13 = vmmov %vm8682_vm0 }
 0x10e   : > { %v7561_v63 = vadd.f32 %v1771_v3, %v1380_v52  ;;  %v1395_v16 = vadd.f32 %v5725_v40, %v7426_v8  ;;  %6026 = vmatprep.mubr.msk.f32.mxu1 %vm8743_vm8, %v5235_v54  ;;  %v1781_v42 = vpop.f32.mrf.mxu0  ;;  %v5239_v54 = vld [vmem:[%s6218_s28 + $0xb1] sm:$0xff]  ;;  %vm8750_vm11 = vmmov %vm8682_vm0 }
 0x10f   : > { %v1389_v46 = vpop.f32.mrf.mxu1  ;;  %vm8751_vm6 = vmmov %vm8682_vm0 }
 0x110   : > { %v7572_v12 = vadd.f32 %v5775_v4, %v1395_v16  ;;  %v1390_v8 = vadd.f32 %v1389_v46, %v7440_v38  ;;  %v5778_v35 = vpop.f32.mrf.mxu0  ;;  %6077 = vmatmul.mubr.msk.f32.gmra.mxu0 %vm8746_vm15, %v4020_v62  ;;  %v4024_v62 = vsel %vm8670_vm4, 0.0, %v5306_v49  ;;  %vm8752_vm1 = vmmov %vm8682_vm0 }
 0x111   : > { %v5728_v31 = vpop.f32.mrf.mxu1  ;;  %6027 = vmatmul.mubr.msk.f32.gmra.mxu1 %vm8745_vm3, %v5236_v47  ;;  %6079 = vmatprep.mubr.msk.f32.mxu0 %vm8748_vm10, %v5303_v43  ;;  %v5240_v47 = vld [vmem:[%s6218_s28 + $0xb9] sm:$0xff]  ;;  %v5308_v43 = vld [vmem:[%s6218_s28 + $0xca] sm:$0xff]  ;;  %vm8753_vm8 = vmmov %vm8682_vm0 }
 0x112   : > { %v7577_v60 = vadd.f32 %v1781_v42, %v1390_v8  ;;  %v1405_v48 = vadd.f32 %v5728_v31, %v7447_v55  ;;  %6029 = vmatprep.mubr.msk.f32.mxu1 %vm8747_vm14, %v5237_v19  ;;  %v1791_v3 = vpop.f32.mrf.mxu0  ;;  %v5241_v42 = vld [vmem:[%s6218_s28 + $0xc1] sm:$0xff]  ;;  %vm8754_vm4 = vmmov %vm8682_vm0 }
 0x113   : > { %v1399_v38 = vpop.f32.mrf.mxu1  ;;  %v5307_v19 = vld [vmem:[%s6218_s28 + $0xc2] sm:$0xff]  ;;  %vm8755_vm7 = vmmov %vm8682_vm0 }
 0x114   : > { %v7588_v52 = vadd.f32 %v5778_v35, %v1405_v48  ;;  %v1400_v55 = vadd.f32 %v1399_v38, %v7458_v57  ;;  %v5781_v4 = vpop.f32.mrf.mxu0  ;;  %6080 = vmatmul.mubr.msk.f32.gmra.mxu0 %vm8750_vm11, %v4022_v30  ;;  %v5242_v48 = vld [vmem:[%s6218_s28 + $0xc9] sm:$0xff]  ;;  %v5243_v38 = vld [vmem:[%s6218_s28 + $0xd1] sm:$0xff]  ;;  %vm8756_vm3 = vmmov %vm8682_vm0 }
 0x115   : > { %v5731_v40 = vpop.f32.mrf.mxu1  ;;  %6030 = vmatmul.mubr.msk.f32.gmra.mxu1 %vm8749_vm13, %v5238_v15  ;;  %6082 = vmatprep.mubr.msk.f32.mxu0 %vm8682_vm0, %v5305_v50  ;;  %v4026_v15 = vsel %vm8678_vm12, 0.0, %v5308_v43  ;;  %vm8757_vm15 = vmmov %vm8682_vm0 }
 0x116   : > { %v7593_v32 = vadd.f32 %v1791_v3, %v1400_v55  ;;  %v1415_v16 = vadd.f32 %v5731_v40, %v7294_v13  ;;  %6032 = vmatprep.mubr.msk.f32.mxu1 %vm8751_vm6, %v5239_v54  ;;  %v1801_v46 = vpop.f32.mrf.mxu0  ;;  %v5309_v3 = vld [vmem:[%s6218_s28 + $0xd2] sm:$0xff]  ;;  %v5310_v54 = vld [vmem:[%s6218_s28 + $0xda] sm:$0xff]  ;;  %vm8758_vm12 = vmmov %vm8682_vm0  ;;  %vm8764_vm6 = vnez %v8694_v53 }
 0x117   : > { %v1409_v57 = vpop.f32.mrf.mxu1  ;;  %vm8759_vm14 = vmmov %vm8682_vm0 }
 0x118   : > { %v7604_v27 = vadd.f32 %v5781_v4, %v1415_v16  ;;  %v1410_v13 = vadd.f32 %v1409_v57, %v7311_v21  ;;  %v5784_v31 = vpop.f32.mrf.mxu0  ;;  %6083 = vmatmul.mubr.msk.f32.gmra.mxu0 %vm8753_vm8, %v4024_v62  ;;  %v5244_v4 = vld [vmem:[%s6218_s28 + $0xd9] sm:$0xff]  ;;  %v4028_v16 = vsel %vm8687_vm9, 0.0, %v5310_v54  ;;  %v5245_v62 = vld [vmem:[%s6218_s28 + $0xe1] sm:$0xff]  ;;  %vm8760_vm10 = vmmov %vm8682_vm0 }
 0x119   : > { %v5734_v8 = vpop.f32.mrf.mxu1  ;;  %6033 = vmatmul.mubr.msk.f32.gmra.mxu1 %vm8752_vm1, %v5240_v47  ;;  %6085 = vmatprep.mubr.msk.f32.mxu0 %vm8755_vm7, %v5307_v19  ;;  %v5311_v57 = vld [vmem:[%s6218_s28 + $0xe2] sm:$0xff]  ;;  %vm8761_vm13 = vmmov %vm8682_vm0  ;;  %vm8768_vm7 = vnez %v8701_v20 }
 0x11a   : > { %v7609_v2 = vadd.f32 %v1801_v46, %v1410_v13  ;;  %v1425_v35 = vadd.f32 %v5734_v8, %v7315_v33  ;;  %6035 = vmatprep.mubr.msk.f32.mxu1 %vm8754_vm4, %v5241_v42  ;;  %v1811_v30 = vpop.f32.mrf.mxu0  ;;  %v5312_v46 = vld [vmem:[%s6218_s28 + $0xea] sm:$0xff]  ;;  %vm8762_vm9 = vmmov %vm8682_vm0 }
 0x11b   : > { %v1419_v21 = vpop.f32.mrf.mxu1  ;;  %vm8763_vm11 = vmmov %vm8682_vm0  ;;  %v5246_v8 = vld [vmem:[%s6218_s28 + $0xe9] sm:$0xff] }
 0x11c   : > { %v7620_v50 = vadd.f32 %v5784_v31, %v1425_v35  ;;  %v1420_v33 = vadd.f32 %v1419_v21, %v7332_v58  ;;  %v5787_v55 = vpop.f32.mrf.mxu0  ;;  %6086 = vmatmul.mubr.msk.f32.gmra.mxu0 %vm8757_vm15, %v4026_v15  ;;  %v4030_v31 = vsel %vm8764_vm6, 0.0, %v5312_v46  ;;  %v5313_v15 = vld [vmem:[%s6218_s28 + $0xf2] sm:$0xff]  ;;  %v5314_v21 = vld [vmem:[%s6218_s28 + $0xfa] sm:$0xff]  ;;  %vm8765_vm1 = vmmov %vm8682_vm0 }
 0x11d   : > { %v5737_v49 = vpop.f32.mrf.mxu1  ;;  %6036 = vmatmul.mubr.msk.f32.gmra.mxu1 %vm8756_vm3, %v5242_v48  ;;  %6088 = vmatprep.mubr.msk.f32.mxu0 %vm8759_vm14, %v5309_v3  ;;  %v5247_v48 = vld [vmem:[%s6218_s28 + $0xf1] sm:$0xff]  ;;  %vm8766_vm8 = vmmov %vm8682_vm0 }
 0x11e   : > { %v7625_v24 = vadd.f32 %v1811_v30, %v1420_v33  ;;  %v1435_v40 = vadd.f32 %v5737_v49, %v7336_v7  ;;  %6038 = vmatprep.mubr.msk.f32.mxu1 %vm8758_vm12, %v5243_v38  ;;  %v1821_v47 = vpop.f32.mrf.mxu0  ;;  %vm8767_vm4 = vmmov %vm8682_vm0  ;;  %v5248_v33 = vld [vmem:[%s6218_s28 + $0xf9] sm:$0xff]  ;;  %v4032_v49 = vsel %vm8768_vm7, 0.0, %v5314_v21 }
 0x11f   : > { %v1429_v58 = vpop.f32.mrf.mxu1  ;;  %vm8769_vm3 = vmmov %vm8682_vm0  ;;  %v5317_v46 = vld [vmem:[%s6218_s28 + $0x112] sm:$0xff] }
 0x120   : > { %v7636_v42 = vadd.f32 %v5787_v55, %v1435_v40  ;;  %v1430_v7 = vadd.f32 %v1429_v58, %v7353_v9  ;;  %v5790_v43 = vpop.f32.mrf.mxu0  ;;  %6089 = vmatmul.mubr.msk.f32.gmra.mxu0 %vm8761_vm13, %v4028_v16  ;;  %vm8770_vm15 = vmmov %vm8682_vm0 }
 0x121   : > { %v5740_v19 = vpop.f32.mrf.mxu1  ;;  %6039 = vmatmul.mubr.msk.f32.gmra.mxu1 %vm8760_vm10, %v5244_v4  ;;  %6091 = vmatprep.mubr.msk.f32.mxu0 %vm8763_vm11, %v5311_v57  ;;  %vm8771_vm12 = vmmov %vm8682_vm0  ;;  %v5251_v57 = vld [vmem:[%s6218_s28 + $0x111] sm:$0xff] }
 0x122   : > { %v7641_v10 = vadd.f32 %v1821_v47, %v1430_v7  ;;  %v1445_v13 = vadd.f32 %v5740_v19, %v7357_v25  ;;  %6041 = vmatprep.mubr.msk.f32.mxu1 %vm8762_vm9, %v5245_v62  ;;  %v1831_v35 = vpop.f32.mrf.mxu0  ;;  %vm8772_vm14 = vmmov %vm8682_vm0  ;;  %v5318_v7 = vld [vmem:[%s6218_s28 + $0x11a] sm:$0xff] }
 0x123   : > { %v1439_v9 = vpop.f32.mrf.mxu1  ;;  %vm8773_vm10 = vmmov %vm8682_vm0 }
 0x124   : > { %v7652_v30 = vadd.f32 %v5790_v43, %v1445_v13  ;;  %v1440_v38 = vadd.f32 %v1439_v9, %v7374_v45  ;;  %v5793_v25 = vpop.f32.mrf.mxu0  ;;  %6092 = vmatmul.mubr.msk.f32.gmra.mxu0 %vm8765_vm1, %v4030_v31  ;;  %vm8774_vm13 = vmmov %vm8682_vm0 }
 0x125   : > { %v5743_v3 = vpop.f32.mrf.mxu1  ;;  %6042 = vmatmul.mubr.msk.f32.gmra.mxu1 %vm8682_vm0, %v5246_v8  ;;  %6094 = vmatprep.mubr.msk.f32.mxu0 %vm8767_vm4, %v5313_v15  ;;  %vm8776_vm9 = vmmov %vm8682_vm0 }
 0x126   : > { %v7657_v54 = vadd.f32 %v1831_v35, %v1440_v38  ;;  %v1455_v53 = vadd.f32 %v5743_v3, %v7378_v28  ;;  %6044 = vmatprep.mubr.msk.f32.mxu1 %vm8766_vm8, %v5247_v48  ;;  %v1841_v55 = vpop.f32.mrf.mxu0  ;;  %vm8777_vm11 = vmmov %vm8682_vm0  ;;  %v8779_v48 = vld [vmem:[#allocation2_spill] sm:$0xff] }
 0x127   : > { %v1449_v45 = vpop.f32.mrf.mxu1  ;;  %vm8778_vm6 = vmmov %vm8682_vm0  ;;  %v8780_v3 = vld [vmem:[#allocation42_spill] sm:$0xff] }
 0x128   : > { %v7665_v40 = vadd.f32 %v5793_v25, %v1455_v53  ;;  %v1450_v4 = vadd.f32 %v1449_v45, %v7395_v26  ;;  %v5796_v58 = vpop.f32.mrf.mxu0  ;;  %6095 = vmatmul.mubr.msk.f32.gmra.mxu0 %vm8770_vm15, %v4032_v49  ;;  %v4034_v26 = vsel %vm8708_vm2, 0.0, %v7424_v6  ;;  %vm8775_vm2 = vmmov %vm8682_vm0  ;;  %v4036_v6 = vsel %vm8713_vm5, 0.0, %v5318_v7 }
 0x129   : > { %v5746_v16 = vpop.f32.mrf.mxu1  ;;  %6045 = vmatmul.mubr.msk.f32.gmra.mxu1 %vm8769_vm3, %v5248_v33  ;;  %6097 = vmatprep.mubr.msk.f32.mxu0 %vm8772_vm14, %v7419_v29  ;;  %v5252_v29 = vld [vmem:[%s6218_s28 + $0x119] sm:$0xff]  ;;  %vm4395_vm5 = vcmask 64512   ;;  %vm4497_vm0 = vcmask 57344   ;;  %s253_s28 = scalar_lea.vmem %s8200_s4, %s8864_s15 }
 0x12a   : > { %v7670_v28 = vadd.f32 %v1841_v55, %v1450_v4  ;;  %v1465_v20 = vadd.f32 %v5746_v16, %v7403_v0  ;;  %6047 = vmatprep.mubr.msk.f32.mxu1 %vm8771_vm12, %v7155_v11  ;;  %v1851_v62 = vpop.f32.mrf.mxu0 }
 0x12b   : > { %v1459_v47 = vpop.f32.mrf.mxu1 }
 0x12c   : > { %v7683_v19 = vadd.f32 %v5796_v58, %v1465_v20  ;;  %v1460_v0 = vadd.f32 %v1459_v47, %v7416_v5  ;;  %v5799_v13 = vpop.f32.mrf.mxu0  ;;  %6098 = vmatmul.mubr.msk.f32.gmra.mxu0 %vm8774_vm13, %v4034_v26 }
 0x12d   : > { %v5749_v43 = vpop.f32.mrf.mxu1  ;;  %6048 = vmatmul.mubr.msk.f32.gmra.mxu1 %vm8773_vm10, %v7168_v17  ;;  %6100 = vmatprep.mubr.msk.f32.mxu0 %vm8776_vm9, %v5317_v46 }
 0x12e   : > { %v7689_v11 = vadd.f32 %v1851_v62, %v1460_v0  ;;  %v1475_v37 = vadd.f32 %v5749_v43, %v7428_v23  ;;  %6050 = vmatprep.mubr.msk.f32.mxu1 %vm8775_vm2, %v5251_v57  ;;  %v1861_v8 = vpop.f32.mrf.mxu0 }
 0x12f   : > { %v1469_v5 = vpop.f32.mrf.mxu1 }
 0x130   : > { %v7697_v31 = vadd.f32 %v5799_v13, %v1475_v37  ;;  %v1470_v17 = vadd.f32 %v1469_v5, %v7442_v39  ;;  %v5802_v35 = vpop.f32.mrf.mxu0  ;;  %6101 = vmatmul.mubr.msk.f32.gmra.mxu0 %vm8778_vm6, %v4036_v6 }
 0x131   : > { %v5752_v9 = vpop.f32.mrf.mxu1  ;;  %6051 = vmatmul.mubr.msk.f32.gmra.mxu1 %vm8777_vm11, %v5252_v29 }
 0x132   : > { %v7702_v23 = vadd.f32 %v1861_v8, %v1470_v17  ;;  %v1485_v15 = vadd.f32 %v5752_v9, %v8779_v48  ;;  %v1871_v38 = vpop.f32.mrf.mxu0 }
 0x133   : > { %v1479_v21 = vpop.f32.mrf.mxu1 }
 0x134   : > { %v7705_v14 = vadd.f32 %v5802_v35, %v1485_v15  ;;  %v1480_v25 = vadd.f32 %v1479_v21, %v8780_v3  ;;  %v5857_v33 = vpop.f32.mrf.mxu0 }
 0x135   : > { %v5807_v53 = vpop.f32.mrf.mxu1 }
 0x136   : > { %v7708_v49 = vadd.f32 %v1871_v38, %v1480_v25  ;;  %v2307_v39 = vadd.f32 %v5807_v53, %v7476_v22  ;;  %v2539_v55 = vpop.f32.mrf.mxu0 }
 0x137   : > { %v2147_v45 = vpop.f32.mrf.mxu1 }
 0x138   : > { %v7711_v4 = vadd.f32 %v5857_v33, %v2307_v39  ;;  %v2306_v16 = vadd.f32 %v2147_v45, %v7481_v34  ;;  %v5860_v20 = vpop.f32.mrf.mxu0 }
 0x139   : > { %v5810_v58 = vpop.f32.mrf.mxu1 }
 0x13a   : > { %v7714_v26 = vadd.f32 %v2539_v55, %v2306_v16  ;;  %v2309_v47 = vadd.f32 %v5810_v58, %v7492_v61  ;;  %v2549_v57 = vpop.f32.mrf.mxu0 }
 0x13b   : > { %v2157_v62 = vpop.f32.mrf.mxu1 }
 0x13c   : > { %v7717_v46 = vadd.f32 %v5860_v20, %v2309_v47  ;;  %v2308_v7 = vadd.f32 %v2157_v62, %v7497_v56  ;;  %v5863_v22 = vpop.f32.mrf.mxu0 }
 0x13d   : > { %v5813_v0 = vpop.f32.mrf.mxu1 }
 0x13e   : > { %v7720_v43 = vadd.f32 %v2549_v57, %v2308_v7  ;;  %v2311_v13 = vadd.f32 %v5813_v0, %v7508_v36  ;;  %v2559_v34 = vpop.f32.mrf.mxu0 }
 0x13f   : > { %v2167_v37 = vpop.f32.mrf.mxu1 }
 0x140   : > { %v7723_v29 = vadd.f32 %v5863_v22, %v2311_v13  ;;  %v2310_v6 = vadd.f32 %v2167_v37, %v7513_v51  ;;  %v5866_v61 = vpop.f32.mrf.mxu0 }
 0x141   : > { %v5816_v5 = vpop.f32.mrf.mxu1 }
 0x142   : > { %v7726_v8 = vadd.f32 %v2559_v34, %v2310_v6  ;;  %v2313_v17 = vadd.f32 %v5816_v5, %v7524_v1  ;;  %v2569_v56 = vpop.f32.mrf.mxu0 }
 0x143   : > { %v2177_v9 = vpop.f32.mrf.mxu1 }
 0x144   : > { %v7729_v35 = vadd.f32 %v5866_v61, %v2313_v17  ;;  %v2312_v48 = vadd.f32 %v2177_v9, %v7529_v59  ;;  %v5869_v36 = vpop.f32.mrf.mxu0 }
 0x145   : > { %v5819_v15 = vpop.f32.mrf.mxu1 }
 0x146   : > { %v7732_v21 = vadd.f32 %v2569_v56, %v2312_v48  ;;  %v2315_v38 = vadd.f32 %v5819_v15, %v7540_v18  ;;  %v2579_v51 = vpop.f32.mrf.mxu0 }
 0x147   : > { %v2187_v3 = vpop.f32.mrf.mxu1 }
 0x148   : > { %v7735_v25 = vadd.f32 %v5869_v36, %v2315_v38  ;;  %v2314_v53 = vadd.f32 %v2187_v3, %v7545_v44  ;;  %v5872_v1 = vpop.f32.mrf.mxu0 }
 0x149   : > { %v5822_v33 = vpop.f32.mrf.mxu1 }
 0x14a   : > { %v7738_v39 = vadd.f32 %v2579_v51, %v2314_v53  ;;  %v2317_v45 = vadd.f32 %v5822_v33, %v7556_v41  ;;  %v2589_v59 = vpop.f32.mrf.mxu0 }
 0x14b   : > { %v2197_v55 = vpop.f32.mrf.mxu1 }
 0x14c   : > { %v7741_v16 = vadd.f32 %v5872_v1, %v2317_v45  ;;  %v2316_v58 = vadd.f32 %v2197_v55, %v7561_v63  ;;  %v5875_v18 = vpop.f32.mrf.mxu0 }
 0x14d   : > { %v5825_v20 = vpop.f32.mrf.mxu1 }
 0x14e   : > { %v7744_v47 = vadd.f32 %v2589_v59, %v2316_v58  ;;  %v2319_v62 = vadd.f32 %v5825_v20, %v7572_v12  ;;  %v2599_v44 = vpop.f32.mrf.mxu0 }
 0x14f   : > { %v2207_v57 = vpop.f32.mrf.mxu1 }
 0x150   : > { %v7747_v7 = vadd.f32 %v5875_v18, %v2319_v62  ;;  %v2318_v0 = vadd.f32 %v2207_v57, %v7577_v60  ;;  %v5878_v41 = vpop.f32.mrf.mxu0 }
 0x151   : > { %v5828_v22 = vpop.f32.mrf.mxu1 }
 0x152   : > { %v7750_v13 = vadd.f32 %v2599_v44, %v2318_v0  ;;  %v2321_v37 = vadd.f32 %v5828_v22, %v7588_v52  ;;  %v2609_v63 = vpop.f32.mrf.mxu0 }
 0x153   : > { %v2217_v34 = vpop.f32.mrf.mxu1 }
 0x154   : > { %v7753_v6 = vadd.f32 %v5878_v41, %v2321_v37  ;;  %v2320_v5 = vadd.f32 %v2217_v34, %v7593_v32  ;;  %v5881_v12 = vpop.f32.mrf.mxu0 }
 0x155   : > { %v5831_v61 = vpop.f32.mrf.mxu1 }
 0x156   : > { %v7756_v17 = vadd.f32 %v2609_v63, %v2320_v5  ;;  %v2323_v9 = vadd.f32 %v5831_v61, %v7604_v27  ;;  %v2619_v60 = vpop.f32.mrf.mxu0 }
 0x157   : > { %v2227_v56 = vpop.f32.mrf.mxu1 }
 0x158   : > { %v7759_v48 = vadd.f32 %v5881_v12, %v2323_v9  ;;  %v2322_v15 = vadd.f32 %v2227_v56, %v7609_v2  ;;  %v5884_v52 = vpop.f32.mrf.mxu0 }
 0x159   : > { %v5834_v36 = vpop.f32.mrf.mxu1 }
 0x15a   : > { %v7762_v38 = vadd.f32 %v2619_v60, %v2322_v15  ;;  %v2325_v3 = vadd.f32 %v5834_v36, %v7620_v50  ;;  %v2629_v32 = vpop.f32.mrf.mxu0 }
 0x15b   : > { %v2237_v51 = vpop.f32.mrf.mxu1 }
 0x15c   : > { %v7765_v53 = vadd.f32 %v5884_v52, %v2325_v3  ;;  %v2324_v33 = vadd.f32 %v2237_v51, %v7625_v24  ;;  %v5887_v27 = vpop.f32.mrf.mxu0 }
 0x15d   : > { %v5837_v1 = vpop.f32.mrf.mxu1 }
 0x15e   : > { %v7768_v45 = vadd.f32 %v2629_v32, %v2324_v33  ;;  %v2327_v55 = vadd.f32 %v5837_v1, %v7636_v42  ;;  %v2639_v2 = vpop.f32.mrf.mxu0 }
 0x15f   : > { %v2247_v59 = vpop.f32.mrf.mxu1 }
 0x160   : > { %v7771_v58 = vadd.f32 %v5887_v27, %v2327_v55  ;;  %v2326_v20 = vadd.f32 %v2247_v59, %v7641_v10  ;;  %v5890_v50 = vpop.f32.mrf.mxu0 }
 0x161   : > { %v5840_v18 = vpop.f32.mrf.mxu1 }
 0x162   : > { %8781 = vst [vmem:[#allocation41_spill] sm:$0xff] %v7771_v58  ;;  %v7774_v62 = vadd.f32 %v2639_v2, %v2326_v20  ;;  %v2329_v57 = vadd.f32 %v5840_v18, %v7652_v30  ;;  %v2649_v24 = vpop.f32.mrf.mxu0 }
 0x163   : > { %v2257_v44 = vpop.f32.mrf.mxu1 }
 0x164   : > { %8782 = vst [vmem:[#allocation46_spill] sm:$0xff] %v7774_v62  ;;  %v7777_v0 = vadd.f32 %v5890_v50, %v2329_v57  ;;  %v2328_v22 = vadd.f32 %v2257_v44, %v7657_v54  ;;  %v5893_v42 = vpop.f32.mrf.mxu0 }
 0x165   : > { %v5843_v41 = vpop.f32.mrf.mxu1 }
 0x166   : > { %8783 = vst [vmem:[#allocation3_spill] sm:$0xff] %v7777_v0  ;;  %v7780_v37 = vadd.f32 %v2649_v24, %v2328_v22  ;;  %v2331_v34 = vadd.f32 %v5843_v41, %v7665_v40  ;;  %v2659_v10 = vpop.f32.mrf.mxu0 }
 0x167   : > { %v2267_v63 = vpop.f32.mrf.mxu1 }
 0x168   : > { %8784 = vst [vmem:[#allocation4_spill] sm:$0xff] %v7780_v37  ;;  %v7783_v5 = vadd.f32 %v5893_v42, %v2331_v34  ;;  %v2330_v61 = vadd.f32 %v2267_v63, %v7670_v28  ;;  %v5896_v30 = vpop.f32.mrf.mxu0 }
 0x169   : > { %v5846_v12 = vpop.f32.mrf.mxu1 }
 0x16a   : > { %8785 = vst [vmem:[#allocation47_spill] sm:$0xff] %v7783_v5  ;;  %v7786_v9 = vadd.f32 %v2659_v10, %v2330_v61  ;;  %v2333_v56 = vadd.f32 %v5846_v12, %v7683_v19  ;;  %v2669_v54 = vpop.f32.mrf.mxu0 }
 0x16b   : > { %v2277_v60 = vpop.f32.mrf.mxu1 }
 0x16c   : > { %8786 = vst [vmem:[#allocation52_spill] sm:$0xff] %v7786_v9  ;;  %v7789_v15 = vadd.f32 %v5896_v30, %v2333_v56  ;;  %v2332_v36 = vadd.f32 %v2277_v60, %v7689_v11  ;;  %v5899_v40 = vpop.f32.mrf.mxu0 }
 0x16d   : > { %v5849_v52 = vpop.f32.mrf.mxu1 }
 0x16e   : > { %8787 = vst [vmem:[#allocation5_spill] sm:$0xff] %v7789_v15  ;;  %v7792_v3 = vadd.f32 %v2669_v54, %v2332_v36  ;;  %v2335_v51 = vadd.f32 %v5849_v52, %v7697_v31  ;;  %v2679_v28 = vpop.f32.mrf.mxu0 }
 0x16f   : > { %v2287_v32 = vpop.f32.mrf.mxu1 }
 0x170   : > { %8788 = vst [vmem:[#allocation6_spill] sm:$0xff] %v7792_v3  ;;  %v7795_v33 = vadd.f32 %v5899_v40, %v2335_v51  ;;  %v2334_v1 = vadd.f32 %v2287_v32, %v7702_v23  ;;  %v5902_v19 = vpop.f32.mrf.mxu0 }
 0x171   : > { %v5852_v27 = vpop.f32.mrf.mxu1 }
 0x172   : > { %8789 = vst [vmem:[#allocation53_spill] sm:$0xff] %v7795_v33  ;;  %v7798_v55 = vadd.f32 %v2679_v28, %v2334_v1  ;;  %v2337_v59 = vadd.f32 %v5852_v27, %v7705_v14  ;;  %v2689_v11 = vpop.f32.mrf.mxu0 }
 0x173   : > { %v2297_v2 = vpop.f32.mrf.mxu1 }
 0x174   : > { %8790 = vst [vmem:[#allocation51_spill] sm:$0xff] %v7798_v55  ;;  %v7801_v20 = vadd.f32 %v5902_v19, %v2337_v59  ;;  %v2336_v18 = vadd.f32 %v2297_v2, %v7708_v49  ;;  %v7804_v31 = vpop.f32.mrf.mxu0 }
 0x175   : > { %v5907_v50 = vpop.f32.mrf.mxu1 }
 0x176   : > { %8791 = vst [vmem:[#allocation57_spill] sm:$0xff] %v7801_v20  ;;  %v7806_v57 = vadd.f32 %v2689_v11, %v2336_v18  ;;  %v7808_v24 = vpop.f32.mrf.mxu0 }
 0x177   : > { %v2963_v44 = vpop.f32.mrf.mxu1 }
 0x178   : > { %8792 = vst [vmem:[#allocation7_spill] sm:$0xff] %v7806_v57  ;;  %v7810_v22 = vpop.f32.mrf.mxu0 }
 0x179   : > { %v5910_v23 = vpop.f32.mrf.mxu1 }
 0x17a   : > { %v7812_v42 = vpop.f32.mrf.mxu0 }
 0x17b   : > { %v2973_v41 = vpop.f32.mrf.mxu1 }
 0x17c   : > { %v7814_v34 = vpop.f32.mrf.mxu0 }
 0x17d   : > { %v5913_v14 = vpop.f32.mrf.mxu1 }
 0x17e   : > { %v7816_v10 = vpop.f32.mrf.mxu0 }
 0x17f   : > { %v2983_v63 = vpop.f32.mrf.mxu1 }
 0x180   : > { %v7818_v61 = vpop.f32.mrf.mxu0 }
 0x181   : > { %v5916_v49 = vpop.f32.mrf.mxu1 }
 0x182   : > { %v7820_v30 = vpop.f32.mrf.mxu0 }
 0x183   : > { %v2993_v12 = vpop.f32.mrf.mxu1 }
 0x184   : > { %v7822_v60 = vpop.f32.mrf.mxu0 }
 0x185   : > { %v5919_v56 = vpop.f32.mrf.mxu1 }
 0x186   : > { %v7824_v36 = vpop.f32.mrf.mxu0 }
 0x187   : > { %v3003_v54 = vpop.f32.mrf.mxu1 }
 0x188   : > { %v7826_v40 = vpop.f32.mrf.mxu0 }
 0x189   : > { %v5922_v52 = vpop.f32.mrf.mxu1 }
 0x18a   : > { %v7828_v32 = vpop.f32.mrf.mxu0 }
 0x18b   : > { %v3013_v51 = vpop.f32.mrf.mxu1 }
 0x18c   : > { %v7830_v1 = vpop.f32.mrf.mxu0 }
 0x18d   : > { %v5925_v28 = vpop.f32.mrf.mxu1 }
 0x18e   : > { %v7834_v19 = vpop.f32.mrf.mxu0 }
 0x18f   : > { %v7832_v27 = vpop.f32.mrf.mxu1  ;;  %8793 = vst [vmem:[#allocation8_spill] sm:$0xff] %v7834_v19 }
 0x190   : > { %v7838_v2 = vpop.f32.mrf.mxu0 }
 0x191   : > { %v7836_v59 = vpop.f32.mrf.mxu1  ;;  %8794 = vst [vmem:[#allocation9_spill] sm:$0xff] %v7838_v2 }
 0x192   : > { %v7842_v18 = vpop.f32.mrf.mxu0 }
 0x193   : > { %v7840_v11 = vpop.f32.mrf.mxu1  ;;  %8795 = vst [vmem:[#allocation10_spill] sm:$0xff] %v7842_v18 }
 0x194   : > { %v7846_v20 = vpop.f32.mrf.mxu0 }
 0x195   : > { %v7844_v57 = vpop.f32.mrf.mxu1  ;;  %8796 = vst [vmem:[#allocation11_spill] sm:$0xff] %v7846_v20 }
 0x196   : > { %v7850_v33 = vpop.f32.mrf.mxu0 }
 0x197   : > { %v7848_v55 = vpop.f32.mrf.mxu1  ;;  %8797 = vst [vmem:[#allocation12_spill] sm:$0xff] %v7850_v33 }
 0x198   : > { %v7854_v15 = vpop.f32.mrf.mxu0 }
 0x199   : > { %v7852_v3 = vpop.f32.mrf.mxu1  ;;  %8798 = vst [vmem:[#allocation64_spill] sm:$0xff] %v7854_v15 }
 0x19a   : > { %v7858_v5 = vpop.f32.mrf.mxu0 }
 0x19b   : > { %v7856_v9 = vpop.f32.mrf.mxu1  ;;  %8799 = vst [vmem:[#allocation13_spill] sm:$0xff] %v7858_v5 }
 0x19c   : > { %v7862_v0 = vpop.f32.mrf.mxu0 }
 0x19d   : > { %v7860_v37 = vpop.f32.mrf.mxu1  ;;  %8801 = vst [vmem:[#allocation15_spill] sm:$0xff] %v7862_v0 }
 0x19e   : > { %8800 = vst [vmem:[#allocation14_spill] sm:$0xff] %v7860_v37  ;;  %v7866_v58 = vpop.f32.mrf.mxu0 }
 0x19f   : > { %v7864_v62 = vpop.f32.mrf.mxu1  ;;  %8803 = vst [vmem:[#allocation18_spill] sm:$0xff] %v7866_v58 }
 0x1a0   : > { %8802 = vst [vmem:[#allocation19_spill] sm:$0xff] %v7864_v62  ;;  %v7870_v18 = vpop.f32.mrf.mxu0 }
 0x1a1   : > { %v7868_v20 = vpop.f32.mrf.mxu1  ;;  %8805 = vst [vmem:[#allocation22_spill] sm:$0xff] %v7870_v18 }
 0x1a2   : > { %8804 = vst [vmem:[#allocation16_spill] sm:$0xff] %v7868_v20  ;;  %v7874_v2 = vpop.f32.mrf.mxu0 }
 0x1a3   : > { %v7872_v33 = vpop.f32.mrf.mxu1  ;;  %8807 = vst [vmem:[#allocation20_spill] sm:$0xff] %v7874_v2 }
 0x1a4   : > { %8806 = vst [vmem:[#allocation17_spill] sm:$0xff] %v7872_v33  ;;  %v7878_v19 = vpop.f32.mrf.mxu0 }
 0x1a5   : > { %v7876_v15 = vpop.f32.mrf.mxu1  ;;  %8809 = vst [vmem:[#allocation25_spill] sm:$0xff] %v7878_v19 }
 0x1a6   : > { %8808 = vst [vmem:[#allocation24_spill] sm:$0xff] %v7876_v15  ;;  %v7882_v37 = vpop.f32.mrf.mxu0 }
 0x1a7   : > { %v7880_v5 = vpop.f32.mrf.mxu1  ;;  %8811 = vst [vmem:[#allocation26_spill] sm:$0xff] %v7882_v37 }
 0x1a8   : > { %8810 = vst [vmem:[#allocation21_spill] sm:$0xff] %v7880_v5  ;;  %v7886_v62 = vpop.f32.mrf.mxu0  ;;  %v3123_v5 = vadd.f32 %v5907_v50, %v7711_v4  ;;  %v3129_v50 = vadd.f32 %v5916_v49, %v7729_v35  ;;  %v3134_v49 = vadd.f32 %v7832_v27, %v7750_v13 }
 0x1a9   : > { %v7884_v0 = vpop.f32.mrf.mxu1  ;;  %8813 = vst [vmem:[#allocation23_spill] sm:$0xff] %v7886_v62  ;;  %v3122_v62 = vadd.f32 %v2963_v44, %v7714_v26  ;;  %v3131_v26 = vadd.f32 %v5919_v56, %v7735_v25 }
 0x1aa   : > { %8812 = vst [vmem:[#allocation28_spill] sm:$0xff] %v7884_v0  ;;  %v7890_v20 = vpop.f32.mrf.mxu0  ;;  %v3548_v4 = vadd.f32 %v7804_v31, %v3123_v5 }
 0x1ab   : > { %v7888_v58 = vpop.f32.mrf.mxu1  ;;  %8815 = vst [vmem:[#allocation31_spill] sm:$0xff] %v7890_v20  ;;  %v3124_v20 = vadd.f32 %v2973_v41, %v7720_v43  ;;  %v3133_v43 = vadd.f32 %v5922_v52, %v7741_v16  ;;  %v3135_v41 = vadd.f32 %v5925_v28, %v7747_v7  ;;  %v3554_v7 = vadd.f32 %v7818_v61, %v3129_v50 }
 0x1ac   : > { %8814 = vst [vmem:[#allocation29_spill] sm:$0xff] %v7888_v58  ;;  %v7894_v33 = vpop.f32.mrf.mxu0  ;;  %v3125_v58 = vadd.f32 %v5910_v23, %v7717_v46  ;;  %v3130_v46 = vadd.f32 %v3003_v54, %v7738_v39  ;;  %v3547_v23 = vadd.f32 %v7808_v24, %v3122_v62  ;;  %v3137_v61 = vadd.f32 %v7836_v59, %v7753_v6  ;;  %v8820_v59 = vld [vmem:[#allocation8_spill] sm:$0xff] }
 0x1ad   : > { %v7892_v18 = vpop.f32.mrf.mxu1  ;;  %8817 = vst [vmem:[#allocation32_spill] sm:$0xff] %v7894_v33  ;;  %v3126_v33 = vadd.f32 %v2983_v63, %v7726_v8  ;;  %v7944_v24 = vadd.f32 %v7826_v40, %v3133_v43  ;;  %v3138_v6 = vadd.f32 %v7848_v55, %v7762_v38  ;;  %v7977_v38 = vadd.f32 %v8820_v59, %v3134_v49  ;;  %v8821_v55 = vld [vmem:[#allocation9_spill] sm:$0xff]  ;;  %v8823_v43 = vld [vmem:[#allocation11_spill] sm:$0xff] }
 0x1ae   : > { %8816 = vst [vmem:[#allocation27_spill] sm:$0xff] %v7892_v18  ;;  %v7898_v19 = vpop.f32.mrf.mxu0  ;;  %v3127_v18 = vadd.f32 %v5913_v14, %v7723_v29  ;;  %v3132_v29 = vadd.f32 %v3013_v51, %v7744_v47  ;;  %v3550_v35 = vadd.f32 %v7810_v22, %v3125_v58 }
 0x1af   : > { %v7896_v2 = vpop.f32.mrf.mxu1  ;;  %v3551_v39 = vadd.f32 %v7816_v10, %v3126_v33  ;;  %v7941_v33 = vadd.f32 %v7824_v36, %v3130_v46 }
 0x1b0   : > { %8818 = vst [vmem:[#allocation34_spill] sm:$0xff] %v7896_v2  ;;  %v7903_v0 = vpop.f32.mrf.mxu0  ;;  %v3552_v25 = vadd.f32 %v7814_v34, %v3127_v18  ;;  %v7947_v22 = vadd.f32 %v7828_v32, %v3132_v29  ;;  %v3140_v32 = vadd.f32 %v7856_v9, %v7768_v45  ;;  %v8822_v45 = vld [vmem:[#allocation10_spill] sm:$0xff] }
 0x1b1   : > { %v7901_v37 = vpop.f32.mrf.mxu1  ;;  %8819 = vst [vmem:[#allocation30_spill] sm:$0xff] %v7903_v0  ;;  %v3128_v0 = vadd.f32 %v2993_v12, %v7732_v21  ;;  %v3549_v21 = vadd.f32 %v7812_v42, %v3124_v20  ;;  %v7938_v20 = vadd.f32 %v7822_v60, %v3131_v26  ;;  %v3136_v12 = vadd.f32 %v7840_v11, %v7756_v17 }
 0x1b2   : > { %v7912_v2 = vpop.f32.mrf.mxu0  ;;  %v3141_v17 = vadd.f32 %v7852_v3, %v7765_v53  ;;  %v7980_v53 = vadd.f32 %v8821_v55, %v3137_v61 }
 0x1b3   : > { %v7910_v15 = vpop.f32.mrf.mxu1  ;;  %v7935_v62 = vadd.f32 %v7820_v30, %v3128_v0  ;;  %v7950_v0 = vadd.f32 %v7830_v1, %v3135_v41  ;;  %v3139_v30 = vadd.f32 %v7844_v57, %v7759_v48  ;;  %v7983_v9 = vadd.f32 %v8822_v45, %v3136_v12  ;;  %v8831_v45 = vld [vmem:[#allocation15_spill] sm:$0xff] }
 0x1b4   : > { %v6057_v44 = vpop.f32.mrf.mxu0 }
 0x1b5   : > { %v6007_v8 = vpop.f32.mrf.mxu1  ;;  %v7986_v29 = vadd.f32 %v8823_v43, %v3139_v30 }
 0x1b6   : > { %v3940_v5 = vadd.f32 %v6007_v8, %v3548_v4  ;;  %v4204_v47 = vpop.f32.mrf.mxu0  ;;  %v8824_v8 = vld [vmem:[#allocation12_spill] sm:$0xff] }
 0x1b7   : > { %v3780_v16 = vpop.f32.mrf.mxu1 }
 0x1b8   : > { %v4364_v58 = vadd.f32 %v6057_v44, %v3940_v5  ;;  %v3939_v31 = vadd.f32 %v3780_v16, %v3547_v23  ;;  %v6060_v14 = vpop.f32.mrf.mxu0  ;;  %v7989_v44 = vadd.f32 %v8824_v8, %v3138_v6  ;;  %v8826_v16 = vld [vmem:[#allocation13_spill] sm:$0xff] }
 0x1b9   : > { %v6010_v42 = vpop.f32.mrf.mxu1 }
 0x1ba   : > { %4397 = vst.msk [vmem:[%s7931_s22 + $0x8] sm:$0xff] %vm4395_vm5, %v4364_v58  ;;  %v4500_v34 = vmul.f32 %v4364_v58, %v4364_v58  ;;  %v4363_v63 = vadd.f32 %v4204_v47, %v3939_v31  ;;  %v3942_v10 = vadd.f32 %v6010_v42, %v3550_v35  ;;  %v4214_v60 = vpop.f32.mrf.mxu0  ;;  %v4429_v54 = vsel %vm4395_vm5, %v4364_v58, 0.0  ;;  %v8827_v31 = vld [vmem:[#allocation41_spill] sm:$0xff]  ;;  %v8828_v42 = vld [vmem:[#allocation14_spill] sm:$0xff] }
 0x1bb   : > { %v3790_v56 = vpop.f32.mrf.mxu1  ;;  %v7998_v47 = vadd.f32 %v8826_v16, %v3140_v32 }
 0x1bc   : > { %4396 = vst.msk [vmem:[%s7931_s22] sm:$0xff] %vm4395_vm5, %v4363_v63  ;;  %v4428_v36 = vsel %vm4395_vm5, %v4363_v63, 0.0  ;;  %v4499_v52 = vmul.f32 %v4363_v63, %v4363_v63  ;;  %v4366_v13 = vadd.f32 %v6060_v14, %v3942_v10  ;;  %v3941_v51 = vadd.f32 %v3790_v56, %v3549_v21  ;;  %v6063_v57 = vpop.f32.mrf.mxu0  ;;  %v8825_v21 = vld [vmem:[#allocation64_spill] sm:$0xff] }
 0x1bd   : > { %v4430_v40 = vadd.f32 %v4429_v54, %v4428_v36  ;;  %v6013_v48 = vpop.f32.mrf.mxu1  ;;  %v4532_v28 = vsel %vm4395_vm5, %v4500_v34, 0.0  ;;  %v3143_v14 = vadd.f32 %v8828_v42, %v8827_v31 }
 0x1be   : > { %v4531_v1 = vsel %vm4395_vm5, %v4499_v52, 0.0  ;;  %4399 = vst.msk [vmem:[%s7931_s22 + $0x18] sm:$0xff] %vm4395_vm5, %v4366_v13  ;;  %v3944_v27 = vadd.f32 %v6013_v48, %v3552_v25  ;;  %v4365_v11 = vadd.f32 %v4214_v60, %v3941_v51  ;;  %v4224_v4 = vpop.f32.mrf.mxu0  ;;  %v4502_v50 = vmul.f32 %v4366_v13, %v4366_v13 }
 0x1bf   : > { %v4533_v3 = vadd.f32 %v4532_v28, %v4531_v1  ;;  %v3800_v18 = vpop.f32.mrf.mxu1  ;;  %v7995_v25 = vadd.f32 %v8825_v21, %v3141_v17  ;;  %v4433_v34 = vsel %vm4395_vm5, %v4366_v13, 0.0 }
 0x1c0   : > { %v4368_v26 = vadd.f32 %v6063_v57, %v3944_v27  ;;  %v3943_v46 = vadd.f32 %v3800_v18, %v3551_v39  ;;  %4398 = vst.msk [vmem:[%s7931_s22 + $0x10] sm:$0xff] %vm4395_vm5, %v4365_v11  ;;  %v4431_v23 = vsel %vm4395_vm5, %v4365_v11, 0.0  ;;  %v4501_v41 = vmul.f32 %v4365_v11, %v4365_v11  ;;  %v6066_v35 = vpop.f32.mrf.mxu0 }
 0x1c1   : > { %v6016_v5 = vpop.f32.mrf.mxu1  ;;  %v4432_v39 = vadd.f32 %v4431_v23, %v4430_v40  ;;  %v4536_v12 = vsel %vm4395_vm5, %v4502_v50, 0.0  ;;  %v8829_v40 = vld [vmem:[#allocation46_spill] sm:$0xff]  ;;  %v8020_v50 = vadd.f32 %v8831_v45, %v3143_v14 }
 0x1c2   : > { %4401 = vst.msk [vmem:[%s7931_s22 + $0x28] sm:$0xff] %vm4395_vm5, %v4368_v26  ;;  %v4367_v58 = vadd.f32 %v4224_v4, %v3943_v46  ;;  %v4534_v63 = vsel %vm4395_vm5, %v4501_v41, 0.0  ;;  %v3946_v10 = vadd.f32 %v6016_v5, %v3554_v7  ;;  %v4234_v61 = vpop.f32.mrf.mxu0  ;;  %v4504_v54 = vmul.f32 %v4368_v26, %v4368_v26  ;;  %v8830_v7 = vld [vmem:[#allocation19_spill] sm:$0xff]  ;;  %v8832_v23 = vld [vmem:[#allocation18_spill] sm:$0xff] }
 0x1c3   : > { %v3810_v49 = vpop.f32.mrf.mxu1  ;;  %v4535_v30 = vadd.f32 %v4534_v63, %v4533_v3  ;;  %v4434_v56 = vadd.f32 %v4433_v34, %v4432_v39  ;;  %v3142_v51 = vadd.f32 %v8830_v7, %v8829_v40  ;;  %v4437_v28 = vsel %vm4395_vm5, %v4368_v26, 0.0  ;;  %v8833_v5 = vld [vmem:[#allocation3_spill] sm:$0xff]  ;;  %v8836_v40 = vld [vmem:[#allocation17_spill] sm:$0xff] }
 0x1c4   : > { %4400 = vst.msk [vmem:[%s7931_s22 + $0x20] sm:$0xff] %vm4395_vm5, %v4367_v58  ;;  %v4435_v60 = vsel %vm4395_vm5, %v4367_v58, 0.0  ;;  %v4503_v36 = vmul.f32 %v4367_v58, %v4367_v58  ;;  %v4370_v52 = vadd.f32 %v6066_v35, %v3946_v10  ;;  %v3945_v6 = vadd.f32 %v3810_v49, %v7935_v62  ;;  %v6069_v17 = vpop.f32.mrf.mxu0  ;;  %v8834_v35 = vld [vmem:[#allocation16_spill] sm:$0xff] }
 0x1c5   : > { %v6019_v13 = vpop.f32.mrf.mxu1  ;;  %v4436_v48 = vadd.f32 %v4435_v60, %v4434_v56  ;;  %v4537_v57 = vadd.f32 %v4536_v12, %v4535_v30  ;;  %v8027_v41 = vadd.f32 %v8832_v23, %v3142_v51  ;;  %v3145_v21 = vadd.f32 %v8834_v35, %v8833_v5  ;;  %v8838_v51 = vld [vmem:[#allocation24_spill] sm:$0xff] }
 0x1c6   : > { %v3948_v32 = vadd.f32 %v6019_v13, %v7938_v20  ;;  %v4538_v1 = vsel %vm4395_vm5, %v4503_v36, 0.0  ;;  %4403 = vst.msk [vmem:[%s7931_s22 + $0x38] sm:$0xff] %vm4395_vm5, %v4370_v52  ;;  %v4506_v27 = vmul.f32 %v4370_v52, %v4370_v52  ;;  %v4369_v59 = vadd.f32 %v4234_v61, %v3945_v6  ;;  %v4244_v62 = vpop.f32.mrf.mxu0 }
 0x1c7   : > { %v3820_v55 = vpop.f32.mrf.mxu1  ;;  %v4539_v3 = vadd.f32 %v4538_v1, %v4537_v57  ;;  %v4438_v11 = vadd.f32 %v4437_v28, %v4436_v48  ;;  %v4540_v20 = vsel %vm4395_vm5, %v4504_v54, 0.0  ;;  %v4441_v39 = vsel %vm4395_vm5, %v4370_v52, 0.0 }
 0x1c8   : > { %v4372_v18 = vadd.f32 %v6069_v17, %v3948_v32  ;;  %v3947_v4 = vadd.f32 %v3820_v55, %v7941_v33  ;;  %4402 = vst.msk [vmem:[%s7931_s22 + $0x30] sm:$0xff] %vm4395_vm5, %v4369_v59  ;;  %v4439_v26 = vsel %vm4395_vm5, %v4369_v59, 0.0  ;;  %v4505_v46 = vmul.f32 %v4369_v59, %v4369_v59  ;;  %v6072_v8 = vpop.f32.mrf.mxu0  ;;  %v8835_v17 = vld [vmem:[#allocation4_spill] sm:$0xff] }
 0x1c9   : > { %v6022_v43 = vpop.f32.mrf.mxu1  ;;  %v4440_v33 = vadd.f32 %v4439_v26, %v4438_v11  ;;  %v4541_v16 = vadd.f32 %v4540_v20, %v4539_v3  ;;  %v4544_v63 = vsel %vm4395_vm5, %v4506_v27, 0.0  ;;  %v3144_v7 = vadd.f32 %v8836_v40, %v8835_v17 }
 0x1ca   : > { %4405 = vst.msk [vmem:[%s7931_s22 + $0x48] sm:$0xff] %vm4395_vm5, %v4372_v18  ;;  %v4542_v58 = vsel %vm4395_vm5, %v4505_v46, 0.0  ;;  %v4371_v31 = vadd.f32 %v4244_v62, %v3947_v4  ;;  %v3950_v42 = vadd.f32 %v6022_v43, %v7944_v24  ;;  %v4254_v34 = vpop.f32.mrf.mxu0  ;;  %v4508_v12 = vmul.f32 %v4372_v18, %v4372_v18 }
 0x1cb   : > { %v3830_v14 = vpop.f32.mrf.mxu1  ;;  %v4543_v10 = vadd.f32 %v4542_v58, %v4541_v16  ;;  %v4442_v49 = vadd.f32 %v4441_v39, %v4440_v33  ;;  %v4445_v57 = vsel %vm4395_vm5, %v4372_v18, 0.0 }
 0x1cc   : > { %v3949_v61 = vadd.f32 %v3830_v14, %v7947_v22  ;;  %4404 = vst.msk [vmem:[%s7931_s22 + $0x40] sm:$0xff] %vm4395_vm5, %v4371_v31  ;;  %v4443_v30 = vsel %vm4395_vm5, %v4371_v31, 0.0  ;;  %v4507_v56 = vmul.f32 %v4371_v31, %v4371_v31  ;;  %v4374_v60 = vadd.f32 %v6072_v8, %v3950_v42  ;;  %v6075_v36 = vpop.f32.mrf.mxu0  ;;  %v8837_v22 = vld [vmem:[#allocation47_spill] sm:$0xff]  ;;  %v8839_v8 = vld [vmem:[#allocation22_spill] sm:$0xff]  ;;  %v8840_v14 = vld [vmem:[#allocation20_spill] sm:$0xff] }
 0x1cd   : > { %v6025_v54 = vpop.f32.mrf.mxu1  ;;  %v4444_v24 = vadd.f32 %v4443_v30, %v4442_v49  ;;  %v4545_v52 = vadd.f32 %v4544_v63, %v4543_v10  ;;  %v3147_v48 = vadd.f32 %v8838_v51, %v8837_v22  ;;  %v4548_v62 = vsel %vm4395_vm5, %v4508_v12, 0.0  ;;  %v8842_v30 = vld [vmem:[#allocation52_spill] sm:$0xff] }
 0x1ce   : > { %v4373_v6 = vadd.f32 %v4254_v34, %v3949_v61  ;;  %v3952_v13 = vadd.f32 %v6025_v54, %v7950_v0  ;;  %v4546_v32 = vsel %vm4395_vm5, %v4507_v56, 0.0  ;;  %4407 = vst.msk [vmem:[%s7931_s22 + $0x58] sm:$0xff] %vm4395_vm5, %v4374_v60  ;;  %v4264_v1 = vpop.f32.mrf.mxu0  ;;  %v4510_v3 = vmul.f32 %v4374_v60, %v4374_v60  ;;  %v8841_v61 = vld [vmem:[#allocation25_spill] sm:$0xff] }
 0x1cf   : > { %v3840_v28 = vpop.f32.mrf.mxu1  ;;  %v4547_v27 = vadd.f32 %v4546_v32, %v4545_v52  ;;  %v4446_v59 = vadd.f32 %v4445_v57, %v4444_v24  ;;  %v8058_v23 = vadd.f32 %v8839_v8, %v3145_v21  ;;  %v4449_v5 = vsel %vm4395_vm5, %v4374_v60, 0.0  ;;  %v8843_v56 = vld [vmem:[#allocation21_spill] sm:$0xff] }
 0x1d0   : > { %4406 = vst.msk [vmem:[%s7931_s22 + $0x50] sm:$0xff] %vm4395_vm5, %v4373_v6  ;;  %v4447_v0 = vsel %vm4395_vm5, %v4373_v6, 0.0  ;;  %v4509_v55 = vmul.f32 %v4373_v6, %v4373_v6  ;;  %v4376_v11 = vadd.f32 %v6075_v36, %v3952_v13  ;;  %v3951_v18 = vadd.f32 %v3840_v28, %v7977_v38  ;;  %v6078_v45 = vpop.f32.mrf.mxu0 }
 0x1d1   : > { %v6028_v4 = vpop.f32.mrf.mxu1  ;;  %v4448_v20 = vadd.f32 %v4447_v0, %v4446_v59  ;;  %v4549_v26 = vadd.f32 %v4548_v62, %v4547_v27  ;;  %v8065_v34 = vadd.f32 %v8840_v14, %v3144_v7  ;;  %v8072_v12 = vadd.f32 %v8841_v61, %v3147_v48  ;;  %v8844_v62 = vld [vmem:[#allocation5_spill] sm:$0xff] }
 0x1d2   : > { %v4550_v46 = vsel %vm4395_vm5, %v4509_v55, 0.0  ;;  %v3954_v43 = vadd.f32 %v6028_v4, %v7980_v53  ;;  %4409 = vst.msk [vmem:[%s7931_s22 + $0x68] sm:$0xff] %vm4395_vm5, %v4376_v11  ;;  %v4512_v35 = vmul.f32 %v4376_v11, %v4376_v11  ;;  %v4375_v33 = vadd.f32 %v4264_v1, %v3951_v18  ;;  %v4274_v38 = vpop.f32.mrf.mxu0  ;;  %v8847_v18 = vld [vmem:[#allocation29_spill] sm:$0xff] }
 0x1d3   : > { %v3850_v16 = vpop.f32.mrf.mxu1  ;;  %v4551_v39 = vadd.f32 %v4550_v46, %v4549_v26  ;;  %v4450_v58 = vadd.f32 %v4449_v5, %v4448_v20  ;;  %v4552_v53 = vsel %vm4395_vm5, %v4510_v3, 0.0  ;;  %v3146_v60 = vadd.f32 %v8843_v56, %v8842_v30  ;;  %v8845_v3 = vld [vmem:[#allocation28_spill] sm:$0xff] }
 0x1d4   : > { %v4378_v31 = vadd.f32 %v6078_v45, %v3954_v43  ;;  %v3953_v42 = vadd.f32 %v3850_v16, %v7983_v9  ;;  %4408 = vst.msk [vmem:[%s7931_s22 + $0x60] sm:$0xff] %vm4395_vm5, %v4375_v33  ;;  %v4451_v21 = vsel %vm4395_vm5, %v4375_v33, 0.0  ;;  %v4511_v63 = vmul.f32 %v4375_v33, %v4375_v33  ;;  %v6081_v49 = vpop.f32.mrf.mxu0 }
 0x1d5   : > { %v6031_v10 = vpop.f32.mrf.mxu1  ;;  %v4452_v9 = vadd.f32 %v4451_v21, %v4450_v58  ;;  %v4553_v54 = vadd.f32 %v4552_v53, %v4551_v39  ;;  %v4453_v36 = vsel %vm4395_vm5, %v4376_v11, 0.0  ;;  %v4556_v40 = vsel %vm4395_vm5, %v4512_v35, 0.0  ;;  %v8848_v21 = vld [vmem:[#allocation26_spill] sm:$0xff] }
 0x1d6   : > { %4411 = vst.msk [vmem:[%s7931_s22 + $0x78] sm:$0xff] %vm4395_vm5, %v4378_v31  ;;  %v4554_v24 = vsel %vm4395_vm5, %v4511_v63, 0.0  ;;  %v4377_v52 = vadd.f32 %v4274_v38, %v3953_v42  ;;  %v3956_v6 = vadd.f32 %v6031_v10, %v7986_v29  ;;  %v4284_v17 = vpop.f32.mrf.mxu0  ;;  %v4514_v48 = vmul.f32 %v4378_v31, %v4378_v31 }
 0x1d7   : > { %v3860_v13 = vpop.f32.mrf.mxu1  ;;  %v4555_v7 = vadd.f32 %v4554_v24, %v4553_v54  ;;  %v4454_v22 = vadd.f32 %v4453_v36, %v4452_v9  ;;  %v3149_v11 = vadd.f32 %v8845_v3, %v8844_v62  ;;  %v4457_v45 = vsel %vm4395_vm5, %v4378_v31, 0.0  ;;  %v8849_v24 = vld [vmem:[#allocation23_spill] sm:$0xff] }
 0x1d8   : > { %v3955_v51 = vadd.f32 %v3860_v13, %v7989_v44  ;;  %4410 = vst.msk [vmem:[%s7931_s22 + $0x70] sm:$0xff] %vm4395_vm5, %v4377_v52  ;;  %v4455_v57 = vsel %vm4395_vm5, %v4377_v52, 0.0  ;;  %v4513_v32 = vmul.f32 %v4377_v52, %v4377_v52  ;;  %v4380_v28 = vadd.f32 %v6081_v49, %v3956_v6  ;;  %v6084_v27 = vpop.f32.mrf.mxu0  ;;  %v8846_v44 = vld [vmem:[#allocation6_spill] sm:$0xff] }
 0x1d9   : > { %v6034_v1 = vpop.f32.mrf.mxu1  ;;  %v4456_v29 = vadd.f32 %v4455_v57, %v4454_v22  ;;  %v4557_v59 = vadd.f32 %v4556_v40, %v4555_v7  ;;  %v3148_v4 = vadd.f32 %v8847_v18, %v8846_v44  ;;  %v4560_v35 = vsel %vm4395_vm5, %v4514_v48, 0.0  ;;  %v8850_v40 = vld [vmem:[#allocation31_spill] sm:$0xff]  ;;  %v8851_v22 = vld [vmem:[#allocation53_spill] sm:$0xff] }
 0x1da   : > { %v4379_v0 = vadd.f32 %v4284_v17, %v3955_v51  ;;  %v3958_v55 = vadd.f32 %v6034_v1, %v7995_v25  ;;  %v4558_v20 = vsel %vm4395_vm5, %v4513_v32, 0.0  ;;  %4413 = vst.msk [vmem:[%s7931_s22 + $0x88] sm:$0xff] %vm4395_vm5, %v4380_v28  ;;  %v4294_v46 = vpop.f32.mrf.mxu0  ;;  %v4516_v33 = vmul.f32 %v4380_v28, %v4380_v28  ;;  %v8852_v51 = vld [vmem:[#allocation27_spill] sm:$0xff] }
 0x1db   : > { %v3870_v26 = vpop.f32.mrf.mxu1  ;;  %v4559_v43 = vadd.f32 %v4558_v20, %v4557_v59  ;;  %v4458_v8 = vadd.f32 %v4457_v45, %v4456_v29  ;;  %v3571_v63 = vadd.f32 %v8848_v21, %v3146_v60  ;;  %v4461_v10 = vsel %vm4395_vm5, %v4380_v28, 0.0 }
 0x1dc   : > { %4412 = vst.msk [vmem:[%s7931_s22 + $0x80] sm:$0xff] %vm4395_vm5, %v4379_v0  ;;  %v4459_v25 = vsel %vm4395_vm5, %v4379_v0, 0.0  ;;  %v4515_v5 = vmul.f32 %v4379_v0, %v4379_v0  ;;  %v4382_v16 = vadd.f32 %v6084_v27, %v3958_v55  ;;  %v3957_v38 = vadd.f32 %v3870_v26, %v7998_v47  ;;  %v6087_v58 = vpop.f32.mrf.mxu0 }
 0x1dd   : > { %v6037_v39 = vpop.f32.mrf.mxu1  ;;  %v4460_v31 = vadd.f32 %v4459_v25, %v4458_v8  ;;  %v4561_v42 = vadd.f32 %v4560_v35, %v4559_v43  ;;  %v3574_v52 = vadd.f32 %v8849_v24, %v3149_v11  ;;  %v3573_v7 = vadd.f32 %v8850_v40, %v3148_v4  ;;  %v8853_v8 = vld [vmem:[#allocation51_spill] sm:$0xff]  ;;  %v8854_v25 = vld [vmem:[#allocation34_spill] sm:$0xff] }
 0x1de   : > { %v4562_v14 = vsel %vm4395_vm5, %v4515_v5, 0.0  ;;  %v3960_v53 = vadd.f32 %v6037_v39, %v8020_v50  ;;  %4415 = vst.msk [vmem:[%s7931_s22 + $0x98] sm:$0xff] %vm4395_vm5, %v4382_v16  ;;  %v4518_v49 = vmul.f32 %v4382_v16, %v4382_v16  ;;  %v4381_v61 = vadd.f32 %v4294_v46, %v3957_v38  ;;  %v4304_v56 = vpop.f32.mrf.mxu0 }
 0x1df   : > { %v3880_v30 = vpop.f32.mrf.mxu1  ;;  %v4563_v47 = vadd.f32 %v4562_v14, %v4561_v42  ;;  %v4462_v9 = vadd.f32 %v4461_v10, %v4460_v31  ;;  %v4564_v50 = vsel %vm4395_vm5, %v4516_v33, 0.0  ;;  %v3151_v48 = vadd.f32 %v8852_v51, %v8851_v22 }
 0x1e0   : > { %v4384_v54 = vadd.f32 %v6087_v58, %v3960_v53  ;;  %v3959_v36 = vadd.f32 %v3880_v30, %v8027_v41  ;;  %4414 = vst.msk [vmem:[%s7931_s22 + $0x90] sm:$0xff] %vm4395_vm5, %v4381_v61  ;;  %v4463_v60 = vsel %vm4395_vm5, %v4381_v61, 0.0  ;;  %v4517_v6 = vmul.f32 %v4381_v61, %v4381_v61  ;;  %v6090_v17 = vpop.f32.mrf.mxu0 }
 0x1e1   : > { %v6040_v13 = vpop.f32.mrf.mxu1  ;;  %v4464_v57 = vadd.f32 %v4463_v60, %v4462_v9  ;;  %v4565_v32 = vadd.f32 %v4564_v50, %v4563_v47  ;;  %v4465_v41 = vsel %vm4395_vm5, %v4382_v16, 0.0  ;;  %v4568_v0 = vsel %vm4395_vm5, %v4518_v49, 0.0  ;;  %v8856_v9 = vld [vmem:[#allocation32_spill] sm:$0xff] }
 0x1e2   : > { %4417 = vst.msk [vmem:[%s7931_s22 + $0xa8] sm:$0xff] %vm4395_vm5, %v4384_v54  ;;  %v4566_v28 = vsel %vm4395_vm5, %v4517_v6, 0.0  ;;  %v4383_v1 = vadd.f32 %v4304_v56, %v3959_v36  ;;  %v3962_v27 = vadd.f32 %v6040_v13, %v8058_v23  ;;  %v4314_v59 = vpop.f32.mrf.mxu0  ;;  %v4520_v11 = vmul.f32 %v4384_v54, %v4384_v54 }
 0x1e3   : > { %v3890_v29 = vpop.f32.mrf.mxu1  ;;  %v4567_v55 = vadd.f32 %v4566_v28, %v4565_v32  ;;  %v4466_v62 = vadd.f32 %v4465_v41, %v4464_v57  ;;  %v3150_v5 = vadd.f32 %v8854_v25, %v8853_v8  ;;  %v4469_v33 = vsel %vm4395_vm5, %v4384_v54, 0.0  ;;  %v8857_v41 = vld [vmem:[#allocation30_spill] sm:$0xff] }
 0x1e4   : > { %v3961_v3 = vadd.f32 %v3890_v29, %v8065_v34  ;;  %4416 = vst.msk [vmem:[%s7931_s22 + $0xa0] sm:$0xff] %vm4395_vm5, %v4383_v1  ;;  %v4467_v44 = vsel %vm4395_vm5, %v4383_v1, 0.0  ;;  %v4519_v18 = vmul.f32 %v4383_v1, %v4383_v1  ;;  %v4386_v4 = vadd.f32 %v6090_v17, %v3962_v27  ;;  %v6093_v20 = vpop.f32.mrf.mxu0  ;;  %v8855_v34 = vld [vmem:[#allocation57_spill] sm:$0xff]  ;;  %v8858_v1 = vld [vmem:[#allocation7_spill] sm:$0xff] }
 0x1e5   : > { %v6043_v45 = vpop.f32.mrf.mxu1  ;;  %v4468_v23 = vadd.f32 %v4467_v44, %v4466_v62  ;;  %v4569_v26 = vadd.f32 %v4568_v0, %v4567_v55  ;;  %v3153_v35 = vadd.f32 %v7901_v37, %v8855_v34  ;;  %v4572_v14 = vsel %vm4395_vm5, %v4520_v11, 0.0 }
 0x1e6   : > { %v4385_v46 = vadd.f32 %v4314_v59, %v3961_v3  ;;  %v3964_v43 = vadd.f32 %v6043_v45, %v8072_v12  ;;  %v4570_v16 = vsel %vm4395_vm5, %v4519_v18, 0.0  ;;  %4419 = vst.msk [vmem:[%s7931_s22 + $0xb8] sm:$0xff] %vm4395_vm5, %v4386_v4  ;;  %v4324_v39 = vpop.f32.mrf.mxu0  ;;  %v4522_v53 = vmul.f32 %v4386_v4, %v4386_v4 }
 0x1e7   : > { %v3900_v38 = vpop.f32.mrf.mxu1  ;;  %v4571_v58 = vadd.f32 %v4570_v16, %v4569_v26  ;;  %v4470_v31 = vadd.f32 %v4469_v33, %v4468_v23  ;;  %v3576_v54 = vadd.f32 %v8856_v9, %v3151_v48  ;;  %v4473_v36 = vsel %vm4395_vm5, %v4386_v4, 0.0 }
 0x1e8   : > { %4418 = vst.msk [vmem:[%s7931_s22 + $0xb0] sm:$0xff] %vm4395_vm5, %v4385_v46  ;;  %v4471_v12 = vsel %vm4395_vm5, %v4385_v46, 0.0  ;;  %v4521_v42 = vmul.f32 %v4385_v46, %v4385_v46  ;;  %v4388_v37 = vadd.f32 %v6093_v20, %v3964_v43  ;;  %v3963_v21 = vadd.f32 %v3900_v38, %v3571_v63  ;;  %v6096_v49 = vpop.f32.mrf.mxu0 }
 0x1e9   : > { %v6046_v10 = vpop.f32.mrf.mxu1  ;;  %v4472_v61 = vadd.f32 %v4471_v12, %v4470_v31  ;;  %v4573_v30 = vadd.f32 %v4572_v14, %v4571_v58  ;;  %v3575_v22 = vadd.f32 %v7898_v19, %v3150_v5  ;;  %v4576_v51 = vsel %vm4395_vm5, %v4522_v53, 0.0 }
 0x1ea   : > { %v4574_v56 = vsel %vm4395_vm5, %v4521_v42, 0.0  ;;  %v3966_v47 = vadd.f32 %v6046_v10, %v3574_v52  ;;  %4421 = vst.msk [vmem:[%s7931_s22 + $0xc8] sm:$0xff] %vm4395_vm5, %v4388_v37  ;;  %v4524_v24 = vmul.f32 %v4388_v37, %v4388_v37  ;;  %v4387_v50 = vadd.f32 %v4324_v39, %v3963_v21  ;;  %v4334_v6 = vpop.f32.mrf.mxu0 }
 0x1eb   : > { %v3910_v60 = vpop.f32.mrf.mxu1  ;;  %v4575_v63 = vadd.f32 %v4574_v56, %v4573_v30  ;;  %v4474_v13 = vadd.f32 %v4473_v36, %v4472_v61  ;;  %v3578_v28 = vadd.f32 %v8857_v41, %v3153_v35  ;;  %v3152_v27 = vadd.f32 %v7910_v15, %v8858_v1 }
 0x1ec   : > { %v4390_v17 = vadd.f32 %v6096_v49, %v3966_v47  ;;  %v3965_v40 = vadd.f32 %v3910_v60, %v3573_v7  ;;  %4420 = vst.msk [vmem:[%s7931_s22 + $0xc0] sm:$0xff] %vm4395_vm5, %v4387_v50  ;;  %v4475_v52 = vsel %vm4395_vm5, %v4387_v50, 0.0  ;;  %v4523_v48 = vmul.f32 %v4387_v50, %v4387_v50  ;;  %v6099_v32 = vpop.f32.mrf.mxu0 }
 0x1ed   : > { %v6049_v57 = vpop.f32.mrf.mxu1  ;;  %v4476_v29 = vadd.f32 %v4475_v52, %v4474_v13  ;;  %v4577_v59 = vadd.f32 %v4576_v51, %v4575_v63  ;;  %v4477_v19 = vsel %vm4395_vm5, %v4388_v37, 0.0  ;;  %v4580_v11 = vsel %vm4395_vm5, %v4524_v24, 0.0 }
 0x1ee   : > { %4423 = vst.msk [vmem:[%s7931_s22 + $0xd8] sm:$0xff] %vm4395_vm5, %v4390_v17  ;;  %v4578_v7 = vsel %vm4395_vm5, %v4523_v48, 0.0  ;;  %v4389_v0 = vadd.f32 %v4334_v6, %v3965_v40  ;;  %v3968_v55 = vadd.f32 %v6049_v57, %v3576_v54  ;;  %v4344_v3 = vpop.f32.mrf.mxu0  ;;  %v4526_v45 = vmul.f32 %v4390_v17, %v4390_v17 }
 0x1ef   : > { %v3920_v62 = vpop.f32.mrf.mxu1  ;;  %v4579_v44 = vadd.f32 %v4578_v7, %v4577_v59  ;;  %v4478_v18 = vadd.f32 %v4477_v19, %v4476_v29  ;;  %v3577_v34 = vadd.f32 %v7912_v2, %v3152_v27  ;;  %v4481_v35 = vsel %vm4395_vm5, %v4390_v17, 0.0 }
 0x1f0   : > { %v3967_v4 = vadd.f32 %v3920_v62, %v3575_v22  ;;  %4422 = vst.msk [vmem:[%s7931_s22 + $0xd0] sm:$0xff] %vm4395_vm5, %v4389_v0  ;;  %v4479_v15 = vsel %vm4395_vm5, %v4389_v0, 0.0  ;;  %v4525_v20 = vmul.f32 %v4389_v0, %v4389_v0  ;;  %v4392_v23 = vadd.f32 %v6099_v32, %v3968_v55  ;;  %v6102_v5 = vpop.f32.mrf.mxu0 }
 0x1f1   : > { %v6052_v26 = vpop.f32.mrf.mxu1  ;;  %v4480_v46 = vadd.f32 %v4479_v15, %v4478_v18  ;;  %v4581_v43 = vadd.f32 %v4580_v11, %v4579_v44  ;;  %v4584_v12 = vsel %vm4395_vm5, %v4526_v45, 0.0 }
 0x1f2   : > { %v4391_v8 = vadd.f32 %v4344_v3, %v3967_v4  ;;  %v3970_v25 = vadd.f32 %v6052_v26, %v3578_v28  ;;  %v4582_v33 = vsel %vm4395_vm5, %v4525_v20, 0.0  ;;  %4425 = vst.msk [vmem:[%s7931_s22 + $0xe8] sm:$0xff] %vm4395_vm5, %v4392_v23  ;;  %v4528_v42 = vmul.f32 %v4392_v23, %v4392_v23  ;;  %v4354_v10 = vpop.f32.mrf.mxu0 }
 0x1f3   : > { %v3930_v16 = vpop.f32.mrf.mxu1  ;;  %v4583_v38 = vadd.f32 %v4582_v33, %v4581_v43  ;;  %v4482_v39 = vadd.f32 %v4481_v35, %v4480_v46  ;;  %v4485_v49 = vsel %vm4395_vm5, %v4392_v23, 0.0 }
 0x1f4   : > { %4424 = vst.msk [vmem:[%s7931_s22 + $0xe0] sm:$0xff] %vm4395_vm5, %v4391_v8  ;;  %v4483_v58 = vsel %vm4395_vm5, %v4391_v8, 0.0  ;;  %v4527_v31 = vmul.f32 %v4391_v8, %v4391_v8  ;;  %v4394_v2 = vadd.f32 %v6102_v5, %v3970_v25  ;;  %v3969_v14 = vadd.f32 %v3930_v16, %v3577_v34 }
 0x1f5   : > { %v4484_v53 = vadd.f32 %v4483_v58, %v4482_v39  ;;  %v4585_v37 = vadd.f32 %v4584_v12, %v4583_v38  ;;  %v4588_v47 = vsel %vm4395_vm5, %v4528_v42, 0.0 }
 0x1f6   : > { %v4586_v21 = vsel %vm4395_vm5, %v4527_v31, 0.0  ;;  %4427 = vst.msk [vmem:[%s7931_s22 + $0xf8] sm:$0xff] %vm4395_vm5, %v4394_v2  ;;  %v4393_v61 = vadd.f32 %v4354_v10, %v3969_v14  ;;  %v4530_v9 = vmul.f32 %v4394_v2, %v4394_v2  ;;  %v4489_v60 = vsel %vm4395_vm5, %v4394_v2, 0.0 }
 0x1f7   : > { %v4587_v30 = vadd.f32 %v4586_v21, %v4585_v37  ;;  %v4486_v56 = vadd.f32 %v4485_v49, %v4484_v53 }
 0x1f8   : > { %4426 = vst.msk [vmem:[%s7931_s22 + $0xf0] sm:$0xff] %vm4395_vm5, %v4393_v61  ;;  %v4487_v54 = vsel %vm4395_vm5, %v4393_v61, 0.0  ;;  %v4529_v36 = vmul.f32 %v4393_v61, %v4393_v61  ;;  %v4592_v17 = vsel %vm4395_vm5, %v4530_v9, 0.0 }
 0x1f9   : > { %v4488_v24 = vadd.f32 %v4487_v54, %v4486_v56  ;;  %v4589_v50 = vadd.f32 %v4588_v47, %v4587_v30 }
 0x1fa   : > { %v4590_v6 = vsel %vm4395_vm5, %v4529_v36, 0.0 }
 0x1fb   : > { %v4490_v63 = vadd.f32 %v4489_v60, %v4488_v24  ;;  %v4591_v13 = vadd.f32 %v4590_v6, %v4589_v50 }
 0x1fd   : > { %v4491_v40 = vrot.slane %v4490_v63, 4  ;;  %v4593_v22 = vadd.f32 %v4592_v17, %v4591_v13 }
 0x1ff   : > { %v4492_v51 = vadd.f32 %v4491_v40, %v4490_v63  ;;  %v4594_v52 = vrot.slane %v4593_v22, 4 }
 0x201   : > { %v4493_v48 = vrot.slane %v4492_v51, 2  ;;  %v4595_v57 = vadd.f32 %v4594_v52, %v4593_v22 }
 0x203   : > { %v4494_v32 = vadd.f32 %v4493_v48, %v4492_v51  ;;  %v4596_v41 = vrot.slane %v4595_v57, 2 }
 0x205   : > { %v4495_v28 = vrot.slane %v4494_v32, 1  ;;  %v4597_v1 = vadd.f32 %v4596_v41, %v4595_v57 }
 0x207   : > { %v4496_v27 = vadd.f32 %v4495_v28, %v4494_v32  ;;  %v4598_v29 = vrot.slane %v4597_v1, 1 }
 0x209   : > { %4498 = vst.msk [vmem:[%s247_s25] sm:$0x1] %vm4497_vm0, %v4496_v27  ;;  %v4599_v59 = vadd.f32 %v4598_v29, %v4597_v1 }
 0x20b   : > { %4600 = vst.msk [vmem:[%s253_s28] sm:$0x1] %vm4497_vm0, %v4599_v59 }
 0x20c PF: > { %s15_s17 = sadd.s32 1, %s6152_s17   ;;  %s8859_s15 = smov %s6148_s16 }
 0x20d   : > { %p12_p5 = scmp.ge.s32.totalorder %s15_s17, 4   ;;  %s8860_s16 = smov %s8862_s18 }
 0x20f   :  { %14 = sbr.rel (!%p12_p5) target bundleno = 2 (0x2), region = 99 }

</bundles_post_ra>
